<compile_context>
chip_gen: v5e
topology: v5e:2x2
jax: 0.10.0
libtpu: 0.0.40
codegen_flags: <defaults>
</compile_context>

<pallas_src>
import functools

import jax
import jax.numpy as jnp
from jax.experimental import pallas as pl
from jax.experimental.pallas import tpu as pltpu

# ----------------------------- configuration --------------------------------
D_MODEL = 128          # d_model
NHEAD = 8              # nhead
DIM_FF = 256           # dim_feedforward (small, lane-dense)
LN_EPS = 1e-5          # PyTorch LayerNorm default eps
MASK_NEG = -1e30       # additive key-padding mask value (f32-safe; note: a query
                       # whose keys are ALL masked gets a uniform distribution
                       # instead of PyTorch's NaN -- benign for DETR usage)


# ----------------------------- Pallas kernel ---------------------------------
def _decoder_layer_kernel(
    tgt_ref, mem_ref, qpos_ref, pos_ref, kpm_ref,
    sa_wi_ref, sa_bi_ref, sa_wo_ref, sa_bo_ref,
    ca_wi_ref, ca_bi_ref, ca_wo_ref, ca_bo_ref,
    ff_w1_ref, ff_b1_ref, ff_w2_ref, ff_b2_ref,
    ln_ref, out_ref, *, nhead):
    """Bb batch elements of TransformerDecoderLayer.forward_post (eval mode)."""
    bb, T, d_model = tgt_ref.shape
    S = mem_ref.shape[1]
    hd = d_model // nhead
    scale = float(hd) ** -0.5
    M = bb * T

    f32 = jnp.float32
    bf16 = jnp.bfloat16

    # --- stacked activation slabs (leading-dim reshapes are layout-free) -----
    tgt_bf = tgt_ref[...].reshape(M, d_model)                  # bf16
    qpos_f = qpos_ref[...].reshape(M, d_model).astype(f32)
    mem_bf = mem_ref[...].reshape(bb * S, d_model)             # bf16
    pos_f = pos_ref[...].reshape(bb * S, d_model).astype(f32)
    kpm = kpm_ref[...]                                         # (Bb, 1, S) additive, f32
    ln = ln_ref[...]                                           # (6, D) [g1,b1,g2,b2,g3,b3]

    x0 = tgt_bf.astype(f32)                                    # residual stream in f32
    mem_f = mem_bf.astype(f32)

    def layer_norm(x, g, b):
        mu = jnp.mean(x, axis=-1, keepdims=True)
        var = jnp.mean(jnp.square(x - mu), axis=-1, keepdims=True)
        return (x - mu) * jax.lax.rsqrt(var + LN_EPS) * g + b

    def attention_core(q, k, v, tq, tk, add_mask):
        # q: (Bb*tq, D) f32 (already scaled); k, v: (Bb*tk, D) f32.
        # bf16 inputs -> single-pass MXU; f32 accumulation & softmax math.
        q3 = q.astype(bf16).reshape(bb, tq, d_model)
        k3 = k.astype(bf16).reshape(bb, tk, d_model)
        v3 = v.astype(bf16).reshape(bb, tk, d_model)
        ctx_heads = []
        for h in range(nhead):
            sl = slice(h * hd, (h + 1) * hd)
            s = jnp.einsum('bqd,bkd->bqk', q3[:, :, sl], k3[:, :, sl],
                           preferred_element_type=f32)          # (Bb, tq, tk)
            if add_mask is not None:
                s = s + add_mask
            s = s - jnp.max(s, axis=-1, keepdims=True)
            e = jnp.exp(s)
            p = e * pl.reciprocal(jnp.sum(e, axis=-1, keepdims=True), approx=True)
            # TODO(synk): attention-weight dropout (p=0.1) is identity in eval mode.
            ctx_heads.append(
                jnp.einsum('bqk,bkd->bqd', p.astype(bf16), v3[:, :, sl],
                           preferred_element_type=f32))          # (Bb, tq, hd)
        # Lane-concatenate heads, then ONE K=d_model output projection.
        ctx = jnp.concatenate(ctx_heads, axis=-1)                # (Bb, tq, D) f32
        return ctx.reshape(bb * tq, d_model)

    def out_proj(ctx, wo_ref, bo_ref):
        return jnp.dot(ctx.astype(bf16), wo_ref[...],
                       preferred_element_type=f32) + bo_ref[...]

    # ---- self-attention block ------------------------------------------------
    # TODO(synk): tgt_mask / tgt_key_padding_mask are None in DETR's decoder usage.
    # Fused Q/K in-projection (same input tgt+query_pos), N = 2*d_model.
    qk_in = (x0 + qpos_f).astype(bf16)
    sa_qk = jnp.dot(qk_in, sa_wi_ref[:, :2 * d_model],
                    preferred_element_type=f32) + sa_bi_ref[:, :2 * d_model]
    sa_v = jnp.dot(tgt_bf, sa_wi_ref[:, 2 * d_model:],
                   preferred_element_type=f32) + sa_bi_ref[:, 2 * d_model:]
    q = sa_qk[:, :d_model] * scale            # PyTorch scales q (incl. bias) post-proj
    k = sa_qk[:, d_model:]
    ctx = attention_core(q, k, sa_v, T, T, None)
    sa_out = out_proj(ctx, sa_wo_ref, sa_bo_ref)
    x1 = layer_norm(x0 + sa_out, ln[0:1], ln[1:2])     # dropout1 == identity (eval)

    # ---- cross-attention block -------------------------------------------------
    q_in = (x1 + qpos_f).astype(bf16)
    k_in = (mem_f + pos_f).astype(bf16)
    ca_q = (jnp.dot(q_in, ca_wi_ref[:, :d_model], preferred_element_type=f32)
            + ca_bi_ref[:, :d_model]) * scale
    ca_k = jnp.dot(k_in, ca_wi_ref[:, d_model:2 * d_model],
                   preferred_element_type=f32) + ca_bi_ref[:, d_model:2 * d_model]
    ca_v = jnp.dot(mem_bf, ca_wi_ref[:, 2 * d_model:],
                   preferred_element_type=f32) + ca_bi_ref[:, 2 * d_model:]
    ctx = attention_core(ca_q, ca_k, ca_v, T, S, kpm)
    ca_out = out_proj(ctx, ca_wo_ref, ca_bo_ref)
    x2 = layer_norm(x1 + ca_out, ln[2:3], ln[3:4])     # dropout2 == identity

    # ---- feed-forward block ------------------------------------------------------
    hdn = jnp.maximum(
        jnp.dot(x2.astype(bf16), ff_w1_ref[...], preferred_element_type=f32)
        + ff_b1_ref[...], 0.0)                                   # relu(linear1)
    ff = jnp.dot(hdn.astype(bf16), ff_w2_ref[...],
                 preferred_element_type=f32) + ff_b2_ref[...]    # linear2 (dropout==id)
    x3 = layer_norm(x2 + ff, ln[4:5], ln[5:6])                   # dropout3 == identity

    out_ref[...] = x3.reshape(bb, T, d_model)


# ----------------------------- wrapper ----------------------------------------
def transformer_decoder_layer_forward(params, tgt, memory,
                                      memory_key_padding_mask=None,
                                      pos=None, query_pos=None,
                                      nhead=NHEAD):
    """TransformerDecoderLayer.forward (normalize_before=False, eval mode).

    Tensors use PyTorch's (seq, batch, d_model) layout.
    """
    T, B, D = tgt.shape
    S = memory.shape[0]
    F_ = params['linear1_w'].shape[0]

    cdiv = lambda a, b: -(-a // b)  # noqa: E731

    # Batch block per grid step: aim for ~256 matmul rows (fills the v6e/v7x MXU),
    # but keep >=2 parallel grid steps (v7x megacore) when that does not shrink
    # the matmul M dimension below 128 rows.
    Bb = max(1, min(B, 256 // max(T, 1)))
    nb = cdiv(B, Bb)
    if nb == 1 and B > 1 and cdiv(B, 2) * T >= 128:
        Bb = cdiv(B, 2)
        nb = cdiv(B, Bb)
    Bp = nb * Bb                      # padded batch (zero rows are discarded)

    def act(x, seq_len):
        # (seq, B, D) -> (Bp, seq, D) bf16; transpose + cast fuse into one XLA pass.
        if x is None:
            return jnp.zeros((Bp, seq_len, D), jnp.bfloat16)
        xb = jnp.transpose(x, (1, 0, 2)).astype(jnp.bfloat16)
        if Bp != B:
            xb = jnp.pad(xb, ((0, Bp - B), (0, 0), (0, 0)))
        return xb

    tgt_b = act(tgt, T)
    mem_b = act(memory, S)
    qpos_b = act(query_pos, T)
    pos_b = act(pos, S)

    if memory_key_padding_mask is None:
        kpm = jnp.zeros((Bp, 1, S), jnp.float32)
    else:
        kpm = jnp.where(memory_key_padding_mask, MASK_NEG, 0.0
                        ).astype(jnp.float32).reshape(B, 1, S)
        if Bp != B:
            kpm = jnp.pad(kpm, ((0, Bp - B), (0, 0), (0, 0)))

    # weights: (in, out) layout + bf16 (halves HBM DMA, bf16 MXU); biases / LN f32.
    def wT(name):
        return params[name].T.astype(jnp.bfloat16)

    def brow(name):
        return params[name].reshape(1, -1).astype(jnp.float32)

    sa_wi, sa_bi = wT('sa_in_proj_w'), brow('sa_in_proj_b')
    sa_wo, sa_bo = wT('sa_out_proj_w'), brow('sa_out_proj_b')
    ca_wi, ca_bi = wT('ca_in_proj_w'), brow('ca_in_proj_b')
    ca_wo, ca_bo = wT('ca_out_proj_w'), brow('ca_out_proj_b')
    ff_w1, ff_b1 = wT('linear1_w'), brow('linear1_b')
    ff_w2, ff_b2 = wT('linear2_w'), brow('linear2_b')
    ln = jnp.stack([params['norm1_w'], params['norm1_b'],
                    params['norm2_w'], params['norm2_b'],
                    params['norm3_w'], params['norm3_b']], axis=0
                   ).astype(jnp.float32)                       # (6, D)

    const2d = lambda b: (0, 0)      # noqa: E731  (weights reused across the grid)
    # TODO(synk): for very long memory (S ~ 1k-10k), tile S with an online-softmax
    # reduction axis instead of loading the full (Bb, S, D) block per step (v7x VMEM).

    out = pl.pallas_call(
        functools.partial(_decoder_layer_kernel, nhead=nhead),
        out_shape=jax.ShapeDtypeStruct((Bp, T, D), jnp.float32),
        grid_spec=pltpu.PrefetchScalarGridSpec(
            num_scalar_prefetch=0,
            grid=(nb,),
            in_specs=[
                pl.BlockSpec((Bb, T, D), lambda b: (b, 0, 0)),   # tgt
                pl.BlockSpec((Bb, S, D), lambda b: (b, 0, 0)),   # memory
                pl.BlockSpec((Bb, T, D), lambda b: (b, 0, 0)),   # query_pos
                pl.BlockSpec((Bb, S, D), lambda b: (b, 0, 0)),   # pos
                pl.BlockSpec((Bb, 1, S), lambda b: (b, 0, 0)),   # key-padding mask
                pl.BlockSpec((D, 3 * D), const2d),               # self-attn in-proj W
                pl.BlockSpec((1, 3 * D), const2d),               # self-attn in-proj b
                pl.BlockSpec((D, D), const2d),                   # self-attn out-proj W
                pl.BlockSpec((1, D), const2d),                   # self-attn out-proj b
                pl.BlockSpec((D, 3 * D), const2d),               # cross-attn in-proj W
                pl.BlockSpec((1, 3 * D), const2d),               # cross-attn in-proj b
                pl.BlockSpec((D, D), const2d),                   # cross-attn out-proj W
                pl.BlockSpec((1, D), const2d),                   # cross-attn out-proj b
                pl.BlockSpec((D, F_), const2d),                  # linear1 W
                pl.BlockSpec((1, F_), const2d),                  # linear1 b
                pl.BlockSpec((F_, D), const2d),                  # linear2 W
                pl.BlockSpec((1, D), const2d),                   # linear2 b
                pl.BlockSpec((6, D), const2d),                   # LayerNorm params
            ],
            out_specs=pl.BlockSpec((Bb, T, D), lambda b: (b, 0, 0)),
        ),
        compiler_params=pltpu.CompilerParams(
            dimension_semantics=("parallel",)),
    )(tgt_b, mem_b, qpos_b, pos_b, kpm,
      sa_wi, sa_bi, sa_wo, sa_bo,
      ca_wi, ca_bi, ca_wo, ca_bo,
      ff_w1, ff_b1, ff_w2, ff_b2, ln)

    if Bp != B:
        out = out[:B]
    return jnp.transpose(out, (1, 0, 2))   # back to (T, B, D)


# ----------------------------- parameters -------------------------------------
def make_params(key, d_model=D_MODEL, dim_ff=DIM_FF):
    keys = iter(jax.random.split(key, 16))

    def init(shape, scale=0.05):
        return scale * jax.random.normal(next(keys), shape, jnp.float32)

    # PyTorch layouts: in_proj_weight (3D, D), out_proj.weight (D, D),
    # linear1.weight (F, D), linear2.weight (D, F).
    return {
        'sa_in_proj_w': init((3 * d_model, d_model)),
        'sa_in_proj_b': init((3 * d_model,)),
        'sa_out_proj_w': init((d_model, d_model)),
        'sa_out_proj_b': init((d_model,)),
        'ca_in_proj_w': init((3 * d_model, d_model)),
        'ca_in_proj_b': init((3 * d_model,)),
        'ca_out_proj_w': init((d_model, d_model)),
        'ca_out_proj_b': init((d_model,)),
        'linear1_w': init((dim_ff, d_model)),
        'linear1_b': init((dim_ff,)),
        'linear2_w': init((d_model, dim_ff)),
        'linear2_b': init((d_model,)),
        'norm1_w': jnp.ones((d_model,), jnp.float32),
        'norm1_b': jnp.zeros((d_model,), jnp.float32),
        'norm2_w': jnp.ones((d_model,), jnp.float32),
        'norm2_b': jnp.zeros((d_model,), jnp.float32),
        'norm3_w': jnp.ones((d_model,), jnp.float32),
        'norm3_b': jnp.zeros((d_model,), jnp.float32),
    }


# ----------------------------- pure-JAX reference -----------------------------
def _reference_forward(params, tgt, memory, memory_key_padding_mask=None,
                       pos=None, query_pos=None, nhead=NHEAD):
    """f32 XLA reference of forward_post (eval mode), for validation."""
    T, B, D = tgt.shape
    S = memory.shape[0]
    hd = D // nhead

    def ln(x, g, b):
        mu = x.mean(-1, keepdims=True)
        var = ((x - mu) ** 2).mean(-1, keepdims=True)
        return (x - mu) / jnp.sqrt(var + LN_EPS) * g + b

    def mha(q_in, k_in, v_in, wi, bi, wo, bo, kpm):
        Tq, Tk = q_in.shape[0], k_in.shape[0]
        q = (q_in @ wi[:D].T + bi[:D]) * (hd ** -0.5)
        k = k_in @ wi[D:2 * D].T + bi[D:2 * D]
        v = v_in @ wi[2 * D:].T + bi[2 * D:]

        def split(x, L):
            return x.reshape(L, B, nhead, hd).transpose(1, 2, 0, 3)   # (B,H,L,hd)

        qh, kh, vh = split(q, Tq), split(k, Tk), split(v, Tk)
        s = jnp.einsum('bhqd,bhkd->bhqk', qh, kh)
        if kpm is not None:
            s = s + jnp.where(kpm[:, None, None, :], -jnp.inf, 0.0)
        p = jax.nn.softmax(s, axis=-1)
        ctx = jnp.einsum('bhqk,bhkd->bhqd', p, vh)
        ctx = ctx.transpose(2, 0, 1, 3).reshape(Tq, B, D)
        return ctx @ wo.T + bo

    qp = jnp.zeros_like(tgt) if query_pos is None else query_pos
    ps = jnp.zeros_like(memory) if pos is None else pos

    q = tgt + qp
    x = ln(tgt + mha(q, q, tgt,
                     params['sa_in_proj_w'], params['sa_in_proj_b'],
                     params['sa_out_proj_w'], params['sa_out_proj_b'], None),
           params['norm1_w'], params['norm1_b'])
    x = ln(x + mha(x + qp, memory + ps, memory,
                   params['ca_in_proj_w'], params['ca_in_proj_b'],
                   params['ca_out_proj_w'], params['ca_out_proj_b'],
                   memory_key_padding_mask),
           params['norm2_w'], params['norm2_b'])
    h = jax.nn.relu(x @ params['linear1_w'].T + params['linear1_b'])
    f = h @ params['linear2_w'].T + params['linear2_b']
    return ln(x + f, params['norm3_w'], params['norm3_b'])


# ----------------------------- main --------------------------------------------
if __name__ == "__main__":
    key = jax.random.PRNGKey(0)
    pkey, k1, k2, k3, k4 = jax.random.split(key, 5)
    params = make_params(pkey)

    B, T, S = 2, 8, 32     # batch, num_queries (tgt len), memory len
    tgt = jax.random.normal(k1, (T, B, D_MODEL), jnp.float32)
    memory = jax.random.normal(k2, (S, B, D_MODEL), jnp.float32)
    query_pos = 0.1 * jax.random.normal(k3, (T, B, D_MODEL), jnp.float32)
    pos = 0.1 * jax.random.normal(k4, (S, B, D_MODEL), jnp.float32)
    # padding mask: batch 1 has its last 8 memory positions padded
    mem_kpm = jnp.zeros((B, S), bool).at[1, 24:].set(True)

    fwd = jax.jit(transformer_decoder_layer_forward)
    out = fwd(params, tgt, memory, mem_kpm, pos, query_pos)
    jax.block_until_ready(out)

    assert out.shape == (T, B, D_MODEL)
    ref = _reference_forward(params, tgt, memory, mem_kpm, pos, query_pos)
    rel_err = float(jnp.linalg.norm(out - ref) / jnp.linalg.norm(ref))
    assert rel_err < 3e-2, f"relative L2 error vs f32 reference: {rel_err}"
    print("KERNEL_OK")
</pallas_src>

<mosaic_0001>
module attributes {stable_mosaic.version = 11 : i64} {
  func.func @_decoder_layer_kernel(%arg0: i32, %arg1: memref<2x8x128xbf16, #tpu.memory_space<vmem>>, %arg2: memref<2x32x128xbf16, #tpu.memory_space<vmem>>, %arg3: memref<2x8x128xbf16, #tpu.memory_space<vmem>>, %arg4: memref<2x32x128xbf16, #tpu.memory_space<vmem>>, %arg5: memref<2x1x32xf32, #tpu.memory_space<vmem>>, %arg6: memref<128x384xbf16, #tpu.memory_space<vmem>>, %arg7: memref<1x384xf32, #tpu.memory_space<vmem>>, %arg8: memref<128x128xbf16, #tpu.memory_space<vmem>>, %arg9: memref<1x128xf32, #tpu.memory_space<vmem>>, %arg10: memref<128x384xbf16, #tpu.memory_space<vmem>>, %arg11: memref<1x384xf32, #tpu.memory_space<vmem>>, %arg12: memref<128x128xbf16, #tpu.memory_space<vmem>>, %arg13: memref<1x128xf32, #tpu.memory_space<vmem>>, %arg14: memref<128x256xbf16, #tpu.memory_space<vmem>>, %arg15: memref<1x256xf32, #tpu.memory_space<vmem>>, %arg16: memref<256x128xbf16, #tpu.memory_space<vmem>>, %arg17: memref<1x128xf32, #tpu.memory_space<vmem>>, %arg18: memref<6x128xf32, #tpu.memory_space<vmem>>, %arg19: memref<2x8x128xf32, #tpu.memory_space<vmem>>) attributes {dimension_semantics = [#tpu.dimension_semantics<parallel>], iteration_bounds = array<i64: 1>, scalar_prefetch = 0 : i64, scratch_operands = 0 : i64, tpu.core_type = #tpu.core_type<tc>, window_params = [{transform_indices = @transform_0, window_bounds = array<i64: 2, 8, 128>}, {transform_indices = @transform_1, window_bounds = array<i64: 2, 32, 128>}, {transform_indices = @transform_2, window_bounds = array<i64: 2, 8, 128>}, {transform_indices = @transform_3, window_bounds = array<i64: 2, 32, 128>}, {transform_indices = @transform_4, window_bounds = array<i64: 2, 1, 32>}, {pipeline_mode = #tpu.pipeline_mode<synchronous>, transform_indices = @transform_5, window_bounds = array<i64: 128, 384>}, {pipeline_mode = #tpu.pipeline_mode<synchronous>, transform_indices = @transform_6, window_bounds = array<i64: 1, 384>}, {pipeline_mode = #tpu.pipeline_mode<synchronous>, transform_indices = @transform_7, window_bounds = array<i64: 128, 128>}, {pipeline_mode = #tpu.pipeline_mode<synchronous>, transform_indices = @transform_8, window_bounds = array<i64: 1, 128>}, {pipeline_mode = #tpu.pipeline_mode<synchronous>, transform_indices = @transform_9, window_bounds = array<i64: 128, 384>}, {pipeline_mode = #tpu.pipeline_mode<synchronous>, transform_indices = @transform_10, window_bounds = array<i64: 1, 384>}, {pipeline_mode = #tpu.pipeline_mode<synchronous>, transform_indices = @transform_11, window_bounds = array<i64: 128, 128>}, {pipeline_mode = #tpu.pipeline_mode<synchronous>, transform_indices = @transform_12, window_bounds = array<i64: 1, 128>}, {pipeline_mode = #tpu.pipeline_mode<synchronous>, transform_indices = @transform_13, window_bounds = array<i64: 128, 256>}, {pipeline_mode = #tpu.pipeline_mode<synchronous>, transform_indices = @transform_14, window_bounds = array<i64: 1, 256>}, {pipeline_mode = #tpu.pipeline_mode<synchronous>, transform_indices = @transform_15, window_bounds = array<i64: 256, 128>}, {pipeline_mode = #tpu.pipeline_mode<synchronous>, transform_indices = @transform_16, window_bounds = array<i64: 1, 128>}, {pipeline_mode = #tpu.pipeline_mode<synchronous>, transform_indices = @transform_17, window_bounds = array<i64: 6, 128>}, {transform_indices = @transform_18, window_bounds = array<i64: 2, 8, 128>}]} {
    %c0 = arith.constant 0 : index
    %c0_0 = arith.constant 0 : index
    %c0_1 = arith.constant 0 : index
    %0 = vector.load %arg1[%c0, %c0_0, %c0_1] : memref<2x8x128xbf16, #tpu.memory_space<vmem>>, vector<2x8x128xbf16>
    %1 = vector.shape_cast %0 : vector<2x8x128xbf16> to vector<16x128xbf16>
    %c0_2 = arith.constant 0 : index
    %c0_3 = arith.constant 0 : index
    %c0_4 = arith.constant 0 : index
    %2 = vector.load %arg3[%c0_2, %c0_3, %c0_4] : memref<2x8x128xbf16, #tpu.memory_space<vmem>>, vector<2x8x128xbf16>
    %3 = vector.shape_cast %2 : vector<2x8x128xbf16> to vector<16x128xbf16>
    %4 = arith.extf %3 : vector<16x128xbf16> to vector<16x128xf32>
    %c0_5 = arith.constant 0 : index
    %c0_6 = arith.constant 0 : index
    %c0_7 = arith.constant 0 : index
    %5 = vector.load %arg2[%c0_5, %c0_6, %c0_7] : memref<2x32x128xbf16, #tpu.memory_space<vmem>>, vector<2x32x128xbf16>
    %6 = vector.shape_cast %5 : vector<2x32x128xbf16> to vector<64x128xbf16>
    %c0_8 = arith.constant 0 : index
    %c0_9 = arith.constant 0 : index
    %c0_10 = arith.constant 0 : index
    %7 = vector.load %arg4[%c0_8, %c0_9, %c0_10] : memref<2x32x128xbf16, #tpu.memory_space<vmem>>, vector<2x32x128xbf16>
    %8 = vector.shape_cast %7 : vector<2x32x128xbf16> to vector<64x128xbf16>
    %9 = arith.extf %8 : vector<64x128xbf16> to vector<64x128xf32>
    %c0_11 = arith.constant 0 : index
    %c0_12 = arith.constant 0 : index
    %c0_13 = arith.constant 0 : index
    %10 = vector.load %arg5[%c0_11, %c0_12, %c0_13] : memref<2x1x32xf32, #tpu.memory_space<vmem>>, vector<2x1x32xf32>
    %c0_14 = arith.constant 0 : index
    %c0_15 = arith.constant 0 : index
    %11 = vector.load %arg18[%c0_14, %c0_15] : memref<6x128xf32, #tpu.memory_space<vmem>>, vector<6x128xf32>
    %12 = arith.extf %1 : vector<16x128xbf16> to vector<16x128xf32>
    %13 = arith.extf %6 : vector<64x128xbf16> to vector<64x128xf32>
    %14 = arith.addf %12, %4 : vector<16x128xf32>
    %15 = arith.truncf %14 : vector<16x128xf32> to vector<16x128xbf16>
    %c0_16 = arith.constant 0 : index
    %c0_17 = arith.constant 0 : index
    %16 = vector.load %arg6[%c0_16, %c0_17] : memref<128x384xbf16, #tpu.memory_space<vmem>>, vector<128x256xbf16>
    %cst = arith.constant dense<0.000000e+00> : vector<16x256xf32>
    %17 = tpu.matmul %15, %16, %cst {dimension_numbers = #tpu.dot_dimension_numbers<[1], [0], [0], [1], [0, 0, 1, 1], [], []>} : vector<16x128xbf16>, vector<128x256xbf16>, vector<16x256xf32> -> vector<16x256xf32>
    %c0_18 = arith.constant 0 : index
    %c0_19 = arith.constant 0 : index
    %18 = vector.load %arg7[%c0_18, %c0_19] : memref<1x384xf32, #tpu.memory_space<vmem>>, vector<1x256xf32>
    %19 = vector.broadcast %18 : vector<1x256xf32> to vector<16x256xf32>
    %20 = arith.addf %17, %19 : vector<16x256xf32>
    %c0_20 = arith.constant 0 : index
    %c256 = arith.constant 256 : index
    %21 = vector.load %arg6[%c0_20, %c256] : memref<128x384xbf16, #tpu.memory_space<vmem>>, vector<128x128xbf16>
    %cst_21 = arith.constant dense<0.000000e+00> : vector<16x128xf32>
    %22 = tpu.matmul %1, %21, %cst_21 {dimension_numbers = #tpu.dot_dimension_numbers<[1], [0], [0], [1], [0, 0, 1, 1], [], []>} : vector<16x128xbf16>, vector<128x128xbf16>, vector<16x128xf32> -> vector<16x128xf32>
    %c0_22 = arith.constant 0 : index
    %c256_23 = arith.constant 256 : index
    %23 = vector.load %arg7[%c0_22, %c256_23] : memref<1x384xf32, #tpu.memory_space<vmem>>, vector<1x128xf32>
    %24 = vector.broadcast %23 : vector<1x128xf32> to vector<16x128xf32>
    %25 = arith.addf %22, %24 : vector<16x128xf32>
    %26 = vector.extract_strided_slice %20 {offsets = [0, 0], sizes = [16, 128], strides = [1, 1]} : vector<16x256xf32> to vector<16x128xf32>
    %cst_24 = arith.constant 2.500000e-01 : f32
    %27 = vector.broadcast %cst_24 : f32 to vector<16x128xf32>
    %28 = arith.mulf %26, %27 : vector<16x128xf32>
    %29 = vector.extract_strided_slice %20 {offsets = [0, 128], sizes = [16, 128], strides = [1, 1]} : vector<16x256xf32> to vector<16x128xf32>
    %30 = arith.truncf %28 : vector<16x128xf32> to vector<16x128xbf16>
    %31 = vector.shape_cast %30 : vector<16x128xbf16> to vector<2x8x128xbf16>
    %32 = arith.truncf %29 : vector<16x128xf32> to vector<16x128xbf16>
    %33 = vector.shape_cast %32 : vector<16x128xbf16> to vector<2x8x128xbf16>
    %34 = arith.truncf %25 : vector<16x128xf32> to vector<16x128xbf16>
    %35 = vector.shape_cast %34 : vector<16x128xbf16> to vector<2x8x128xbf16>
    %36 = vector.extract_strided_slice %31 {offsets = [0, 0, 0], sizes = [2, 8, 16], strides = [1, 1, 1]} : vector<2x8x128xbf16> to vector<2x8x16xbf16>
    %37 = vector.extract_strided_slice %33 {offsets = [0, 0, 0], sizes = [2, 8, 16], strides = [1, 1, 1]} : vector<2x8x128xbf16> to vector<2x8x16xbf16>
    "tpu.trace_start"() <{level = 10 : i32, message = "bqd,bkd->bqk"}> : () -> ()
    %cst_25 = arith.constant dense<0.000000e+00> : vector<2x8x8xf32>
    %38 = tpu.matmul %36, %37, %cst_25 {dimension_numbers = #tpu.dot_dimension_numbers<[2], [2], [1], [1], [0, 0, 0, 1, 1, 1], [0], [0]>} : vector<2x8x16xbf16>, vector<2x8x16xbf16>, vector<2x8x8xf32> -> vector<2x8x8xf32>
    "tpu.trace_stop"() : () -> ()
    %cst_26 = arith.constant dense<0xFF800000> : vector<2x8xf32>
    %39 = vector.multi_reduction <maximumf>, %38, %cst_26 [2] : vector<2x8x8xf32> to vector<2x8xf32>
    %40 = vector.shape_cast %39 : vector<2x8xf32> to vector<2x8x1xf32>
    %41 = vector.broadcast %40 : vector<2x8x1xf32> to vector<2x8x8xf32>
    %42 = arith.subf %38, %41 : vector<2x8x8xf32>
    %43 = math.exp %42 : vector<2x8x8xf32>
    %cst_27 = arith.constant dense<0.000000e+00> : vector<2x8xf32>
    %44 = vector.multi_reduction <add>, %43, %cst_27 [2] : vector<2x8x8xf32> to vector<2x8xf32>
    %45 = vector.shape_cast %44 : vector<2x8xf32> to vector<2x8x1xf32>
    %46 = tpu.reciprocal %45 {approx = true} : vector<2x8x1xf32> -> vector<2x8x1xf32>
    %47 = vector.broadcast %46 : vector<2x8x1xf32> to vector<2x8x8xf32>
    %48 = arith.mulf %43, %47 : vector<2x8x8xf32>
    %49 = arith.truncf %48 : vector<2x8x8xf32> to vector<2x8x8xbf16>
    %50 = vector.extract_strided_slice %35 {offsets = [0, 0, 0], sizes = [2, 8, 16], strides = [1, 1, 1]} : vector<2x8x128xbf16> to vector<2x8x16xbf16>
    "tpu.trace_start"() <{level = 10 : i32, message = "bqk,bkd->bqd"}> : () -> ()
    %cst_28 = arith.constant dense<0.000000e+00> : vector<2x8x16xf32>
    %51 = tpu.matmul %49, %50, %cst_28 {dimension_numbers = #tpu.dot_dimension_numbers<[2], [1], [1], [2], [0, 0, 0, 1, 1, 2], [0], [0]>} : vector<2x8x8xbf16>, vector<2x8x16xbf16>, vector<2x8x16xf32> -> vector<2x8x16xf32>
    "tpu.trace_stop"() : () -> ()
    %52 = vector.extract_strided_slice %31 {offsets = [0, 0, 16], sizes = [2, 8, 16], strides = [1, 1, 1]} : vector<2x8x128xbf16> to vector<2x8x16xbf16>
    %53 = vector.extract_strided_slice %33 {offsets = [0, 0, 16], sizes = [2, 8, 16], strides = [1, 1, 1]} : vector<2x8x128xbf16> to vector<2x8x16xbf16>
    "tpu.trace_start"() <{level = 10 : i32, message = "bqd,bkd->bqk"}> : () -> ()
    %cst_29 = arith.constant dense<0.000000e+00> : vector<2x8x8xf32>
    %54 = tpu.matmul %52, %53, %cst_29 {dimension_numbers = #tpu.dot_dimension_numbers<[2], [2], [1], [1], [0, 0, 0, 1, 1, 1], [0], [0]>} : vector<2x8x16xbf16>, vector<2x8x16xbf16>, vector<2x8x8xf32> -> vector<2x8x8xf32>
    "tpu.trace_stop"() : () -> ()
    %cst_30 = arith.constant dense<0xFF800000> : vector<2x8xf32>
    %55 = vector.multi_reduction <maximumf>, %54, %cst_30 [2] : vector<2x8x8xf32> to vector<2x8xf32>
    %56 = vector.shape_cast %55 : vector<2x8xf32> to vector<2x8x1xf32>
    %57 = vector.broadcast %56 : vector<2x8x1xf32> to vector<2x8x8xf32>
    %58 = arith.subf %54, %57 : vector<2x8x8xf32>
    %59 = math.exp %58 : vector<2x8x8xf32>
    %cst_31 = arith.constant dense<0.000000e+00> : vector<2x8xf32>
    %60 = vector.multi_reduction <add>, %59, %cst_31 [2] : vector<2x8x8xf32> to vector<2x8xf32>
    %61 = vector.shape_cast %60 : vector<2x8xf32> to vector<2x8x1xf32>
    %62 = tpu.reciprocal %61 {approx = true} : vector<2x8x1xf32> -> vector<2x8x1xf32>
    %63 = vector.broadcast %62 : vector<2x8x1xf32> to vector<2x8x8xf32>
    %64 = arith.mulf %59, %63 : vector<2x8x8xf32>
    %65 = arith.truncf %64 : vector<2x8x8xf32> to vector<2x8x8xbf16>
    %66 = vector.extract_strided_slice %35 {offsets = [0, 0, 16], sizes = [2, 8, 16], strides = [1, 1, 1]} : vector<2x8x128xbf16> to vector<2x8x16xbf16>
    "tpu.trace_start"() <{level = 10 : i32, message = "bqk,bkd->bqd"}> : () -> ()
    %cst_32 = arith.constant dense<0.000000e+00> : vector<2x8x16xf32>
    %67 = tpu.matmul %65, %66, %cst_32 {dimension_numbers = #tpu.dot_dimension_numbers<[2], [1], [1], [2], [0, 0, 0, 1, 1, 2], [0], [0]>} : vector<2x8x8xbf16>, vector<2x8x16xbf16>, vector<2x8x16xf32> -> vector<2x8x16xf32>
    "tpu.trace_stop"() : () -> ()
    %68 = vector.extract_strided_slice %31 {offsets = [0, 0, 32], sizes = [2, 8, 16], strides = [1, 1, 1]} : vector<2x8x128xbf16> to vector<2x8x16xbf16>
    %69 = vector.extract_strided_slice %33 {offsets = [0, 0, 32], sizes = [2, 8, 16], strides = [1, 1, 1]} : vector<2x8x128xbf16> to vector<2x8x16xbf16>
    "tpu.trace_start"() <{level = 10 : i32, message = "bqd,bkd->bqk"}> : () -> ()
    %cst_33 = arith.constant dense<0.000000e+00> : vector<2x8x8xf32>
    %70 = tpu.matmul %68, %69, %cst_33 {dimension_numbers = #tpu.dot_dimension_numbers<[2], [2], [1], [1], [0, 0, 0, 1, 1, 1], [0], [0]>} : vector<2x8x16xbf16>, vector<2x8x16xbf16>, vector<2x8x8xf32> -> vector<2x8x8xf32>
    "tpu.trace_stop"() : () -> ()
    %cst_34 = arith.constant dense<0xFF800000> : vector<2x8xf32>
    %71 = vector.multi_reduction <maximumf>, %70, %cst_34 [2] : vector<2x8x8xf32> to vector<2x8xf32>
    %72 = vector.shape_cast %71 : vector<2x8xf32> to vector<2x8x1xf32>
    %73 = vector.broadcast %72 : vector<2x8x1xf32> to vector<2x8x8xf32>
    %74 = arith.subf %70, %73 : vector<2x8x8xf32>
    %75 = math.exp %74 : vector<2x8x8xf32>
    %cst_35 = arith.constant dense<0.000000e+00> : vector<2x8xf32>
    %76 = vector.multi_reduction <add>, %75, %cst_35 [2] : vector<2x8x8xf32> to vector<2x8xf32>
    %77 = vector.shape_cast %76 : vector<2x8xf32> to vector<2x8x1xf32>
    %78 = tpu.reciprocal %77 {approx = true} : vector<2x8x1xf32> -> vector<2x8x1xf32>
    %79 = vector.broadcast %78 : vector<2x8x1xf32> to vector<2x8x8xf32>
    %80 = arith.mulf %75, %79 : vector<2x8x8xf32>
    %81 = arith.truncf %80 : vector<2x8x8xf32> to vector<2x8x8xbf16>
    %82 = vector.extract_strided_slice %35 {offsets = [0, 0, 32], sizes = [2, 8, 16], strides = [1, 1, 1]} : vector<2x8x128xbf16> to vector<2x8x16xbf16>
    "tpu.trace_start"() <{level = 10 : i32, message = "bqk,bkd->bqd"}> : () -> ()
    %cst_36 = arith.constant dense<0.000000e+00> : vector<2x8x16xf32>
    %83 = tpu.matmul %81, %82, %cst_36 {dimension_numbers = #tpu.dot_dimension_numbers<[2], [1], [1], [2], [0, 0, 0, 1, 1, 2], [0], [0]>} : vector<2x8x8xbf16>, vector<2x8x16xbf16>, vector<2x8x16xf32> -> vector<2x8x16xf32>
    "tpu.trace_stop"() : () -> ()
    %84 = vector.extract_strided_slice %31 {offsets = [0, 0, 48], sizes = [2, 8, 16], strides = [1, 1, 1]} : vector<2x8x128xbf16> to vector<2x8x16xbf16>
    %85 = vector.extract_strided_slice %33 {offsets = [0, 0, 48], sizes = [2, 8, 16], strides = [1, 1, 1]} : vector<2x8x128xbf16> to vector<2x8x16xbf16>
    "tpu.trace_start"() <{level = 10 : i32, message = "bqd,bkd->bqk"}> : () -> ()
    %cst_37 = arith.constant dense<0.000000e+00> : vector<2x8x8xf32>
    %86 = tpu.matmul %84, %85, %cst_37 {dimension_numbers = #tpu.dot_dimension_numbers<[2], [2], [1], [1], [0, 0, 0, 1, 1, 1], [0], [0]>} : vector<2x8x16xbf16>, vector<2x8x16xbf16>, vector<2x8x8xf32> -> vector<2x8x8xf32>
    "tpu.trace_stop"() : () -> ()
    %cst_38 = arith.constant dense<0xFF800000> : vector<2x8xf32>
    %87 = vector.multi_reduction <maximumf>, %86, %cst_38 [2] : vector<2x8x8xf32> to vector<2x8xf32>
    %88 = vector.shape_cast %87 : vector<2x8xf32> to vector<2x8x1xf32>
    %89 = vector.broadcast %88 : vector<2x8x1xf32> to vector<2x8x8xf32>
    %90 = arith.subf %86, %89 : vector<2x8x8xf32>
    %91 = math.exp %90 : vector<2x8x8xf32>
    %cst_39 = arith.constant dense<0.000000e+00> : vector<2x8xf32>
    %92 = vector.multi_reduction <add>, %91, %cst_39 [2] : vector<2x8x8xf32> to vector<2x8xf32>
    %93 = vector.shape_cast %92 : vector<2x8xf32> to vector<2x8x1xf32>
    %94 = tpu.reciprocal %93 {approx = true} : vector<2x8x1xf32> -> vector<2x8x1xf32>
    %95 = vector.broadcast %94 : vector<2x8x1xf32> to vector<2x8x8xf32>
    %96 = arith.mulf %91, %95 : vector<2x8x8xf32>
    %97 = arith.truncf %96 : vector<2x8x8xf32> to vector<2x8x8xbf16>
    %98 = vector.extract_strided_slice %35 {offsets = [0, 0, 48], sizes = [2, 8, 16], strides = [1, 1, 1]} : vector<2x8x128xbf16> to vector<2x8x16xbf16>
    "tpu.trace_start"() <{level = 10 : i32, message = "bqk,bkd->bqd"}> : () -> ()
    %cst_40 = arith.constant dense<0.000000e+00> : vector<2x8x16xf32>
    %99 = tpu.matmul %97, %98, %cst_40 {dimension_numbers = #tpu.dot_dimension_numbers<[2], [1], [1], [2], [0, 0, 0, 1, 1, 2], [0], [0]>} : vector<2x8x8xbf16>, vector<2x8x16xbf16>, vector<2x8x16xf32> -> vector<2x8x16xf32>
    "tpu.trace_stop"() : () -> ()
    %100 = vector.extract_strided_slice %31 {offsets = [0, 0, 64], sizes = [2, 8, 16], strides = [1, 1, 1]} : vector<2x8x128xbf16> to vector<2x8x16xbf16>
    %101 = vector.extract_strided_slice %33 {offsets = [0, 0, 64], sizes = [2, 8, 16], strides = [1, 1, 1]} : vector<2x8x128xbf16> to vector<2x8x16xbf16>
    "tpu.trace_start"() <{level = 10 : i32, message = "bqd,bkd->bqk"}> : () -> ()
    %cst_41 = arith.constant dense<0.000000e+00> : vector<2x8x8xf32>
    %102 = tpu.matmul %100, %101, %cst_41 {dimension_numbers = #tpu.dot_dimension_numbers<[2], [2], [1], [1], [0, 0, 0, 1, 1, 1], [0], [0]>} : vector<2x8x16xbf16>, vector<2x8x16xbf16>, vector<2x8x8xf32> -> vector<2x8x8xf32>
    "tpu.trace_stop"() : () -> ()
    %cst_42 = arith.constant dense<0xFF800000> : vector<2x8xf32>
    %103 = vector.multi_reduction <maximumf>, %102, %cst_42 [2] : vector<2x8x8xf32> to vector<2x8xf32>
    %104 = vector.shape_cast %103 : vector<2x8xf32> to vector<2x8x1xf32>
    %105 = vector.broadcast %104 : vector<2x8x1xf32> to vector<2x8x8xf32>
    %106 = arith.subf %102, %105 : vector<2x8x8xf32>
    %107 = math.exp %106 : vector<2x8x8xf32>
    %cst_43 = arith.constant dense<0.000000e+00> : vector<2x8xf32>
    %108 = vector.multi_reduction <add>, %107, %cst_43 [2] : vector<2x8x8xf32> to vector<2x8xf32>
    %109 = vector.shape_cast %108 : vector<2x8xf32> to vector<2x8x1xf32>
    %110 = tpu.reciprocal %109 {approx = true} : vector<2x8x1xf32> -> vector<2x8x1xf32>
    %111 = vector.broadcast %110 : vector<2x8x1xf32> to vector<2x8x8xf32>
    %112 = arith.mulf %107, %111 : vector<2x8x8xf32>
    %113 = arith.truncf %112 : vector<2x8x8xf32> to vector<2x8x8xbf16>
    %114 = vector.extract_strided_slice %35 {offsets = [0, 0, 64], sizes = [2, 8, 16], strides = [1, 1, 1]} : vector<2x8x128xbf16> to vector<2x8x16xbf16>
    "tpu.trace_start"() <{level = 10 : i32, message = "bqk,bkd->bqd"}> : () -> ()
    %cst_44 = arith.constant dense<0.000000e+00> : vector<2x8x16xf32>
    %115 = tpu.matmul %113, %114, %cst_44 {dimension_numbers = #tpu.dot_dimension_numbers<[2], [1], [1], [2], [0, 0, 0, 1, 1, 2], [0], [0]>} : vector<2x8x8xbf16>, vector<2x8x16xbf16>, vector<2x8x16xf32> -> vector<2x8x16xf32>
    "tpu.trace_stop"() : () -> ()
    %116 = vector.extract_strided_slice %31 {offsets = [0, 0, 80], sizes = [2, 8, 16], strides = [1, 1, 1]} : vector<2x8x128xbf16> to vector<2x8x16xbf16>
    %117 = vector.extract_strided_slice %33 {offsets = [0, 0, 80], sizes = [2, 8, 16], strides = [1, 1, 1]} : vector<2x8x128xbf16> to vector<2x8x16xbf16>
    "tpu.trace_start"() <{level = 10 : i32, message = "bqd,bkd->bqk"}> : () -> ()
    %cst_45 = arith.constant dense<0.000000e+00> : vector<2x8x8xf32>
    %118 = tpu.matmul %116, %117, %cst_45 {dimension_numbers = #tpu.dot_dimension_numbers<[2], [2], [1], [1], [0, 0, 0, 1, 1, 1], [0], [0]>} : vector<2x8x16xbf16>, vector<2x8x16xbf16>, vector<2x8x8xf32> -> vector<2x8x8xf32>
    "tpu.trace_stop"() : () -> ()
    %cst_46 = arith.constant dense<0xFF800000> : vector<2x8xf32>
    %119 = vector.multi_reduction <maximumf>, %118, %cst_46 [2] : vector<2x8x8xf32> to vector<2x8xf32>
    %120 = vector.shape_cast %119 : vector<2x8xf32> to vector<2x8x1xf32>
    %121 = vector.broadcast %120 : vector<2x8x1xf32> to vector<2x8x8xf32>
    %122 = arith.subf %118, %121 : vector<2x8x8xf32>
    %123 = math.exp %122 : vector<2x8x8xf32>
    %cst_47 = arith.constant dense<0.000000e+00> : vector<2x8xf32>
    %124 = vector.multi_reduction <add>, %123, %cst_47 [2] : vector<2x8x8xf32> to vector<2x8xf32>
    %125 = vector.shape_cast %124 : vector<2x8xf32> to vector<2x8x1xf32>
    %126 = tpu.reciprocal %125 {approx = true} : vector<2x8x1xf32> -> vector<2x8x1xf32>
    %127 = vector.broadcast %126 : vector<2x8x1xf32> to vector<2x8x8xf32>
    %128 = arith.mulf %123, %127 : vector<2x8x8xf32>
    %129 = arith.truncf %128 : vector<2x8x8xf32> to vector<2x8x8xbf16>
    %130 = vector.extract_strided_slice %35 {offsets = [0, 0, 80], sizes = [2, 8, 16], strides = [1, 1, 1]} : vector<2x8x128xbf16> to vector<2x8x16xbf16>
    "tpu.trace_start"() <{level = 10 : i32, message = "bqk,bkd->bqd"}> : () -> ()
    %cst_48 = arith.constant dense<0.000000e+00> : vector<2x8x16xf32>
    %131 = tpu.matmul %129, %130, %cst_48 {dimension_numbers = #tpu.dot_dimension_numbers<[2], [1], [1], [2], [0, 0, 0, 1, 1, 2], [0], [0]>} : vector<2x8x8xbf16>, vector<2x8x16xbf16>, vector<2x8x16xf32> -> vector<2x8x16xf32>
    "tpu.trace_stop"() : () -> ()
    %132 = vector.extract_strided_slice %31 {offsets = [0, 0, 96], sizes = [2, 8, 16], strides = [1, 1, 1]} : vector<2x8x128xbf16> to vector<2x8x16xbf16>
    %133 = vector.extract_strided_slice %33 {offsets = [0, 0, 96], sizes = [2, 8, 16], strides = [1, 1, 1]} : vector<2x8x128xbf16> to vector<2x8x16xbf16>
    "tpu.trace_start"() <{level = 10 : i32, message = "bqd,bkd->bqk"}> : () -> ()
    %cst_49 = arith.constant dense<0.000000e+00> : vector<2x8x8xf32>
    %134 = tpu.matmul %132, %133, %cst_49 {dimension_numbers = #tpu.dot_dimension_numbers<[2], [2], [1], [1], [0, 0, 0, 1, 1, 1], [0], [0]>} : vector<2x8x16xbf16>, vector<2x8x16xbf16>, vector<2x8x8xf32> -> vector<2x8x8xf32>
    "tpu.trace_stop"() : () -> ()
    %cst_50 = arith.constant dense<0xFF800000> : vector<2x8xf32>
    %135 = vector.multi_reduction <maximumf>, %134, %cst_50 [2] : vector<2x8x8xf32> to vector<2x8xf32>
    %136 = vector.shape_cast %135 : vector<2x8xf32> to vector<2x8x1xf32>
    %137 = vector.broadcast %136 : vector<2x8x1xf32> to vector<2x8x8xf32>
    %138 = arith.subf %134, %137 : vector<2x8x8xf32>
    %139 = math.exp %138 : vector<2x8x8xf32>
    %cst_51 = arith.constant dense<0.000000e+00> : vector<2x8xf32>
    %140 = vector.multi_reduction <add>, %139, %cst_51 [2] : vector<2x8x8xf32> to vector<2x8xf32>
    %141 = vector.shape_cast %140 : vector<2x8xf32> to vector<2x8x1xf32>
    %142 = tpu.reciprocal %141 {approx = true} : vector<2x8x1xf32> -> vector<2x8x1xf32>
    %143 = vector.broadcast %142 : vector<2x8x1xf32> to vector<2x8x8xf32>
    %144 = arith.mulf %139, %143 : vector<2x8x8xf32>
    %145 = arith.truncf %144 : vector<2x8x8xf32> to vector<2x8x8xbf16>
    %146 = vector.extract_strided_slice %35 {offsets = [0, 0, 96], sizes = [2, 8, 16], strides = [1, 1, 1]} : vector<2x8x128xbf16> to vector<2x8x16xbf16>
    "tpu.trace_start"() <{level = 10 : i32, message = "bqk,bkd->bqd"}> : () -> ()
    %cst_52 = arith.constant dense<0.000000e+00> : vector<2x8x16xf32>
    %147 = tpu.matmul %145, %146, %cst_52 {dimension_numbers = #tpu.dot_dimension_numbers<[2], [1], [1], [2], [0, 0, 0, 1, 1, 2], [0], [0]>} : vector<2x8x8xbf16>, vector<2x8x16xbf16>, vector<2x8x16xf32> -> vector<2x8x16xf32>
    "tpu.trace_stop"() : () -> ()
    %148 = vector.extract_strided_slice %31 {offsets = [0, 0, 112], sizes = [2, 8, 16], strides = [1, 1, 1]} : vector<2x8x128xbf16> to vector<2x8x16xbf16>
    %149 = vector.extract_strided_slice %33 {offsets = [0, 0, 112], sizes = [2, 8, 16], strides = [1, 1, 1]} : vector<2x8x128xbf16> to vector<2x8x16xbf16>
    "tpu.trace_start"() <{level = 10 : i32, message = "bqd,bkd->bqk"}> : () -> ()
    %cst_53 = arith.constant dense<0.000000e+00> : vector<2x8x8xf32>
    %150 = tpu.matmul %148, %149, %cst_53 {dimension_numbers = #tpu.dot_dimension_numbers<[2], [2], [1], [1], [0, 0, 0, 1, 1, 1], [0], [0]>} : vector<2x8x16xbf16>, vector<2x8x16xbf16>, vector<2x8x8xf32> -> vector<2x8x8xf32>
    "tpu.trace_stop"() : () -> ()
    %cst_54 = arith.constant dense<0xFF800000> : vector<2x8xf32>
    %151 = vector.multi_reduction <maximumf>, %150, %cst_54 [2] : vector<2x8x8xf32> to vector<2x8xf32>
    %152 = vector.shape_cast %151 : vector<2x8xf32> to vector<2x8x1xf32>
    %153 = vector.broadcast %152 : vector<2x8x1xf32> to vector<2x8x8xf32>
    %154 = arith.subf %150, %153 : vector<2x8x8xf32>
    %155 = math.exp %154 : vector<2x8x8xf32>
    %cst_55 = arith.constant dense<0.000000e+00> : vector<2x8xf32>
    %156 = vector.multi_reduction <add>, %155, %cst_55 [2] : vector<2x8x8xf32> to vector<2x8xf32>
    %157 = vector.shape_cast %156 : vector<2x8xf32> to vector<2x8x1xf32>
    %158 = tpu.reciprocal %157 {approx = true} : vector<2x8x1xf32> -> vector<2x8x1xf32>
    %159 = vector.broadcast %158 : vector<2x8x1xf32> to vector<2x8x8xf32>
    %160 = arith.mulf %155, %159 : vector<2x8x8xf32>
    %161 = arith.truncf %160 : vector<2x8x8xf32> to vector<2x8x8xbf16>
    %162 = vector.extract_strided_slice %35 {offsets = [0, 0, 112], sizes = [2, 8, 16], strides = [1, 1, 1]} : vector<2x8x128xbf16> to vector<2x8x16xbf16>
    "tpu.trace_start"() <{level = 10 : i32, message = "bqk,bkd->bqd"}> : () -> ()
    %cst_56 = arith.constant dense<0.000000e+00> : vector<2x8x16xf32>
    %163 = tpu.matmul %161, %162, %cst_56 {dimension_numbers = #tpu.dot_dimension_numbers<[2], [1], [1], [2], [0, 0, 0, 1, 1, 2], [0], [0]>} : vector<2x8x8xbf16>, vector<2x8x16xbf16>, vector<2x8x16xf32> -> vector<2x8x16xf32>
    "tpu.trace_stop"() : () -> ()
    %164 = tpu.concatenate %51, %67, %83, %99, %115, %131, %147, %163 in 2 : vector<2x8x16xf32>, vector<2x8x16xf32>, vector<2x8x16xf32>, vector<2x8x16xf32>, vector<2x8x16xf32>, vector<2x8x16xf32>, vector<2x8x16xf32>, vector<2x8x16xf32> -> vector<2x8x128xf32>
    %165 = vector.shape_cast %164 : vector<2x8x128xf32> to vector<16x128xf32>
    %166 = arith.truncf %165 : vector<16x128xf32> to vector<16x128xbf16>
    %c0_57 = arith.constant 0 : index
    %c0_58 = arith.constant 0 : index
    %167 = vector.load %arg8[%c0_57, %c0_58] : memref<128x128xbf16, #tpu.memory_space<vmem>>, vector<128x128xbf16>
    %cst_59 = arith.constant dense<0.000000e+00> : vector<16x128xf32>
    %168 = tpu.matmul %166, %167, %cst_59 {dimension_numbers = #tpu.dot_dimension_numbers<[1], [0], [0], [1], [0, 0, 1, 1], [], []>} : vector<16x128xbf16>, vector<128x128xbf16>, vector<16x128xf32> -> vector<16x128xf32>
    %c0_60 = arith.constant 0 : index
    %c0_61 = arith.constant 0 : index
    %169 = vector.load %arg9[%c0_60, %c0_61] : memref<1x128xf32, #tpu.memory_space<vmem>>, vector<1x128xf32>
    %170 = vector.broadcast %169 : vector<1x128xf32> to vector<16x128xf32>
    %171 = arith.addf %168, %170 : vector<16x128xf32>
    %172 = arith.addf %12, %171 : vector<16x128xf32>
    %173 = vector.extract_strided_slice %11 {offsets = [0, 0], sizes = [1, 128], strides = [1, 1]} : vector<6x128xf32> to vector<1x128xf32>
    %174 = vector.extract_strided_slice %11 {offsets = [1, 0], sizes = [1, 128], strides = [1, 1]} : vector<6x128xf32> to vector<1x128xf32>
    %cst_62 = arith.constant dense<0.000000e+00> : vector<16xf32>
    %175 = vector.multi_reduction <add>, %172, %cst_62 [1] : vector<16x128xf32> to vector<16xf32>
    %176 = vector.shape_cast %175 : vector<16xf32> to vector<16x1xf32>
    %cst_63 = arith.constant 1.280000e+02 : f32
    %177 = vector.broadcast %cst_63 : f32 to vector<16x1xf32>
    %178 = arith.divf %176, %177 : vector<16x1xf32>
    %179 = vector.broadcast %178 : vector<16x1xf32> to vector<16x128xf32>
    %180 = arith.subf %172, %179 : vector<16x128xf32>
    %181 = arith.mulf %180, %180 : vector<16x128xf32>
    %cst_64 = arith.constant dense<0.000000e+00> : vector<16xf32>
    %182 = vector.multi_reduction <add>, %181, %cst_64 [1] : vector<16x128xf32> to vector<16xf32>
    %183 = vector.shape_cast %182 : vector<16xf32> to vector<16x1xf32>
    %cst_65 = arith.constant 1.280000e+02 : f32
    %184 = vector.broadcast %cst_65 : f32 to vector<16x1xf32>
    %185 = arith.divf %183, %184 : vector<16x1xf32>
    %186 = vector.broadcast %178 : vector<16x1xf32> to vector<16x128xf32>
    %187 = arith.subf %172, %186 : vector<16x128xf32>
    %cst_66 = arith.constant 9.99999974E-6 : f32
    %188 = vector.broadcast %cst_66 : f32 to vector<16x1xf32>
    %189 = arith.addf %185, %188 : vector<16x1xf32>
    %190 = math.rsqrt %189 : vector<16x1xf32>
    %191 = vector.broadcast %190 : vector<16x1xf32> to vector<16x128xf32>
    %192 = arith.mulf %187, %191 : vector<16x128xf32>
    %193 = vector.broadcast %173 : vector<1x128xf32> to vector<16x128xf32>
    %194 = arith.mulf %192, %193 : vector<16x128xf32>
    %195 = vector.broadcast %174 : vector<1x128xf32> to vector<16x128xf32>
    %196 = arith.addf %194, %195 : vector<16x128xf32>
    %197 = arith.addf %196, %4 : vector<16x128xf32>
    %198 = arith.truncf %197 : vector<16x128xf32> to vector<16x128xbf16>
    %199 = arith.addf %13, %9 : vector<64x128xf32>
    %200 = arith.truncf %199 : vector<64x128xf32> to vector<64x128xbf16>
    %c0_67 = arith.constant 0 : index
    %c0_68 = arith.constant 0 : index
    %201 = vector.load %arg10[%c0_67, %c0_68] : memref<128x384xbf16, #tpu.memory_space<vmem>>, vector<128x128xbf16>
    %cst_69 = arith.constant dense<0.000000e+00> : vector<16x128xf32>
    %202 = tpu.matmul %198, %201, %cst_69 {dimension_numbers = #tpu.dot_dimension_numbers<[1], [0], [0], [1], [0, 0, 1, 1], [], []>} : vector<16x128xbf16>, vector<128x128xbf16>, vector<16x128xf32> -> vector<16x128xf32>
    %c0_70 = arith.constant 0 : index
    %c0_71 = arith.constant 0 : index
    %203 = vector.load %arg11[%c0_70, %c0_71] : memref<1x384xf32, #tpu.memory_space<vmem>>, vector<1x128xf32>
    %204 = vector.broadcast %203 : vector<1x128xf32> to vector<16x128xf32>
    %205 = arith.addf %202, %204 : vector<16x128xf32>
    %cst_72 = arith.constant 2.500000e-01 : f32
    %206 = vector.broadcast %cst_72 : f32 to vector<16x128xf32>
    %207 = arith.mulf %205, %206 : vector<16x128xf32>
    %c0_73 = arith.constant 0 : index
    %c128 = arith.constant 128 : index
    %208 = vector.load %arg10[%c0_73, %c128] : memref<128x384xbf16, #tpu.memory_space<vmem>>, vector<128x128xbf16>
    %cst_74 = arith.constant dense<0.000000e+00> : vector<64x128xf32>
    %209 = tpu.matmul %200, %208, %cst_74 {dimension_numbers = #tpu.dot_dimension_numbers<[1], [0], [0], [1], [0, 0, 1, 1], [], []>} : vector<64x128xbf16>, vector<128x128xbf16>, vector<64x128xf32> -> vector<64x128xf32>
    %c0_75 = arith.constant 0 : index
    %c128_76 = arith.constant 128 : index
    %210 = vector.load %arg11[%c0_75, %c128_76] : memref<1x384xf32, #tpu.memory_space<vmem>>, vector<1x128xf32>
    %211 = vector.broadcast %210 : vector<1x128xf32> to vector<64x128xf32>
    %212 = arith.addf %209, %211 : vector<64x128xf32>
    %c0_77 = arith.constant 0 : index
    %c256_78 = arith.constant 256 : index
    %213 = vector.load %arg10[%c0_77, %c256_78] : memref<128x384xbf16, #tpu.memory_space<vmem>>, vector<128x128xbf16>
    %cst_79 = arith.constant dense<0.000000e+00> : vector<64x128xf32>
    %214 = tpu.matmul %6, %213, %cst_79 {dimension_numbers = #tpu.dot_dimension_numbers<[1], [0], [0], [1], [0, 0, 1, 1], [], []>} : vector<64x128xbf16>, vector<128x128xbf16>, vector<64x128xf32> -> vector<64x128xf32>
    %c0_80 = arith.constant 0 : index
    %c256_81 = arith.constant 256 : index
    %215 = vector.load %arg11[%c0_80, %c256_81] : memref<1x384xf32, #tpu.memory_space<vmem>>, vector<1x128xf32>
    %216 = vector.broadcast %215 : vector<1x128xf32> to vector<64x128xf32>
    %217 = arith.addf %214, %216 : vector<64x128xf32>
    %218 = arith.truncf %207 : vector<16x128xf32> to vector<16x128xbf16>
    %219 = vector.shape_cast %218 : vector<16x128xbf16> to vector<2x8x128xbf16>
    %220 = arith.truncf %212 : vector<64x128xf32> to vector<64x128xbf16>
    %221 = vector.shape_cast %220 : vector<64x128xbf16> to vector<2x32x128xbf16>
    %222 = arith.truncf %217 : vector<64x128xf32> to vector<64x128xbf16>
    %223 = vector.shape_cast %222 : vector<64x128xbf16> to vector<2x32x128xbf16>
    %224 = vector.extract_strided_slice %219 {offsets = [0, 0, 0], sizes = [2, 8, 16], strides = [1, 1, 1]} : vector<2x8x128xbf16> to vector<2x8x16xbf16>
    %225 = vector.extract_strided_slice %221 {offsets = [0, 0, 0], sizes = [2, 32, 16], strides = [1, 1, 1]} : vector<2x32x128xbf16> to vector<2x32x16xbf16>
    "tpu.trace_start"() <{level = 10 : i32, message = "bqd,bkd->bqk"}> : () -> ()
    %cst_82 = arith.constant dense<0.000000e+00> : vector<2x8x32xf32>
    %226 = tpu.matmul %224, %225, %cst_82 {dimension_numbers = #tpu.dot_dimension_numbers<[2], [2], [1], [1], [0, 0, 0, 1, 1, 1], [0], [0]>} : vector<2x8x16xbf16>, vector<2x32x16xbf16>, vector<2x8x32xf32> -> vector<2x8x32xf32>
    "tpu.trace_stop"() : () -> ()
    %227 = vector.broadcast %10 : vector<2x1x32xf32> to vector<2x8x32xf32>
    %228 = arith.addf %226, %227 : vector<2x8x32xf32>
    %cst_83 = arith.constant dense<0xFF800000> : vector<2x8xf32>
    %229 = vector.multi_reduction <maximumf>, %228, %cst_83 [2] : vector<2x8x32xf32> to vector<2x8xf32>
    %230 = vector.shape_cast %229 : vector<2x8xf32> to vector<2x8x1xf32>
    %231 = vector.broadcast %230 : vector<2x8x1xf32> to vector<2x8x32xf32>
    %232 = arith.subf %228, %231 : vector<2x8x32xf32>
    %233 = math.exp %232 : vector<2x8x32xf32>
    %cst_84 = arith.constant dense<0.000000e+00> : vector<2x8xf32>
    %234 = vector.multi_reduction <add>, %233, %cst_84 [2] : vector<2x8x32xf32> to vector<2x8xf32>
    %235 = vector.shape_cast %234 : vector<2x8xf32> to vector<2x8x1xf32>
    %236 = tpu.reciprocal %235 {approx = true} : vector<2x8x1xf32> -> vector<2x8x1xf32>
    %237 = vector.broadcast %236 : vector<2x8x1xf32> to vector<2x8x32xf32>
    %238 = arith.mulf %233, %237 : vector<2x8x32xf32>
    %239 = arith.truncf %238 : vector<2x8x32xf32> to vector<2x8x32xbf16>
    %240 = vector.extract_strided_slice %223 {offsets = [0, 0, 0], sizes = [2, 32, 16], strides = [1, 1, 1]} : vector<2x32x128xbf16> to vector<2x32x16xbf16>
    "tpu.trace_start"() <{level = 10 : i32, message = "bqk,bkd->bqd"}> : () -> ()
    %cst_85 = arith.constant dense<0.000000e+00> : vector<2x8x16xf32>
    %241 = tpu.matmul %239, %240, %cst_85 {dimension_numbers = #tpu.dot_dimension_numbers<[2], [1], [1], [2], [0, 0, 0, 1, 1, 2], [0], [0]>} : vector<2x8x32xbf16>, vector<2x32x16xbf16>, vector<2x8x16xf32> -> vector<2x8x16xf32>
    "tpu.trace_stop"() : () -> ()
    %242 = vector.extract_strided_slice %219 {offsets = [0, 0, 16], sizes = [2, 8, 16], strides = [1, 1, 1]} : vector<2x8x128xbf16> to vector<2x8x16xbf16>
    %243 = vector.extract_strided_slice %221 {offsets = [0, 0, 16], sizes = [2, 32, 16], strides = [1, 1, 1]} : vector<2x32x128xbf16> to vector<2x32x16xbf16>
    "tpu.trace_start"() <{level = 10 : i32, message = "bqd,bkd->bqk"}> : () -> ()
    %cst_86 = arith.constant dense<0.000000e+00> : vector<2x8x32xf32>
    %244 = tpu.matmul %242, %243, %cst_86 {dimension_numbers = #tpu.dot_dimension_numbers<[2], [2], [1], [1], [0, 0, 0, 1, 1, 1], [0], [0]>} : vector<2x8x16xbf16>, vector<2x32x16xbf16>, vector<2x8x32xf32> -> vector<2x8x32xf32>
    "tpu.trace_stop"() : () -> ()
    %245 = vector.broadcast %10 : vector<2x1x32xf32> to vector<2x8x32xf32>
    %246 = arith.addf %244, %245 : vector<2x8x32xf32>
    %cst_87 = arith.constant dense<0xFF800000> : vector<2x8xf32>
    %247 = vector.multi_reduction <maximumf>, %246, %cst_87 [2] : vector<2x8x32xf32> to vector<2x8xf32>
    %248 = vector.shape_cast %247 : vector<2x8xf32> to vector<2x8x1xf32>
    %249 = vector.broadcast %248 : vector<2x8x1xf32> to vector<2x8x32xf32>
    %250 = arith.subf %246, %249 : vector<2x8x32xf32>
    %251 = math.exp %250 : vector<2x8x32xf32>
    %cst_88 = arith.constant dense<0.000000e+00> : vector<2x8xf32>
    %252 = vector.multi_reduction <add>, %251, %cst_88 [2] : vector<2x8x32xf32> to vector<2x8xf32>
    %253 = vector.shape_cast %252 : vector<2x8xf32> to vector<2x8x1xf32>
    %254 = tpu.reciprocal %253 {approx = true} : vector<2x8x1xf32> -> vector<2x8x1xf32>
    %255 = vector.broadcast %254 : vector<2x8x1xf32> to vector<2x8x32xf32>
    %256 = arith.mulf %251, %255 : vector<2x8x32xf32>
    %257 = arith.truncf %256 : vector<2x8x32xf32> to vector<2x8x32xbf16>
    %258 = vector.extract_strided_slice %223 {offsets = [0, 0, 16], sizes = [2, 32, 16], strides = [1, 1, 1]} : vector<2x32x128xbf16> to vector<2x32x16xbf16>
    "tpu.trace_start"() <{level = 10 : i32, message = "bqk,bkd->bqd"}> : () -> ()
    %cst_89 = arith.constant dense<0.000000e+00> : vector<2x8x16xf32>
    %259 = tpu.matmul %257, %258, %cst_89 {dimension_numbers = #tpu.dot_dimension_numbers<[2], [1], [1], [2], [0, 0, 0, 1, 1, 2], [0], [0]>} : vector<2x8x32xbf16>, vector<2x32x16xbf16>, vector<2x8x16xf32> -> vector<2x8x16xf32>
    "tpu.trace_stop"() : () -> ()
    %260 = vector.extract_strided_slice %219 {offsets = [0, 0, 32], sizes = [2, 8, 16], strides = [1, 1, 1]} : vector<2x8x128xbf16> to vector<2x8x16xbf16>
    %261 = vector.extract_strided_slice %221 {offsets = [0, 0, 32], sizes = [2, 32, 16], strides = [1, 1, 1]} : vector<2x32x128xbf16> to vector<2x32x16xbf16>
    "tpu.trace_start"() <{level = 10 : i32, message = "bqd,bkd->bqk"}> : () -> ()
    %cst_90 = arith.constant dense<0.000000e+00> : vector<2x8x32xf32>
    %262 = tpu.matmul %260, %261, %cst_90 {dimension_numbers = #tpu.dot_dimension_numbers<[2], [2], [1], [1], [0, 0, 0, 1, 1, 1], [0], [0]>} : vector<2x8x16xbf16>, vector<2x32x16xbf16>, vector<2x8x32xf32> -> vector<2x8x32xf32>
    "tpu.trace_stop"() : () -> ()
    %263 = vector.broadcast %10 : vector<2x1x32xf32> to vector<2x8x32xf32>
    %264 = arith.addf %262, %263 : vector<2x8x32xf32>
    %cst_91 = arith.constant dense<0xFF800000> : vector<2x8xf32>
    %265 = vector.multi_reduction <maximumf>, %264, %cst_91 [2] : vector<2x8x32xf32> to vector<2x8xf32>
    %266 = vector.shape_cast %265 : vector<2x8xf32> to vector<2x8x1xf32>
    %267 = vector.broadcast %266 : vector<2x8x1xf32> to vector<2x8x32xf32>
    %268 = arith.subf %264, %267 : vector<2x8x32xf32>
    %269 = math.exp %268 : vector<2x8x32xf32>
    %cst_92 = arith.constant dense<0.000000e+00> : vector<2x8xf32>
    %270 = vector.multi_reduction <add>, %269, %cst_92 [2] : vector<2x8x32xf32> to vector<2x8xf32>
    %271 = vector.shape_cast %270 : vector<2x8xf32> to vector<2x8x1xf32>
    %272 = tpu.reciprocal %271 {approx = true} : vector<2x8x1xf32> -> vector<2x8x1xf32>
    %273 = vector.broadcast %272 : vector<2x8x1xf32> to vector<2x8x32xf32>
    %274 = arith.mulf %269, %273 : vector<2x8x32xf32>
    %275 = arith.truncf %274 : vector<2x8x32xf32> to vector<2x8x32xbf16>
    %276 = vector.extract_strided_slice %223 {offsets = [0, 0, 32], sizes = [2, 32, 16], strides = [1, 1, 1]} : vector<2x32x128xbf16> to vector<2x32x16xbf16>
    "tpu.trace_start"() <{level = 10 : i32, message = "bqk,bkd->bqd"}> : () -> ()
    %cst_93 = arith.constant dense<0.000000e+00> : vector<2x8x16xf32>
    %277 = tpu.matmul %275, %276, %cst_93 {dimension_numbers = #tpu.dot_dimension_numbers<[2], [1], [1], [2], [0, 0, 0, 1, 1, 2], [0], [0]>} : vector<2x8x32xbf16>, vector<2x32x16xbf16>, vector<2x8x16xf32> -> vector<2x8x16xf32>
    "tpu.trace_stop"() : () -> ()
    %278 = vector.extract_strided_slice %219 {offsets = [0, 0, 48], sizes = [2, 8, 16], strides = [1, 1, 1]} : vector<2x8x128xbf16> to vector<2x8x16xbf16>
    %279 = vector.extract_strided_slice %221 {offsets = [0, 0, 48], sizes = [2, 32, 16], strides = [1, 1, 1]} : vector<2x32x128xbf16> to vector<2x32x16xbf16>
    "tpu.trace_start"() <{level = 10 : i32, message = "bqd,bkd->bqk"}> : () -> ()
    %cst_94 = arith.constant dense<0.000000e+00> : vector<2x8x32xf32>
    %280 = tpu.matmul %278, %279, %cst_94 {dimension_numbers = #tpu.dot_dimension_numbers<[2], [2], [1], [1], [0, 0, 0, 1, 1, 1], [0], [0]>} : vector<2x8x16xbf16>, vector<2x32x16xbf16>, vector<2x8x32xf32> -> vector<2x8x32xf32>
    "tpu.trace_stop"() : () -> ()
    %281 = vector.broadcast %10 : vector<2x1x32xf32> to vector<2x8x32xf32>
    %282 = arith.addf %280, %281 : vector<2x8x32xf32>
    %cst_95 = arith.constant dense<0xFF800000> : vector<2x8xf32>
    %283 = vector.multi_reduction <maximumf>, %282, %cst_95 [2] : vector<2x8x32xf32> to vector<2x8xf32>
    %284 = vector.shape_cast %283 : vector<2x8xf32> to vector<2x8x1xf32>
    %285 = vector.broadcast %284 : vector<2x8x1xf32> to vector<2x8x32xf32>
    %286 = arith.subf %282, %285 : vector<2x8x32xf32>
    %287 = math.exp %286 : vector<2x8x32xf32>
    %cst_96 = arith.constant dense<0.000000e+00> : vector<2x8xf32>
    %288 = vector.multi_reduction <add>, %287, %cst_96 [2] : vector<2x8x32xf32> to vector<2x8xf32>
    %289 = vector.shape_cast %288 : vector<2x8xf32> to vector<2x8x1xf32>
    %290 = tpu.reciprocal %289 {approx = true} : vector<2x8x1xf32> -> vector<2x8x1xf32>
    %291 = vector.broadcast %290 : vector<2x8x1xf32> to vector<2x8x32xf32>
    %292 = arith.mulf %287, %291 : vector<2x8x32xf32>
    %293 = arith.truncf %292 : vector<2x8x32xf32> to vector<2x8x32xbf16>
    %294 = vector.extract_strided_slice %223 {offsets = [0, 0, 48], sizes = [2, 32, 16], strides = [1, 1, 1]} : vector<2x32x128xbf16> to vector<2x32x16xbf16>
    "tpu.trace_start"() <{level = 10 : i32, message = "bqk,bkd->bqd"}> : () -> ()
    %cst_97 = arith.constant dense<0.000000e+00> : vector<2x8x16xf32>
    %295 = tpu.matmul %293, %294, %cst_97 {dimension_numbers = #tpu.dot_dimension_numbers<[2], [1], [1], [2], [0, 0, 0, 1, 1, 2], [0], [0]>} : vector<2x8x32xbf16>, vector<2x32x16xbf16>, vector<2x8x16xf32> -> vector<2x8x16xf32>
    "tpu.trace_stop"() : () -> ()
    %296 = vector.extract_strided_slice %219 {offsets = [0, 0, 64], sizes = [2, 8, 16], strides = [1, 1, 1]} : vector<2x8x128xbf16> to vector<2x8x16xbf16>
    %297 = vector.extract_strided_slice %221 {offsets = [0, 0, 64], sizes = [2, 32, 16], strides = [1, 1, 1]} : vector<2x32x128xbf16> to vector<2x32x16xbf16>
    "tpu.trace_start"() <{level = 10 : i32, message = "bqd,bkd->bqk"}> : () -> ()
    %cst_98 = arith.constant dense<0.000000e+00> : vector<2x8x32xf32>
    %298 = tpu.matmul %296, %297, %cst_98 {dimension_numbers = #tpu.dot_dimension_numbers<[2], [2], [1], [1], [0, 0, 0, 1, 1, 1], [0], [0]>} : vector<2x8x16xbf16>, vector<2x32x16xbf16>, vector<2x8x32xf32> -> vector<2x8x32xf32>
    "tpu.trace_stop"() : () -> ()
    %299 = vector.broadcast %10 : vector<2x1x32xf32> to vector<2x8x32xf32>
    %300 = arith.addf %298, %299 : vector<2x8x32xf32>
    %cst_99 = arith.constant dense<0xFF800000> : vector<2x8xf32>
    %301 = vector.multi_reduction <maximumf>, %300, %cst_99 [2] : vector<2x8x32xf32> to vector<2x8xf32>
    %302 = vector.shape_cast %301 : vector<2x8xf32> to vector<2x8x1xf32>
    %303 = vector.broadcast %302 : vector<2x8x1xf32> to vector<2x8x32xf32>
    %304 = arith.subf %300, %303 : vector<2x8x32xf32>
    %305 = math.exp %304 : vector<2x8x32xf32>
    %cst_100 = arith.constant dense<0.000000e+00> : vector<2x8xf32>
    %306 = vector.multi_reduction <add>, %305, %cst_100 [2] : vector<2x8x32xf32> to vector<2x8xf32>
    %307 = vector.shape_cast %306 : vector<2x8xf32> to vector<2x8x1xf32>
    %308 = tpu.reciprocal %307 {approx = true} : vector<2x8x1xf32> -> vector<2x8x1xf32>
    %309 = vector.broadcast %308 : vector<2x8x1xf32> to vector<2x8x32xf32>
    %310 = arith.mulf %305, %309 : vector<2x8x32xf32>
    %311 = arith.truncf %310 : vector<2x8x32xf32> to vector<2x8x32xbf16>
    %312 = vector.extract_strided_slice %223 {offsets = [0, 0, 64], sizes = [2, 32, 16], strides = [1, 1, 1]} : vector<2x32x128xbf16> to vector<2x32x16xbf16>
    "tpu.trace_start"() <{level = 10 : i32, message = "bqk,bkd->bqd"}> : () -> ()
    %cst_101 = arith.constant dense<0.000000e+00> : vector<2x8x16xf32>
    %313 = tpu.matmul %311, %312, %cst_101 {dimension_numbers = #tpu.dot_dimension_numbers<[2], [1], [1], [2], [0, 0, 0, 1, 1, 2], [0], [0]>} : vector<2x8x32xbf16>, vector<2x32x16xbf16>, vector<2x8x16xf32> -> vector<2x8x16xf32>
    "tpu.trace_stop"() : () -> ()
    %314 = vector.extract_strided_slice %219 {offsets = [0, 0, 80], sizes = [2, 8, 16], strides = [1, 1, 1]} : vector<2x8x128xbf16> to vector<2x8x16xbf16>
    %315 = vector.extract_strided_slice %221 {offsets = [0, 0, 80], sizes = [2, 32, 16], strides = [1, 1, 1]} : vector<2x32x128xbf16> to vector<2x32x16xbf16>
    "tpu.trace_start"() <{level = 10 : i32, message = "bqd,bkd->bqk"}> : () -> ()
    %cst_102 = arith.constant dense<0.000000e+00> : vector<2x8x32xf32>
    %316 = tpu.matmul %314, %315, %cst_102 {dimension_numbers = #tpu.dot_dimension_numbers<[2], [2], [1], [1], [0, 0, 0, 1, 1, 1], [0], [0]>} : vector<2x8x16xbf16>, vector<2x32x16xbf16>, vector<2x8x32xf32> -> vector<2x8x32xf32>
    "tpu.trace_stop"() : () -> ()
    %317 = vector.broadcast %10 : vector<2x1x32xf32> to vector<2x8x32xf32>
    %318 = arith.addf %316, %317 : vector<2x8x32xf32>
    %cst_103 = arith.constant dense<0xFF800000> : vector<2x8xf32>
    %319 = vector.multi_reduction <maximumf>, %318, %cst_103 [2] : vector<2x8x32xf32> to vector<2x8xf32>
    %320 = vector.shape_cast %319 : vector<2x8xf32> to vector<2x8x1xf32>
    %321 = vector.broadcast %320 : vector<2x8x1xf32> to vector<2x8x32xf32>
    %322 = arith.subf %318, %321 : vector<2x8x32xf32>
    %323 = math.exp %322 : vector<2x8x32xf32>
    %cst_104 = arith.constant dense<0.000000e+00> : vector<2x8xf32>
    %324 = vector.multi_reduction <add>, %323, %cst_104 [2] : vector<2x8x32xf32> to vector<2x8xf32>
    %325 = vector.shape_cast %324 : vector<2x8xf32> to vector<2x8x1xf32>
    %326 = tpu.reciprocal %325 {approx = true} : vector<2x8x1xf32> -> vector<2x8x1xf32>
    %327 = vector.broadcast %326 : vector<2x8x1xf32> to vector<2x8x32xf32>
    %328 = arith.mulf %323, %327 : vector<2x8x32xf32>
    %329 = arith.truncf %328 : vector<2x8x32xf32> to vector<2x8x32xbf16>
    %330 = vector.extract_strided_slice %223 {offsets = [0, 0, 80], sizes = [2, 32, 16], strides = [1, 1, 1]} : vector<2x32x128xbf16> to vector<2x32x16xbf16>
    "tpu.trace_start"() <{level = 10 : i32, message = "bqk,bkd->bqd"}> : () -> ()
    %cst_105 = arith.constant dense<0.000000e+00> : vector<2x8x16xf32>
    %331 = tpu.matmul %329, %330, %cst_105 {dimension_numbers = #tpu.dot_dimension_numbers<[2], [1], [1], [2], [0, 0, 0, 1, 1, 2], [0], [0]>} : vector<2x8x32xbf16>, vector<2x32x16xbf16>, vector<2x8x16xf32> -> vector<2x8x16xf32>
    "tpu.trace_stop"() : () -> ()
    %332 = vector.extract_strided_slice %219 {offsets = [0, 0, 96], sizes = [2, 8, 16], strides = [1, 1, 1]} : vector<2x8x128xbf16> to vector<2x8x16xbf16>
    %333 = vector.extract_strided_slice %221 {offsets = [0, 0, 96], sizes = [2, 32, 16], strides = [1, 1, 1]} : vector<2x32x128xbf16> to vector<2x32x16xbf16>
    "tpu.trace_start"() <{level = 10 : i32, message = "bqd,bkd->bqk"}> : () -> ()
    %cst_106 = arith.constant dense<0.000000e+00> : vector<2x8x32xf32>
    %334 = tpu.matmul %332, %333, %cst_106 {dimension_numbers = #tpu.dot_dimension_numbers<[2], [2], [1], [1], [0, 0, 0, 1, 1, 1], [0], [0]>} : vector<2x8x16xbf16>, vector<2x32x16xbf16>, vector<2x8x32xf32> -> vector<2x8x32xf32>
    "tpu.trace_stop"() : () -> ()
    %335 = vector.broadcast %10 : vector<2x1x32xf32> to vector<2x8x32xf32>
    %336 = arith.addf %334, %335 : vector<2x8x32xf32>
    %cst_107 = arith.constant dense<0xFF800000> : vector<2x8xf32>
    %337 = vector.multi_reduction <maximumf>, %336, %cst_107 [2] : vector<2x8x32xf32> to vector<2x8xf32>
    %338 = vector.shape_cast %337 : vector<2x8xf32> to vector<2x8x1xf32>
    %339 = vector.broadcast %338 : vector<2x8x1xf32> to vector<2x8x32xf32>
    %340 = arith.subf %336, %339 : vector<2x8x32xf32>
    %341 = math.exp %340 : vector<2x8x32xf32>
    %cst_108 = arith.constant dense<0.000000e+00> : vector<2x8xf32>
    %342 = vector.multi_reduction <add>, %341, %cst_108 [2] : vector<2x8x32xf32> to vector<2x8xf32>
    %343 = vector.shape_cast %342 : vector<2x8xf32> to vector<2x8x1xf32>
    %344 = tpu.reciprocal %343 {approx = true} : vector<2x8x1xf32> -> vector<2x8x1xf32>
    %345 = vector.broadcast %344 : vector<2x8x1xf32> to vector<2x8x32xf32>
    %346 = arith.mulf %341, %345 : vector<2x8x32xf32>
    %347 = arith.truncf %346 : vector<2x8x32xf32> to vector<2x8x32xbf16>
    %348 = vector.extract_strided_slice %223 {offsets = [0, 0, 96], sizes = [2, 32, 16], strides = [1, 1, 1]} : vector<2x32x128xbf16> to vector<2x32x16xbf16>
    "tpu.trace_start"() <{level = 10 : i32, message = "bqk,bkd->bqd"}> : () -> ()
    %cst_109 = arith.constant dense<0.000000e+00> : vector<2x8x16xf32>
    %349 = tpu.matmul %347, %348, %cst_109 {dimension_numbers = #tpu.dot_dimension_numbers<[2], [1], [1], [2], [0, 0, 0, 1, 1, 2], [0], [0]>} : vector<2x8x32xbf16>, vector<2x32x16xbf16>, vector<2x8x16xf32> -> vector<2x8x16xf32>
    "tpu.trace_stop"() : () -> ()
    %350 = vector.extract_strided_slice %219 {offsets = [0, 0, 112], sizes = [2, 8, 16], strides = [1, 1, 1]} : vector<2x8x128xbf16> to vector<2x8x16xbf16>
    %351 = vector.extract_strided_slice %221 {offsets = [0, 0, 112], sizes = [2, 32, 16], strides = [1, 1, 1]} : vector<2x32x128xbf16> to vector<2x32x16xbf16>
    "tpu.trace_start"() <{level = 10 : i32, message = "bqd,bkd->bqk"}> : () -> ()
    %cst_110 = arith.constant dense<0.000000e+00> : vector<2x8x32xf32>
    %352 = tpu.matmul %350, %351, %cst_110 {dimension_numbers = #tpu.dot_dimension_numbers<[2], [2], [1], [1], [0, 0, 0, 1, 1, 1], [0], [0]>} : vector<2x8x16xbf16>, vector<2x32x16xbf16>, vector<2x8x32xf32> -> vector<2x8x32xf32>
    "tpu.trace_stop"() : () -> ()
    %353 = vector.broadcast %10 : vector<2x1x32xf32> to vector<2x8x32xf32>
    %354 = arith.addf %352, %353 : vector<2x8x32xf32>
    %cst_111 = arith.constant dense<0xFF800000> : vector<2x8xf32>
    %355 = vector.multi_reduction <maximumf>, %354, %cst_111 [2] : vector<2x8x32xf32> to vector<2x8xf32>
    %356 = vector.shape_cast %355 : vector<2x8xf32> to vector<2x8x1xf32>
    %357 = vector.broadcast %356 : vector<2x8x1xf32> to vector<2x8x32xf32>
    %358 = arith.subf %354, %357 : vector<2x8x32xf32>
    %359 = math.exp %358 : vector<2x8x32xf32>
    %cst_112 = arith.constant dense<0.000000e+00> : vector<2x8xf32>
    %360 = vector.multi_reduction <add>, %359, %cst_112 [2] : vector<2x8x32xf32> to vector<2x8xf32>
    %361 = vector.shape_cast %360 : vector<2x8xf32> to vector<2x8x1xf32>
    %362 = tpu.reciprocal %361 {approx = true} : vector<2x8x1xf32> -> vector<2x8x1xf32>
    %363 = vector.broadcast %362 : vector<2x8x1xf32> to vector<2x8x32xf32>
    %364 = arith.mulf %359, %363 : vector<2x8x32xf32>
    %365 = arith.truncf %364 : vector<2x8x32xf32> to vector<2x8x32xbf16>
    %366 = vector.extract_strided_slice %223 {offsets = [0, 0, 112], sizes = [2, 32, 16], strides = [1, 1, 1]} : vector<2x32x128xbf16> to vector<2x32x16xbf16>
    "tpu.trace_start"() <{level = 10 : i32, message = "bqk,bkd->bqd"}> : () -> ()
    %cst_113 = arith.constant dense<0.000000e+00> : vector<2x8x16xf32>
    %367 = tpu.matmul %365, %366, %cst_113 {dimension_numbers = #tpu.dot_dimension_numbers<[2], [1], [1], [2], [0, 0, 0, 1, 1, 2], [0], [0]>} : vector<2x8x32xbf16>, vector<2x32x16xbf16>, vector<2x8x16xf32> -> vector<2x8x16xf32>
    "tpu.trace_stop"() : () -> ()
    %368 = tpu.concatenate %241, %259, %277, %295, %313, %331, %349, %367 in 2 : vector<2x8x16xf32>, vector<2x8x16xf32>, vector<2x8x16xf32>, vector<2x8x16xf32>, vector<2x8x16xf32>, vector<2x8x16xf32>, vector<2x8x16xf32>, vector<2x8x16xf32> -> vector<2x8x128xf32>
    %369 = vector.shape_cast %368 : vector<2x8x128xf32> to vector<16x128xf32>
    %370 = arith.truncf %369 : vector<16x128xf32> to vector<16x128xbf16>
    %c0_114 = arith.constant 0 : index
    %c0_115 = arith.constant 0 : index
    %371 = vector.load %arg12[%c0_114, %c0_115] : memref<128x128xbf16, #tpu.memory_space<vmem>>, vector<128x128xbf16>
    %cst_116 = arith.constant dense<0.000000e+00> : vector<16x128xf32>
    %372 = tpu.matmul %370, %371, %cst_116 {dimension_numbers = #tpu.dot_dimension_numbers<[1], [0], [0], [1], [0, 0, 1, 1], [], []>} : vector<16x128xbf16>, vector<128x128xbf16>, vector<16x128xf32> -> vector<16x128xf32>
    %c0_117 = arith.constant 0 : index
    %c0_118 = arith.constant 0 : index
    %373 = vector.load %arg13[%c0_117, %c0_118] : memref<1x128xf32, #tpu.memory_space<vmem>>, vector<1x128xf32>
    %374 = vector.broadcast %373 : vector<1x128xf32> to vector<16x128xf32>
    %375 = arith.addf %372, %374 : vector<16x128xf32>
    %376 = arith.addf %196, %375 : vector<16x128xf32>
    %377 = vector.extract_strided_slice %11 {offsets = [2, 0], sizes = [1, 128], strides = [1, 1]} : vector<6x128xf32> to vector<1x128xf32>
    %378 = vector.extract_strided_slice %11 {offsets = [3, 0], sizes = [1, 128], strides = [1, 1]} : vector<6x128xf32> to vector<1x128xf32>
    %cst_119 = arith.constant dense<0.000000e+00> : vector<16xf32>
    %379 = vector.multi_reduction <add>, %376, %cst_119 [1] : vector<16x128xf32> to vector<16xf32>
    %380 = vector.shape_cast %379 : vector<16xf32> to vector<16x1xf32>
    %cst_120 = arith.constant 1.280000e+02 : f32
    %381 = vector.broadcast %cst_120 : f32 to vector<16x1xf32>
    %382 = arith.divf %380, %381 : vector<16x1xf32>
    %383 = vector.broadcast %382 : vector<16x1xf32> to vector<16x128xf32>
    %384 = arith.subf %376, %383 : vector<16x128xf32>
    %385 = arith.mulf %384, %384 : vector<16x128xf32>
    %cst_121 = arith.constant dense<0.000000e+00> : vector<16xf32>
    %386 = vector.multi_reduction <add>, %385, %cst_121 [1] : vector<16x128xf32> to vector<16xf32>
    %387 = vector.shape_cast %386 : vector<16xf32> to vector<16x1xf32>
    %cst_122 = arith.constant 1.280000e+02 : f32
    %388 = vector.broadcast %cst_122 : f32 to vector<16x1xf32>
    %389 = arith.divf %387, %388 : vector<16x1xf32>
    %390 = vector.broadcast %382 : vector<16x1xf32> to vector<16x128xf32>
    %391 = arith.subf %376, %390 : vector<16x128xf32>
    %cst_123 = arith.constant 9.99999974E-6 : f32
    %392 = vector.broadcast %cst_123 : f32 to vector<16x1xf32>
    %393 = arith.addf %389, %392 : vector<16x1xf32>
    %394 = math.rsqrt %393 : vector<16x1xf32>
    %395 = vector.broadcast %394 : vector<16x1xf32> to vector<16x128xf32>
    %396 = arith.mulf %391, %395 : vector<16x128xf32>
    %397 = vector.broadcast %377 : vector<1x128xf32> to vector<16x128xf32>
    %398 = arith.mulf %396, %397 : vector<16x128xf32>
    %399 = vector.broadcast %378 : vector<1x128xf32> to vector<16x128xf32>
    %400 = arith.addf %398, %399 : vector<16x128xf32>
    %401 = arith.truncf %400 : vector<16x128xf32> to vector<16x128xbf16>
    %c0_124 = arith.constant 0 : index
    %c0_125 = arith.constant 0 : index
    %402 = vector.load %arg14[%c0_124, %c0_125] : memref<128x256xbf16, #tpu.memory_space<vmem>>, vector<128x256xbf16>
    %cst_126 = arith.constant dense<0.000000e+00> : vector<16x256xf32>
    %403 = tpu.matmul %401, %402, %cst_126 {dimension_numbers = #tpu.dot_dimension_numbers<[1], [0], [0], [1], [0, 0, 1, 1], [], []>} : vector<16x128xbf16>, vector<128x256xbf16>, vector<16x256xf32> -> vector<16x256xf32>
    %c0_127 = arith.constant 0 : index
    %c0_128 = arith.constant 0 : index
    %404 = vector.load %arg15[%c0_127, %c0_128] : memref<1x256xf32, #tpu.memory_space<vmem>>, vector<1x256xf32>
    %405 = vector.broadcast %404 : vector<1x256xf32> to vector<16x256xf32>
    %406 = arith.addf %403, %405 : vector<16x256xf32>
    %cst_129 = arith.constant 0.000000e+00 : f32
    %407 = vector.broadcast %cst_129 : f32 to vector<16x256xf32>
    %408 = arith.maximumf %406, %407 : vector<16x256xf32>
    %409 = arith.truncf %408 : vector<16x256xf32> to vector<16x256xbf16>
    %c0_130 = arith.constant 0 : index
    %c0_131 = arith.constant 0 : index
    %410 = vector.load %arg16[%c0_130, %c0_131] : memref<256x128xbf16, #tpu.memory_space<vmem>>, vector<256x128xbf16>
    %cst_132 = arith.constant dense<0.000000e+00> : vector<16x128xf32>
    %411 = tpu.matmul %409, %410, %cst_132 {dimension_numbers = #tpu.dot_dimension_numbers<[1], [0], [0], [1], [0, 0, 1, 1], [], []>} : vector<16x256xbf16>, vector<256x128xbf16>, vector<16x128xf32> -> vector<16x128xf32>
    %c0_133 = arith.constant 0 : index
    %c0_134 = arith.constant 0 : index
    %412 = vector.load %arg17[%c0_133, %c0_134] : memref<1x128xf32, #tpu.memory_space<vmem>>, vector<1x128xf32>
    %413 = vector.broadcast %412 : vector<1x128xf32> to vector<16x128xf32>
    %414 = arith.addf %411, %413 : vector<16x128xf32>
    %415 = arith.addf %400, %414 : vector<16x128xf32>
    %416 = vector.extract_strided_slice %11 {offsets = [4, 0], sizes = [1, 128], strides = [1, 1]} : vector<6x128xf32> to vector<1x128xf32>
    %417 = vector.extract_strided_slice %11 {offsets = [5, 0], sizes = [1, 128], strides = [1, 1]} : vector<6x128xf32> to vector<1x128xf32>
    %cst_135 = arith.constant dense<0.000000e+00> : vector<16xf32>
    %418 = vector.multi_reduction <add>, %415, %cst_135 [1] : vector<16x128xf32> to vector<16xf32>
    %419 = vector.shape_cast %418 : vector<16xf32> to vector<16x1xf32>
    %cst_136 = arith.constant 1.280000e+02 : f32
    %420 = vector.broadcast %cst_136 : f32 to vector<16x1xf32>
    %421 = arith.divf %419, %420 : vector<16x1xf32>
    %422 = vector.broadcast %421 : vector<16x1xf32> to vector<16x128xf32>
    %423 = arith.subf %415, %422 : vector<16x128xf32>
    %424 = arith.mulf %423, %423 : vector<16x128xf32>
    %cst_137 = arith.constant dense<0.000000e+00> : vector<16xf32>
    %425 = vector.multi_reduction <add>, %424, %cst_137 [1] : vector<16x128xf32> to vector<16xf32>
    %426 = vector.shape_cast %425 : vector<16xf32> to vector<16x1xf32>
    %cst_138 = arith.constant 1.280000e+02 : f32
    %427 = vector.broadcast %cst_138 : f32 to vector<16x1xf32>
    %428 = arith.divf %426, %427 : vector<16x1xf32>
    %429 = vector.broadcast %421 : vector<16x1xf32> to vector<16x128xf32>
    %430 = arith.subf %415, %429 : vector<16x128xf32>
    %cst_139 = arith.constant 9.99999974E-6 : f32
    %431 = vector.broadcast %cst_139 : f32 to vector<16x1xf32>
    %432 = arith.addf %428, %431 : vector<16x1xf32>
    %433 = math.rsqrt %432 : vector<16x1xf32>
    %434 = vector.broadcast %433 : vector<16x1xf32> to vector<16x128xf32>
    %435 = arith.mulf %430, %434 : vector<16x128xf32>
    %436 = vector.broadcast %416 : vector<1x128xf32> to vector<16x128xf32>
    %437 = arith.mulf %435, %436 : vector<16x128xf32>
    %438 = vector.broadcast %417 : vector<1x128xf32> to vector<16x128xf32>
    %439 = arith.addf %437, %438 : vector<16x128xf32>
    %440 = vector.shape_cast %439 : vector<16x128xf32> to vector<2x8x128xf32>
    %c0_140 = arith.constant 0 : index
    %c0_141 = arith.constant 0 : index
    %c0_142 = arith.constant 0 : index
    %441 = vector.load %arg19[%c0_140, %c0_141, %c0_142] : memref<2x8x128xf32, #tpu.memory_space<vmem>>, vector<2x8x128xf32>
    tpu.vector_store %arg19[%c0_140, %c0_141, %c0_142], %440 {strides = array<i32>} : memref<2x8x128xf32, #tpu.memory_space<vmem>>, vector<2x8x128xf32>,
    return
  }
  func.func @transform_0(%arg0: i32) -> (i32, i32, i32) {
    %c0_i32 = arith.constant 0 : i32
    %c0_i32_0 = arith.constant 0 : i32
    %c0_i32_1 = arith.constant 0 : i32
    return %arg0, %c0_i32, %c0_i32_0 : i32, i32, i32
  }
  func.func @transform_1(%arg0: i32) -> (i32, i32, i32) {
    %c0_i32 = arith.constant 0 : i32
    %c0_i32_0 = arith.constant 0 : i32
    %c0_i32_1 = arith.constant 0 : i32
    return %arg0, %c0_i32, %c0_i32_0 : i32, i32, i32
  }
  func.func @transform_2(%arg0: i32) -> (i32, i32, i32) {
    %c0_i32 = arith.constant 0 : i32
    %c0_i32_0 = arith.constant 0 : i32
    %c0_i32_1 = arith.constant 0 : i32
    return %arg0, %c0_i32, %c0_i32_0 : i32, i32, i32
  }
  func.func @transform_3(%arg0: i32) -> (i32, i32, i32) {
    %c0_i32 = arith.constant 0 : i32
    %c0_i32_0 = arith.constant 0 : i32
    %c0_i32_1 = arith.constant 0 : i32
    return %arg0, %c0_i32, %c0_i32_0 : i32, i32, i32
  }
  func.func @transform_4(%arg0: i32) -> (i32, i32, i32) {
    %c0_i32 = arith.constant 0 : i32
    %c0_i32_0 = arith.constant 0 : i32
    %c0_i32_1 = arith.constant 0 : i32
    return %arg0, %c0_i32, %c0_i32_0 : i32, i32, i32
  }
  func.func @transform_5(%arg0: i32) -> (i32, i32) {
    %c0_i32 = arith.constant 0 : i32
    %c0_i32_0 = arith.constant 0 : i32
    %c0_i32_1 = arith.constant 0 : i32
    return %c0_i32, %c0_i32_0 : i32, i32
  }
  func.func @transform_6(%arg0: i32) -> (i32, i32) {
    %c0_i32 = arith.constant 0 : i32
    %c0_i32_0 = arith.constant 0 : i32
    %c0_i32_1 = arith.constant 0 : i32
    return %c0_i32, %c0_i32_0 : i32, i32
  }
  func.func @transform_7(%arg0: i32) -> (i32, i32) {
    %c0_i32 = arith.constant 0 : i32
    %c0_i32_0 = arith.constant 0 : i32
    %c0_i32_1 = arith.constant 0 : i32
    return %c0_i32, %c0_i32_0 : i32, i32
  }
  func.func @transform_8(%arg0: i32) -> (i32, i32) {
    %c0_i32 = arith.constant 0 : i32
    %c0_i32_0 = arith.constant 0 : i32
    %c0_i32_1 = arith.constant 0 : i32
    return %c0_i32, %c0_i32_0 : i32, i32
  }
  func.func @transform_9(%arg0: i32) -> (i32, i32) {
    %c0_i32 = arith.constant 0 : i32
    %c0_i32_0 = arith.constant 0 : i32
    %c0_i32_1 = arith.constant 0 : i32
    return %c0_i32, %c0_i32_0 : i32, i32
  }
  func.func @transform_10(%arg0: i32) -> (i32, i32) {
    %c0_i32 = arith.constant 0 : i32
    %c0_i32_0 = arith.constant 0 : i32
    %c0_i32_1 = arith.constant 0 : i32
    return %c0_i32, %c0_i32_0 : i32, i32
  }
  func.func @transform_11(%arg0: i32) -> (i32, i32) {
    %c0_i32 = arith.constant 0 : i32
    %c0_i32_0 = arith.constant 0 : i32
    %c0_i32_1 = arith.constant 0 : i32
    return %c0_i32, %c0_i32_0 : i32, i32
  }
  func.func @transform_12(%arg0: i32) -> (i32, i32) {
    %c0_i32 = arith.constant 0 : i32
    %c0_i32_0 = arith.constant 0 : i32
    %c0_i32_1 = arith.constant 0 : i32
    return %c0_i32, %c0_i32_0 : i32, i32
  }
  func.func @transform_13(%arg0: i32) -> (i32, i32) {
    %c0_i32 = arith.constant 0 : i32
    %c0_i32_0 = arith.constant 0 : i32
    %c0_i32_1 = arith.constant 0 : i32
    return %c0_i32, %c0_i32_0 : i32, i32
  }
  func.func @transform_14(%arg0: i32) -> (i32, i32) {
    %c0_i32 = arith.constant 0 : i32
    %c0_i32_0 = arith.constant 0 : i32
    %c0_i32_1 = arith.constant 0 : i32
    return %c0_i32, %c0_i32_0 : i32, i32
  }
  func.func @transform_15(%arg0: i32) -> (i32, i32) {
    %c0_i32 = arith.constant 0 : i32
    %c0_i32_0 = arith.constant 0 : i32
    %c0_i32_1 = arith.constant 0 : i32
    return %c0_i32, %c0_i32_0 : i32, i32
  }
  func.func @transform_16(%arg0: i32) -> (i32, i32) {
    %c0_i32 = arith.constant 0 : i32
    %c0_i32_0 = arith.constant 0 : i32
    %c0_i32_1 = arith.constant 0 : i32
    return %c0_i32, %c0_i32_0 : i32, i32
  }
  func.func @transform_17(%arg0: i32) -> (i32, i32) {
    %c0_i32 = arith.constant 0 : i32
    %c0_i32_0 = arith.constant 0 : i32
    %c0_i32_1 = arith.constant 0 : i32
    return %c0_i32, %c0_i32_0 : i32, i32
  }
  func.func @transform_18(%arg0: i32) -> (i32, i32, i32) {
    %c0_i32 = arith.constant 0 : i32
    %c0_i32_0 = arith.constant 0 : i32
    %c0_i32_1 = arith.constant 0 : i32
    return %arg0, %c0_i32, %c0_i32_0 : i32, i32, i32
  }
}

</mosaic_0001>

<bundles_post_ra>
// kernel: transformer_decoder_layer_forward.1
= control target key start
LH: loop header
LB: loop body
LE: loop exit
PB: predicated region body
PF: predicated region fallthrough
CT: control target
= control target key end

     0   :  { %vm332_vm0 = vcmask 130048   ;;  %s4186_s24 = smov 80   ;;  %s4187_s25 = smov 64   ;;  %vm399_vm1 = vcmask 1043456   ;;  %vm371_vm2 = vcmask 64512   ;;  %vm1295_vm3 = vcmask 261120   ;;  %s5708_s5 = inlined_call_operand.vmem [shape: bf16[128,384], index: 5, kind: input, shape index: {}]   ;;  %s5709_s0 = inlined_call_operand.vmem [shape: bf16[2,8,128], index: 0, kind: input, shape index: {}]   ;;  %s5710_s2 = inlined_call_operand.vmem [shape: bf16[2,8,128], index: 2, kind: input, shape index: {}]   ;;  %s5711_s6 = inlined_call_operand.vmem [shape: f32[1,384], index: 6, kind: input, shape index: {}]   ;;  %s5712_s8 = inlined_call_operand.vmem [shape: f32[1,128], index: 8, kind: input, shape index: {}]   ;;  %s5713_s7 = inlined_call_operand.vmem [shape: bf16[128,128], index: 7, kind: input, shape index: {}]   ;;  %s5714_s9 = inlined_call_operand.vmem [shape: bf16[128,384], index: 9, kind: input, shape index: {}]   ;;  %s5715_s1 = inlined_call_operand.vmem [shape: bf16[2,32,128], index: 1, kind: input, shape index: {}]   ;;  %s5716_s3 = inlined_call_operand.vmem [shape: bf16[2,32,128], index: 3, kind: input, shape index: {}]   ;;  %s5717_s10 = inlined_call_operand.vmem [shape: f32[1,384], index: 10, kind: input, shape index: {}]   ;;  %s5718_s17 = inlined_call_operand.vmem [shape: f32[6,128], index: 17, kind: input, shape index: {}]   ;;  %s5719_s4 = inlined_call_operand.vmem [shape: f32[2,1,32], index: 4, kind: input, shape index: {}]   ;;  %s5720_s12 = inlined_call_operand.vmem [shape: f32[1,128], index: 12, kind: input, shape index: {}]   ;;  %s5721_s11 = inlined_call_operand.vmem [shape: bf16[128,128], index: 11, kind: input, shape index: {}]   ;;  %s5722_s13 = inlined_call_operand.vmem [shape: bf16[128,256], index: 13, kind: input, shape index: {}]   ;;  %s5723_s15 = inlined_call_operand.vmem [shape: bf16[256,128], index: 15, kind: input, shape index: {}]   ;;  %s5724_s16 = inlined_call_operand.vmem [shape: f32[1,128], index: 16, kind: input, shape index: {}]   ;;  %s5725_s14 = inlined_call_operand.vmem [shape: f32[1,256], index: 14, kind: input, shape index: {}]   ;;  %s5726_s18 = inlined_call_operand.vmem [shape: f32[2,8,128], index: 18, kind: output, shape index: {}]  }
   0x1   :  { %5731 = sst [smem:[#allocation2_spill]] %s5708_s5  ;;  %s4188_s26 = smov 48   ;;  %vm1298_vm4 = vcmask 392192   ;;  %vm1301_vm5 = vcmask 523264   ;;  %vm1304_vm6 = vcmask 654336   ;;  %vm1307_vm7 = vcmask 785408  }
   0x2   :  { %5732 = sst [smem:[#allocation3_spill]] %s5709_s0  ;;  %s4189_s30 = smov 32   ;;  %vm1310_vm8 = vcmask 916480  }
   0x3   :  { %5733 = sst [smem:[#allocation4_spill]] %s5710_s2  ;;  %s5729_s5 = smov 16  }
   0x4   :  { %s5734_s29 = sld [smem:[#allocation2_spill]] }
   0x5   :  { %s5735_s20 = sld [smem:[#allocation3_spill]] }
   0x6   :  { %s5736_s2 = sld [smem:[#allocation4_spill]] }
   0xa   :  { %v3420_v0 = vld [vmem:[%s5734_s29 + $0xa8] sm:$0xf]  ;;  %v3850_v1 = vld [vmem:[%s5734_s29 + $0xb0] sm:$0xf0]  ;;  %v3849_v2 = vld [vmem:[%s5734_s29 + $0xac] sm:$0xf] }
   0xb   :  { %v3421_v3 = vor.u32 %v3850_v1, %v3420_v0  ;;  %v3422_v4 = vld [vmem:[%s5734_s29 + $0xb4] sm:$0xf0]  ;;  %v3412_v5 = vld [vmem:[%s5734_s29 + $0x90] sm:$0xf]  ;;  %v3848_v6 = vld [vmem:[%s5734_s29 + $0x98] sm:$0xf0] }
   0xc   :  { %v3425_v7 = vor.u32 %v3849_v2, %v3422_v4  ;;  %v3847_v8 = vld [vmem:[%s5734_s29 + $0x94] sm:$0xf]  ;;  %v3414_v9 = vld [vmem:[%s5734_s29 + $0x9c] sm:$0xf0]  ;;  %v3413_v10 = vor.u32 %v3848_v6, %v3412_v5  ;;  %v3404_v12 = vld [vmem:[%s5734_s29 + $0x78] sm:$0xf] }
   0xd   :  { %208 = vmatpush.bf16.msra.mxu0 %v3421_v3  ;;  %v3417_v11 = vor.u32 %v3847_v8, %v3414_v9  ;;  %v3846_v13 = vld [vmem:[%s5734_s29 + $0x80] sm:$0xf0]  ;;  %v3845_v14 = vld [vmem:[%s5734_s29 + $0x7c] sm:$0xf]  ;;  %v3406_v15 = vld [vmem:[%s5734_s29 + $0x84] sm:$0xf0] }
   0xe   :  { %222 = vmatpush.bf16.msra.mxu1 %v3425_v7  ;;  %v3405_v16 = vor.u32 %v3846_v13, %v3404_v12  ;;  %v3409_v17 = vor.u32 %v3845_v14, %v3406_v15  ;;  %v3396_v18 = vld [vmem:[%s5734_s29 + $0x60] sm:$0xf]  ;;  %v3844_v19 = vld [vmem:[%s5734_s29 + $0x68] sm:$0xf0]  ;;  %v3843_v20 = vld [vmem:[%s5734_s29 + $0x64] sm:$0xf] }
   0xf   :  { %v3398_v21 = vld [vmem:[%s5734_s29 + $0x6c] sm:$0xf0]  ;;  %v3397_v22 = vor.u32 %v3844_v19, %v3396_v18  ;;  %v3388_v23 = vld [vmem:[%s5734_s29 + $0x48] sm:$0xf]  ;;  %v3858_v25 = vld [vmem:[%s5734_s29 + $0xb8] sm:$0xf0] }
  0x10   :  { %v3460_v24 = vld [vmem:[%s5734_s29 + $0xb0] sm:$0xf]  ;;  %v3401_v26 = vor.u32 %v3843_v20, %v3398_v21  ;;  %v3842_v27 = vld [vmem:[%s5734_s29 + $0x50] sm:$0xf0]  ;;  %v3456_v29 = vld [vmem:[%s5734_s29 + $0x98] sm:$0xf] }
  0x11   :  { %209 = vmatpush.bf16.msra.mxu0 %v3413_v10  ;;  %v3461_v28 = vor.u32 %v3858_v25, %v3460_v24  ;;  %v3857_v30 = vld [vmem:[%s5734_s29 + $0xa0] sm:$0xf0]  ;;  %v3841_v31 = vld [vmem:[%s5734_s29 + $0x4c] sm:$0xf]  ;;  %v3390_v32 = vld [vmem:[%s5734_s29 + $0x54] sm:$0xf0]  ;;  %v3389_v34 = vor.u32 %v3842_v27, %v3388_v23 }
  0x12   :  { %223 = vmatpush.bf16.msra.mxu1 %v3417_v11  ;;  %v3457_v33 = vor.u32 %v3857_v30, %v3456_v29  ;;  %v3452_v35 = vld [vmem:[%s5734_s29 + $0x80] sm:$0xf]  ;;  %v3856_v36 = vld [vmem:[%s5734_s29 + $0x88] sm:$0xf0]  ;;  %v3393_v37 = vor.u32 %v3841_v31, %v3390_v32  ;;  %v3380_v38 = vld [vmem:[%s5734_s29 + $0x30] sm:$0xf] }
  0x13   :  { %310 = vmatpush.bf16.msra.mxu2 %v3461_v28  ;;  %v3840_v39 = vld [vmem:[%s5734_s29 + $0x38] sm:$0xf0]  ;;  %v3839_v40 = vld [vmem:[%s5734_s29 + $0x34] sm:$0xf]  ;;  %v3382_v41 = vld [vmem:[%s5734_s29 + $0x3c] sm:$0xf0]  ;;  %v3453_v43 = vor.u32 %v3856_v36, %v3452_v35 }
  0x14   :  { %v4380_v42 = vld [vmem:[%s5735_s20] sm:$0xff]   ;;  %v3381_v44 = vor.u32 %v3840_v39, %v3380_v38  ;;  %v3448_v46 = vld [vmem:[%s5734_s29 + $0x68] sm:$0xf]  ;;  %v3855_v47 = vld [vmem:[%s5734_s29 + $0x70] sm:$0xf0]  ;;  %v3385_v48 = vor.u32 %v3839_v40, %v3382_v41 }
  0x15   :  { %210 = vmatpush.bf16.msra.mxu0 %v3405_v16  ;;  %v4385_v45 = vld [vmem:[%s5736_s2] sm:$0xff]   ;;  %v3372_v49 = vld [vmem:[%s5734_s29 + $0x18] sm:$0xf]  ;;  %v3837_v51 = vld [vmem:[%s5734_s29 + $0x1c] sm:$0xf]  ;;  %v93_v53 = vunpack.c.l.bf16 %v4380_v42  ;;  %v94_v56 = vunpack.c.h.bf16 %v4380_v42  ;;  %v3449_v57 = vor.u32 %v3855_v47, %v3448_v46 }
  0x16   :  { %224 = vmatpush.bf16.msra.mxu1 %v3409_v17  ;;  %v3838_v50 = vld [vmem:[%s5734_s29 + $0x20] sm:$0xf0]  ;;  %v3374_v52 = vld [vmem:[%s5734_s29 + $0x24] sm:$0xf0]  ;;  %v3933_v54 = vunpack.c.l.bf16 %v4385_v45  ;;  %v3934_v55 = vunpack.c.h.bf16 %v4385_v45  ;;  %v3444_v59 = vld [vmem:[%s5734_s29 + $0x50] sm:$0xf] }
  0x17   :  { %311 = vmatpush.bf16.msra.mxu2 %v3457_v33  ;;  %v3373_v58 = vor.u32 %v3838_v50, %v3372_v49  ;;  %v3854_v60 = vld [vmem:[%s5734_s29 + $0x58] sm:$0xf0]  ;;  %v3377_v61 = vor.u32 %v3837_v51, %v3374_v52  ;;  %v3364_v62 = vld [vmem:[%s5734_s29] sm:$0xf]  ;;  %v3836_v63 = vld [vmem:[%s5734_s29 + $0x8] sm:$0xf0] }
  0x18   :  { %v3835_v0 = vld [vmem:[%s5734_s29 + $0x4] sm:$0xf]  ;;  %v3366_v1 = vld [vmem:[%s5734_s29 + $0xc] sm:$0xf0]  ;;  %v103_v2 = vadd.f32 %v3933_v54, %v93_v53  ;;  %v104_v3 = vadd.f32 %v3934_v55, %v94_v56  ;;  %v3445_v4 = vor.u32 %v3854_v60, %v3444_v59  ;;  %v3365_v5 = vor.u32 %v3836_v63, %v3364_v62  ;;  %v3440_v6 = vld [vmem:[%s5734_s29 + $0x38] sm:$0xf] }
  0x19   :  { %211 = vmatpush.bf16.msra.mxu0 %v3397_v22  ;;  %v3853_v7 = vld [vmem:[%s5734_s29 + $0x40] sm:$0xf0]  ;;  %v3369_v8 = vor.u32 %v3835_v0, %v3366_v1  ;;  %v3436_v11 = vld [vmem:[%s5734_s29 + $0x20] sm:$0xf]  ;;  %v3852_v12 = vld [vmem:[%s5734_s29 + $0x28] sm:$0xf0] }
  0x1a   :  { %225 = vmatpush.bf16.msra.mxu1 %v3401_v26  ;;  %v105_v9 = vpack.c.bf16 %v104_v3, %v103_v2  ;;  %v3441_v10 = vor.u32 %v3853_v7, %v3440_v6  ;;  %v3437_v13 = vor.u32 %v3852_v12, %v3436_v11  ;;  %v3432_v14 = vld [vmem:[%s5734_s29 + $0x8] sm:$0xf]  ;;  %v3851_v15 = vld [vmem:[%s5734_s29 + $0x10] sm:$0xf0]  ;;  %v3830_v17 = vld [vmem:[%s5735_s20] sm:$0xff]  ;;  %s4184_s29 = smov 96  }
  0x1b   :  { %312 = vmatpush.bf16.msra.mxu2 %v3453_v43  ;;  %v3433_v16 = vor.u32 %v3851_v15, %v3432_v14  ;;  %v122_v18 = vld [vmem:[%s5711_s6] sm:$0x3]  ;;  %s4185_s20 = smov 112   ;;  %v4032_v47 = vld [vmem:[%s5711_s6 + $0x2] ss:$0 sm:$0xff] }
  0x1c   :  { %v124_v19 = vperm.slane %v122_v18, 0  ;;  %v125_v20 = vperm.slane %v122_v18, 1  ;;  %v3877_v42 = vld [vmem:[%s5714_s9 + $0x3c] sm:$0xf0] }
  0x1d   :  { %212 = vmatpush.bf16.msra.mxu0 %v3389_v34 }
  0x1e   :  { %226 = vmatpush.bf16.msra.mxu1 %v3393_v37 }
  0x1f   :  { %313 = vmatpush.bf16.msra.mxu2 %v3449_v57 }
  0x21   :  { %213 = vmatpush.bf16.msra.mxu0 %v3381_v44 }
  0x22   :  { %227 = vmatpush.bf16.msra.mxu1 %v3385_v48 }
  0x23   :  { %314 = vmatpush.bf16.msra.mxu2 %v3445_v4 }
  0x25   :  { %214 = vmatpush.bf16.msra.mxu0 %v3373_v58 }
  0x26   :  { %228 = vmatpush.bf16.msra.mxu1 %v3377_v61 }
  0x27   :  { %315 = vmatpush.bf16.msra.mxu2 %v3441_v10 }
  0x29   :  { %215 = vmatpush.bf16.msra.mxu0 %v3365_v5 }
  0x2a   :  { %229 = vmatpush.bf16.msra.mxu1 %v3369_v8 }
  0x2b   :  { %316 = vmatpush.bf16.msra.mxu2 %v3437_v13 }
  0x2c   :  { %216 = vmatmul.bf16.vlgmr.msra.gmra.mxu0 %v105_v9 }
  0x2d   :  { %230 = vmatmul.bf16.vlgmr.msra.gmra.mxu1 %v105_v9 }
  0x2f   :  { %317 = vmatpush.bf16.msra.mxu2 %v3433_v16 }
  0x32   :  { %318 = vmatmul.bf16.vlgmr.msra.gmra.mxu2 %v3830_v17 }
  0xa9   :  { %v217_v21 = vpop.f32.mrf.mxu0 }
  0xaa   :  { %v218_v22 = vadd.f32 %v217_v21, %v124_v19  ;;  %v231_v23 = vpop.f32.mrf.mxu1 }
  0xab   :  { %v232_v24 = vadd.f32 %v231_v23, %v125_v20 }
  0xac   :  { %v324_v25 = vmul.f32 0.25, %v218_v22 }
  0xad   :  { %v328_v26 = vpack.c.bf16 %v232_v24, %v232_v24 }
  0xae   :  { %v326_v27 = vpack.c.bf16 %v324_v25, %v324_v25 }
  0xaf   :  { %v441_v28 = vunpack.c.l.b16 %v328_v26  ;;  %v337_v29 = vsel %vm332_vm0, %v328_v26, 0 }
  0xb0   :  { %v436_v30 = vunpack.c.l.b16 %v326_v27  ;;  %346 = vmatpush.bf16.xpose.msrb.mxu0 %v337_v29 }
  0xb1   :  { %v442_v31 = vpack.c.b16 %v441_v28, %v441_v28  ;;  %v219_v33 = vpop.f32.mrf.mxu0 }
  0xb2   :  { %v437_v32 = vpack.c.b16 %v436_v30, %v436_v30  ;;  %v233_v34 = vpop.f32.mrf.mxu1  ;;  %v220_v36 = vadd.f32 %v219_v33, %v124_v19 }
  0xb3   :  { %v234_v35 = vadd.f32 %v233_v34, %v125_v20  ;;  %567 = vrot.lane.b32.xlu2 %v442_v31, %s4184_s29  ;;  %443 = vrot.lane.b32.xlu0 %v442_v31, %s4185_s20 }
  0xb4   :  { %438 = vrot.lane.b32.xlu1 %v437_v32, %s4185_s20  ;;  %v325_v40 = vmul.f32 0.25, %v220_v36 }
  0xb5   :  { %v329_v37 = vpack.c.bf16 %v234_v35, %v234_v35  ;;  %v319_v48 = vpop.f32.mrf.mxu2 }
  0xb6   :  { %v327_v43 = vpack.c.bf16 %v325_v40, %v325_v40  ;;  %v320_v49 = vadd.f32 %v4032_v47, %v319_v48 }
  0xb7   :  { %3462 = vmatmul.msk.bf16.vlgmr.msrb.gmra.mxu0 %vm332_vm0, %v326_v27  ;;  %v356_v38 = vsel %vm332_vm0, %v329_v37, 0  ;;  %v470_v39 = vunpack.c.l.b16 %v329_v37 }
  0xb8   :  { %365 = vmatpush.bf16.xpose.msra.mxu3 %v356_v38  ;;  %v465_v44 = vunpack.c.l.b16 %v327_v43  ;;  %v330_v50 = vpack.c.bf16 %v320_v49, %v320_v49 }
  0xb9   :  { %v471_v41 = vpack.c.b16 %v470_v39, %v470_v39 }
  0xba   :  { %v466_v46 = vpack.c.b16 %v465_v44, %v465_v44  ;;  %v518_v52 = vunpack.c.l.b16 %v330_v50  ;;  %v401_v63 = vsel %vm399_vm1, %v330_v50, 0 }
  0xbb   :  { %590 = vrot.lane.b32.xlu2 %v471_v41, %s4184_s29  ;;  %472 = vrot.lane.b32.xlu0 %v471_v41, %s4185_s20 }
  0xbc   :  { %677 = vrot.lane.b32.xlu1 %v437_v32, %s4186_s24  ;;  %v4490_v58 = vpack.c.b16 %v518_v52, %v518_v52 }
  0xbd   :  { %v321_v51 = vpop.f32.mrf.mxu2 }
  0xbe   :  { %v322_v57 = vadd.f32 %v4032_v47, %v321_v51 }
  0xbf   :  { %3463 = vmatmul.msk.bf16.vlgmr.msra.gmra.mxu3 %vm332_vm0, %v327_v43 }
  0xc0   :  { %v331_v59 = vpack.c.bf16 %v322_v57, %v322_v57  ;;  %410 = vmatpush.bf16.msrb.mxu3 %v401_v63 }
  0xc2   :  { %v542_v60 = vunpack.c.l.b16 %v331_v59  ;;  %v420_v0 = vsel %vm399_vm1, %v331_v59, 0 }
  0xc3   :  { %679 = vrot.lane.b32.xlu2 %v442_v31, %s4186_s24  ;;  %565 = vrot.lane.b32.xlu0 %v437_v32, %s4184_s29 }
  0xc4   :  { %814 = vrot.lane.b32.xlu1 %v471_v41, %s4187_s25  ;;  %v4496_v61 = vpack.c.b16 %v542_v60, %v542_v60  ;;  %429 = vmatpush.bf16.msra.mxu0 %v420_v0 }
  0xcb   :  { %700 = vrot.lane.b32.xlu2 %v466_v46, %s4186_s24  ;;  %702 = vrot.lane.b32.xlu0 %v471_v41, %s4186_s24 }
  0xcc   :  { %467 = vrot.lane.b32.xlu1 %v466_v46, %s4185_s20 }
  0xd3   :  { %789 = vrot.lane.b32.xlu2 %v437_v32, %s4187_s25  ;;  %791 = vrot.lane.b32.xlu0 %v442_v31, %s4187_s25 }
  0xd4   :  { %588 = vrot.lane.b32.xlu1 %v466_v46, %s4184_s29 }
  0xdb   :  { %926 = vrot.lane.b32.xlu2 %v471_v41, %s4188_s26  ;;  %812 = vrot.lane.b32.xlu0 %v466_v46, %s4187_s25 }
  0xdc   :  { %903 = vrot.lane.b32.xlu1 %v442_v31, %s4188_s26 }
  0xe3   :  { %1015 = vrot.lane.b32.xlu2 %v442_v31, %s4189_s30  ;;  %901 = vrot.lane.b32.xlu0 %v437_v32, %s4188_s26 }
  0xe4   :  { %1013 = vrot.lane.b32.xlu1 %v437_v32, %s4189_s30 }
  0xeb   :  { %1125 = vrot.lane.b32.xlu2 %v437_v32, %s5729_s5  ;;  %1038 = vrot.lane.b32.xlu0 %v471_v41, %s4189_s30 }
  0xec   :  { %1150 = vrot.lane.b32.xlu1 %v471_v41, %s5729_s5 }
  0xf3   :  { %520 = vrot.lane.b32.xlu2 %v4490_v58, %s4185_s20  ;;  %1127 = vrot.lane.b32.xlu0 %v442_v31, %s5729_s5 }
  0xf4   :  { %924 = vrot.lane.b32.xlu1 %v466_v46, %s4188_s26 }
  0xfb   :  { %1036 = vrot.lane.b32.xlu2 %v466_v46, %s4189_s30  ;;  %635 = vrot.lane.b32.xlu0 %v4490_v58, %s4184_s29 }
  0xfc   :  { %544 = vrot.lane.b32.xlu1 %v4496_v61, %s4185_s20 }
 0x103   :  { %1148 = vrot.lane.b32.xlu0 %v466_v46, %s5729_s5 }
 0x10b   :  { %656 = vrot.lane.b32.xlu0 %v4496_v61, %s4184_s29 }
 0x10d   :  { %v568_v62 = vpop.permute.xlu2 %567 }
 0x10e   :  { %v573_v7 = vsel %vm332_vm0, %v568_v62, 0 }
 0x115   :  { %v591_v1 = vpop.permute.xlu2 %590 }
 0x116   :  { %v596_v13 = vsel %vm332_vm0, %v591_v1, 0 }
 0x11d   :  { %v680_v2 = vpop.permute.xlu2 %679 }
 0x11e   :  { %v685_v10 = vsel %vm332_vm0, %v680_v2, 0 }
 0x125   :  { %v444_v3 = vpop.permute.xlu0 %443  ;;  %v701_v4 = vpop.permute.xlu2 %700 }
 0x126   :  { %v449_v5 = vsel %vm332_vm0, %v444_v3, 0  ;;  %v439_v6 = vpop.permute.xlu1 %438 }
 0x127   :  { %458 = vmatpush.bf16.xpose.msrb.mxu1 %v449_v5 }
 0x12d   :  { %v473_v8 = vpop.permute.xlu0 %472  ;;  %v790_v9 = vpop.permute.xlu2 %789 }
 0x12e   :  { %3466 = vmatmul.msk.bf16.vlgmr.msrb.gmra.mxu1 %vm332_vm0, %v439_v6  ;;  %v478_v11 = vsel %vm332_vm0, %v473_v8, 0  ;;  %v678_v12 = vpop.permute.xlu1 %677 }
 0x12f   :  { %582 = vmatpush.bf16.xpose.msra.mxu1 %v573_v7  ;;  %487 = vmatpush.bf16.xpose.msrb.mxu2 %v478_v11 }
 0x134   :  { %v4514_v14 = vpop.f32.mrf.mxu0 }
 0x135   :  { %v927_v15 = vpop.permute.xlu2 %926  ;;  %v566_v16 = vpop.permute.xlu0 %565  ;;  %v372_v17 = vsel %vm371_vm2, %v4514_v14, -inf }
 0x136   :  { %373 = vmax.xlane.f32.xlu1 %v372_v17  ;;  %v815_v18 = vpop.permute.xlu1 %814  ;;  %v932_v39 = vsel %vm332_vm0, %v927_v15, 0 }
 0x137   :  { %694 = vmatpush.bf16.xpose.msrb.mxu1 %v685_v10  ;;  %605 = vmatpush.bf16.xpose.msra.mxu2 %v596_v13  ;;  %v820_v35 = vsel %vm332_vm0, %v815_v18, 0 }
 0x13c   :  { %v350_v19 = vpop.f32.mrf.mxu0 }
 0x13d   :  { %v1016_v20 = vpop.permute.xlu2 %1015  ;;  %v703_v21 = vpop.permute.xlu0 %702 }
 0x13e   :  { %v708_v22 = vsel %vm332_vm0, %v703_v21, 0  ;;  %3470 = vmatmul.msk.bf16.vlgmr.msra.gmra.mxu1 %vm332_vm0, %v566_v16  ;;  %v468_v23 = vpop.permute.xlu1 %467  ;;  %v1021_v38 = vsel %vm332_vm0, %v1016_v20, 0 }
 0x13f   :  { %3467 = vmatmul.msk.bf16.vlgmr.msrb.gmra.mxu2 %vm332_vm0, %v468_v23 }
 0x140   :  { %717 = vmatpush.bf16.xpose.msrb.mxu2 %v708_v22 }
 0x142   :  { %v4521_v24 = vpop.f32.mrf.mxu3 }
 0x143   :  { %v375_v25 = vsel %vm371_vm2, %v4521_v24, -inf }
 0x144   :  { %376 = vmax.xlane.f32.xlu2 %v375_v25 }
 0x145   :  { %v1126_v26 = vpop.permute.xlu2 %1125  ;;  %v792_v27 = vpop.permute.xlu0 %791 }
 0x146   :  { %v797_v28 = vsel %vm332_vm0, %v792_v27, 0  ;;  %v589_v29 = vpop.permute.xlu1 %588 }
 0x147   :  { %806 = vmatpush.bf16.xpose.msra.mxu1 %v797_v28 }
 0x14a   :  { %v369_v30 = vpop.f32.mrf.mxu3 }
 0x14d   :  { %v521_v31 = vpop.permute.xlu2 %520  ;;  %v813_v32 = vpop.permute.xlu0 %812 }
 0x14e   :  { %v526_v33 = vsel %vm399_vm1, %v521_v31, 0  ;;  %3474 = vmatmul.msk.bf16.vlgmr.msrb.gmra.mxu1 %vm332_vm0, %v678_v12  ;;  %v904_v34 = vpop.permute.xlu1 %903 }
 0x14f   :  { %v909_v36 = vsel %vm332_vm0, %v904_v34, 0  ;;  %768 = vrot.lane.b32.xlu1 %v4496_v61, %s4186_s24  ;;  %3471 = vmatmul.msk.bf16.vlgmr.msra.gmra.mxu2 %vm332_vm0, %v589_v29 }
 0x150   :  { %829 = vmatpush.bf16.xpose.msra.mxu2 %v820_v35  ;;  %918 = vmatpush.bf16.xpose.msrb.mxu1 %v909_v36 }
 0x151   :  { %535 = vmatpush.bf16.msra.mxu3 %v526_v33 }
 0x155   :  { %v902_v37 = vpop.permute.xlu0 %901  ;;  %v1037_v52 = vpop.permute.xlu2 %1036 }
 0x156   :  { %v1014_v41 = vpop.permute.xlu1 %1013 }
 0x157   :  { %859 = vrot.lane.b32.xlu1 %v4490_v58, %s4187_s25 }
 0x15c   :  { %747 = vrot.lane.b32.xlu2 %v4490_v58, %s4186_s24 }
 0x15d   :  { %v1039_v40 = vpop.permute.xlu0 %1038 }
 0x15e   :  { %3478 = vmatmul.msk.bf16.vlgmr.msra.gmra.mxu1 %vm332_vm0, %v790_v9  ;;  %v1151_v44 = vpop.permute.xlu1 %1150  ;;  %v1044_v47 = vsel %vm332_vm0, %v1039_v40, 0 }
 0x15f   :  { %1030 = vmatpush.bf16.xpose.msra.mxu1 %v1021_v38  ;;  %3475 = vmatmul.msk.bf16.vlgmr.msrb.gmra.mxu2 %vm332_vm0, %v701_v4  ;;  %v1156_v49 = vsel %vm332_vm0, %v1151_v44, 0 }
 0x160   :  { %941 = vmatpush.bf16.xpose.msrb.mxu2 %v932_v39 }
 0x165   :  { %v1128_v43 = vpop.permute.xlu0 %1127 }
 0x166   :  { %v1133_v46 = vsel %vm332_vm0, %v1128_v43, 0  ;;  %v925_v48 = vpop.permute.xlu1 %924 }
 0x16d   :  { %v4551_v57 = vpop.permute.xlu0 %635 }
 0x16e   :  { %3482 = vmatmul.msk.bf16.vlgmr.msrb.gmra.mxu1 %vm332_vm0, %v902_v37  ;;  %v545_v50 = vpop.permute.xlu1 %544 }
 0x16f   :  { %1142 = vmatpush.bf16.xpose.msrb.mxu1 %v1133_v46  ;;  %3479 = vmatmul.msk.bf16.vlgmr.msra.gmra.mxu2 %vm332_vm0, %v813_v32  ;;  %v550_v51 = vsel %vm399_vm1, %v545_v50, 0 }
 0x170   :  { %1053 = vmatpush.bf16.xpose.msra.mxu2 %v1044_v47  ;;  %559 = vmatpush.bf16.msrb.mxu0 %v550_v51 }
 0x175   :  { %v1149_v59 = vpop.permute.xlu0 %1148 }
 0x17e   :  { %3486 = vmatmul.msk.bf16.vlgmr.msra.gmra.mxu1 %vm332_vm0, %v1014_v41 }
 0x17f   :  { %3483 = vmatmul.msk.bf16.vlgmr.msrb.gmra.mxu2 %vm332_vm0, %v925_v48  ;;  %v657_v48 = vpop.permute.xlu0 %656 }
 0x180   :  { %1165 = vmatpush.bf16.xpose.msrb.mxu2 %v1156_v49 }
 0x18e   :  { %3490 = vmatmul.msk.bf16.vlgmr.msrb.gmra.mxu1 %vm332_vm0, %v1126_v26 }
 0x18f   :  { %3487 = vmatmul.msk.bf16.vlgmr.msra.gmra.mxu2 %vm332_vm0, %v1037_v52 }
 0x19f   :  { %3491 = vmatmul.msk.bf16.vlgmr.msrb.gmra.mxu2 %vm332_vm0, %v1149_v59 }
 0x1a9   :  { %v374_v60 = vpop.xlane.xlu1 %373 }
 0x1aa   :  { %v378_v62 = vsub.f32 %v4514_v14, %v374_v60 }
 0x1ab   :  { %v4555_v63 = vpop.f32.mrf.mxu1 }
 0x1ac   :  { %v380_v0 = vmul.f32 1.442695, %v378_v62  ;;  %v493_v1 = vsel %vm371_vm2, %v4555_v63, -inf }
 0x1ad   :  { %494 = vmax.xlane.f32.xlu0 %v493_v1 }
 0x1ae   :  { %4041 = vpow2.f32 %v380_v0 }
 0x1b3   :  { %v462_v2 = vpop.f32.mrf.mxu1 }
 0x1b4   :  { %v4559_v3 = vpop.eup %4041 }
 0x1b5   :  { %v384_v4 = vsel %vm371_vm2, %v4559_v3, 0.0 }
 0x1b6   :  { %385 = vadd.xlane.f32.xlu1 %v384_v4 }
 0x1b7   :  { %v377_v15 = vpop.xlane.xlu2 %376 }
 0x1b8   :  { %v379_v16 = vsub.f32 %v4521_v24, %v377_v15  ;;  %v641_v15 = vsel %vm399_vm1, %v4551_v57, 0 }
 0x1ba   :  { %v382_v20 = vmul.f32 1.442695, %v379_v16 }
 0x1bb   :  { %v4563_v5 = vpop.f32.mrf.mxu1 }
 0x1bc   :  { %v611_v6 = vsel %vm371_vm2, %v4563_v5, -inf  ;;  %4043 = vpow2.f32 %v382_v20 }
 0x1be   :  { %612 = vmax.xlane.f32.xlu1 %v611_v6 }
 0x1bf   :  { %v4631_v6 = vpop.permute.xlu2 %747 }
 0x1c1   :  { %880 = vrot.lane.b32.xlu0 %v4496_v61, %s4187_s25  ;;  %v4618_v47 = vpop.permute.xlu1 %768 }
 0x1c2   :  { %v4569_v7 = vpop.f32.mrf.mxu2  ;;  %v4588_v25 = vpop.eup %4043 }
 0x1c3   :  { %v586_v8 = vpop.f32.mrf.mxu1  ;;  %v496_v9 = vsel %vm371_vm2, %v4569_v7, -inf  ;;  %v387_v24 = vsel %vm371_vm2, %v4588_v25, 0.0 }
 0x1c4   :  { %497 = vmax.xlane.f32.xlu2 %v496_v9 }
 0x1c9   :  { %v4620_v51 = vpop.permute.xlu1 %859 }
 0x1ca   :  { %v491_v10 = vpop.f32.mrf.mxu2 }
 0x1cb   :  { %v4573_v11 = vpop.f32.mrf.mxu1 }
 0x1cc   :  { %v723_v28 = vsel %vm371_vm2, %v4573_v11, -inf }
 0x1d2   :  { %v4575_v12 = vpop.f32.mrf.mxu2 }
 0x1d3   :  { %v698_v13 = vpop.f32.mrf.mxu1  ;;  %v614_v14 = vsel %vm371_vm2, %v4575_v12, -inf }
 0x1d4   :  { %615 = vmax.xlane.f32.xlu2 %v614_v14 }
 0x1da   :  { %v609_v17 = vpop.f32.mrf.mxu2 }
 0x1db   :  { %v4580_v18 = vpop.f32.mrf.mxu1 }
 0x1dc   :  { %v835_v19 = vsel %vm371_vm2, %v4580_v18, -inf }
 0x1dd   :  { %836 = vmax.xlane.f32.xlu1 %v835_v19 }
 0x1e2   :  { %v4584_v21 = vpop.f32.mrf.mxu2 }
 0x1e3   :  { %v810_v22 = vpop.f32.mrf.mxu1  ;;  %v726_v23 = vsel %vm371_vm2, %v4584_v21, -inf }
 0x1e4   :  { %727 = vmax.xlane.f32.xlu2 %v726_v23 }
 0x1ea   :  { %v721_v26 = vpop.f32.mrf.mxu2 }
 0x1eb   :  { %388 = vadd.xlane.f32.xlu0 %v387_v24  ;;  %v4592_v27 = vpop.f32.mrf.mxu1 }
 0x1ec   :  { %v947_v35 = vsel %vm371_vm2, %v4592_v27, -inf }
 0x1f2   :  { %v4596_v29 = vpop.f32.mrf.mxu2 }
 0x1f3   :  { %724 = vmax.xlane.f32.xlu0 %v723_v28  ;;  %v922_v30 = vpop.f32.mrf.mxu1  ;;  %v838_v31 = vsel %vm371_vm2, %v4596_v29, -inf }
 0x1fa   :  { %v833_v32 = vpop.f32.mrf.mxu2 }
 0x1fb   :  { %839 = vmax.xlane.f32.xlu0 %v838_v31  ;;  %v4600_v33 = vpop.f32.mrf.mxu1 }
 0x1fc   :  { %v1059_v34 = vsel %vm371_vm2, %v4600_v33, -inf }
 0x1fd   :  { %1060 = vmax.xlane.f32.xlu1 %v1059_v34 }
 0x202   :  { %v4606_v36 = vpop.f32.mrf.mxu2 }
 0x203   :  { %948 = vmax.xlane.f32.xlu0 %v947_v35  ;;  %v1034_v37 = vpop.f32.mrf.mxu1  ;;  %v950_v38 = vsel %vm371_vm2, %v4606_v36, -inf }
 0x20a   :  { %v945_v39 = vpop.f32.mrf.mxu2 }
 0x20b   :  { %v4610_v40 = vpop.f32.mrf.mxu1  ;;  %951 = vmax.xlane.f32.xlu0 %v950_v38 }
 0x20c   :  { %v1171_v41 = vsel %vm371_vm2, %v4610_v40, -inf }
 0x20d   :  { %1172 = vmax.xlane.f32.xlu1 %v1171_v41  ;;  %v662_v41 = vsel %vm399_vm1, %v657_v48, 0 }
 0x212   :  { %v4614_v43 = vpop.f32.mrf.mxu2 }
 0x213   :  { %v1146_v44 = vpop.f32.mrf.mxu1  ;;  %v1062_v46 = vsel %vm371_vm2, %v4614_v43, -inf }
 0x214   :  { %1063 = vmax.xlane.f32.xlu2 %v1062_v46 }
 0x21a   :  { %v1057_v49 = vpop.f32.mrf.mxu2 }
 0x220   :  { %v495_v50 = vpop.xlane.xlu0 %494 }
 0x221   :  { %v499_v52 = vsub.f32 %v4555_v63, %v495_v50 }
 0x222   :  { %v4623_v59 = vpop.f32.mrf.mxu2 }
 0x223   :  { %v501_v60 = vmul.f32 1.442695, %v499_v52  ;;  %v1174_v62 = vsel %vm371_vm2, %v4623_v59, -inf }
 0x224   :  { %1175 = vmax.xlane.f32.xlu2 %v1174_v62 }
 0x225   :  { %4045 = vpow2.f32 %v501_v60 }
 0x229   :  { %v386_v0 = vpop.xlane.xlu1 %385 }
 0x22a   :  { %4047 = vrcp.f32 %v386_v0  ;;  %v1169_v1 = vpop.f32.mrf.mxu2 }
 0x22b   :  { %v4627_v2 = vpop.eup %4045 }
 0x22c   :  { %v505_v4 = vsel %vm371_vm2, %v4627_v2, 0.0 }
 0x22d   :  { %506 = vadd.xlane.f32.xlu2 %v505_v4 }
 0x230   :  { %v4048_v63 = vpop.eup %4047 }
 0x231   :  { %v613_v8 = vpop.xlane.xlu1 %612  ;;  %v392_v9 = vmul.f32 %v4048_v63, %v4559_v3 }
 0x232   :  { %v617_v10 = vsub.f32 %v4563_v5, %v613_v8 }
 0x233   :  { %v394_v13 = vpack.c.bf16 %v392_v9, %v392_v9  ;;  %v4652_v28 = vpop.permute.xlu0 %880 }
 0x234   :  { %v619_v14 = vmul.f32 1.442695, %v617_v10 }
 0x235   :  { %3464 = vmatmul.msk.bf16.vlgmr.msrb.gmra.mxu3 %vm371_vm2, %v394_v13 }
 0x236   :  { %4049 = vpow2.f32 %v619_v14  ;;  %650 = vmatpush.bf16.msrb.mxu3 %v641_v15 }
 0x237   :  { %v498_v16 = vpop.xlane.xlu2 %497 }
 0x238   :  { %v500_v17 = vsub.f32 %v4569_v7, %v498_v16 }
 0x23a   :  { %v503_v19 = vmul.f32 1.442695, %v500_v17 }
 0x23c   :  { %v4639_v20 = vpop.eup %4049  ;;  %4051 = vpow2.f32 %v503_v19 }
 0x23d   :  { %v623_v3 = vsel %vm371_vm2, %v4639_v20, 0.0 }
 0x23e   :  { %624 = vadd.xlane.f32.xlu0 %v623_v3 }
 0x242   :  { %v4643_v5 = vpop.eup %4051 }
 0x243   :  { %v508_v57 = vsel %vm371_vm2, %v4643_v5, 0.0 }
 0x244   :  { %509 = vadd.xlane.f32.xlu1 %v508_v57 }
 0x247   :  { %v616_v22 = vpop.xlane.xlu2 %615 }
 0x248   :  { %v618_v23 = vsub.f32 %v4575_v12, %v616_v22 }
 0x24a   :  { %v621_v24 = vmul.f32 1.442695, %v618_v23 }
 0x24c   :  { %4053 = vpow2.f32 %v621_v24 }
 0x250   :  { %v837_v32 = vpop.xlane.xlu1 %836 }
 0x251   :  { %v841_v38 = vsub.f32 %v4580_v18, %v837_v32 }
 0x252   :  { %v4648_v7 = vpop.eup %4053 }
 0x253   :  { %v626_v26 = vsel %vm371_vm2, %v4648_v7, 0.0  ;;  %v843_v44 = vmul.f32 1.442695, %v841_v38 }
 0x254   :  { %627 = vadd.xlane.f32.xlu2 %v626_v26 }
 0x25d   :  { %992 = vrot.lane.b32.xlu1 %v4496_v61, %s4188_s26 }
 0x25e   :  { %v389_v30 = vpop.xlane.xlu0 %388 }
 0x25f   :  { %4055 = vrcp.f32 %v389_v30 }
 0x265   :  { %v4056_v31 = vpop.eup %4055 }
 0x266   :  { %v393_v34 = vmul.f32 %v4056_v31, %v4588_v25  ;;  %v725_v12 = vpop.xlane.xlu0 %724  ;;  %v728_v25 = vpop.xlane.xlu2 %727 }
 0x267   :  { %v729_v35 = vsub.f32 %v4573_v11, %v725_v12  ;;  %v730_v48 = vsub.f32 %v4584_v21, %v728_v25  ;;  %v753_v12 = vsel %vm399_vm1, %v4631_v6, 0 }
 0x268   :  { %v395_v37 = vpack.c.bf16 %v393_v34, %v393_v34 }
 0x269   :  { %v731_v39 = vmul.f32 1.442695, %v729_v35  ;;  %v733_v62 = vmul.f32 1.442695, %v730_v48 }
 0x26a   :  { %3465 = vmatmul.msk.bf16.vlgmr.msra.gmra.mxu0 %vm371_vm2, %v395_v37 }
 0x26b   :  { %4057 = vpow2.f32 %v731_v39  ;;  %671 = vmatpush.bf16.msra.mxu0 %v662_v41 }
 0x26c   :  { %971 = vrot.lane.b32.xlu2 %v4490_v58, %s4188_s26  ;;  %4059 = vpow2.f32 %v843_v44  ;;  %v865_v44 = vsel %vm399_vm1, %v4620_v51, 0 }
 0x26e   :  { %v840_v46 = vpop.xlane.xlu0 %839 }
 0x26f   :  { %v842_v11 = vsub.f32 %v4596_v29, %v840_v46 }
 0x270   :  { %v1061_v8 = vpop.xlane.xlu1 %1060 }
 0x271   :  { %v4663_v49 = vpop.eup %4057  ;;  %v845_v50 = vmul.f32 1.442695, %v842_v11  ;;  %v1065_v14 = vsub.f32 %v4600_v33, %v1061_v8 }
 0x272   :  { %v735_v18 = vsel %vm371_vm2, %v4663_v49, 0.0  ;;  %v4669_v60 = vpop.eup %4059 }
 0x273   :  { %736 = vadd.xlane.f32.xlu0 %v735_v18  ;;  %4061 = vpow2.f32 %v845_v50  ;;  %v847_v0 = vsel %vm371_vm2, %v4669_v60, 0.0  ;;  %v1067_v15 = vmul.f32 1.442695, %v1065_v14 }
 0x274   :  { %4063 = vpow2.f32 %v733_v62 }
 0x276   :  { %v949_v52 = vpop.xlane.xlu0 %948 }
 0x277   :  { %v953_v29 = vsub.f32 %v4592_v27, %v949_v52 }
 0x279   :  { %v4674_v4 = vpop.eup %4061  ;;  %v955_v21 = vmul.f32 1.442695, %v953_v29  ;;  %v886_v29 = vsel %vm399_vm1, %v4652_v28, 0 }
 0x27a   :  { %v850_v10 = vsel %vm371_vm2, %v4674_v4, 0.0  ;;  %v4679_v13 = vpop.eup %4063 }
 0x27b   :  { %848 = vadd.xlane.f32.xlu0 %v847_v0  ;;  %v738_v27 = vsel %vm371_vm2, %v4679_v13, 0.0 }
 0x27e   :  { %v952_v1 = vpop.xlane.xlu0 %951 }
 0x27f   :  { %v954_v63 = vsub.f32 %v4606_v36, %v952_v1 }
 0x280   :  { %v1173_v35 = vpop.xlane.xlu1 %1172 }
 0x281   :  { %v957_v9 = vmul.f32 1.442695, %v954_v63  ;;  %v1177_v46 = vsub.f32 %v4610_v40, %v1173_v35 }
 0x283   :  { %4065 = vpow2.f32 %v957_v9  ;;  %851 = vadd.xlane.f32.xlu0 %v850_v10  ;;  %v1179_v48 = vmul.f32 1.442695, %v1177_v46 }
 0x284   :  { %4067 = vpow2.f32 %v955_v21 }
 0x285   :  { %4069 = vpow2.f32 %v1067_v15 }
 0x287   :  { %v1064_v16 = vpop.xlane.xlu2 %1063  ;;  %739 = vadd.xlane.f32.xlu1 %v738_v27 }
 0x288   :  { %v1066_v36 = vsub.f32 %v4614_v43, %v1064_v16 }
 0x289   :  { %v4685_v17 = vpop.eup %4065 }
 0x28a   :  { %v1069_v19 = vmul.f32 1.442695, %v1066_v36  ;;  %v962_v3 = vsel %vm371_vm2, %v4685_v17, 0.0  ;;  %v4689_v57 = vpop.eup %4067 }
 0x28b   :  { %963 = vadd.xlane.f32.xlu0 %v962_v3  ;;  %v959_v33 = vsel %vm371_vm2, %v4689_v57, 0.0  ;;  %v4693_v22 = vpop.eup %4069 }
 0x28c   :  { %4071 = vpow2.f32 %v1069_v19  ;;  %v1071_v24 = vsel %vm371_vm2, %v4693_v22, 0.0 }
 0x28f   :  { %960 = vadd.xlane.f32.xlu1 %v959_v33 }
 0x292   :  { %v4695_v23 = vpop.eup %4071 }
 0x293   :  { %v1074_v43 = vsel %vm371_vm2, %v4695_v23, 0.0 }
 0x294   :  { %1075 = vadd.xlane.f32.xlu0 %v1074_v43 }
 0x295   :  { %1072 = vadd.xlane.f32.xlu2 %v1071_v24 }
 0x297   :  { %v1176_v26 = vpop.xlane.xlu2 %1175 }
 0x298   :  { %v1178_v11 = vsub.f32 %v4623_v59, %v1176_v26 }
 0x29a   :  { %v1181_v50 = vmul.f32 1.442695, %v1178_v11 }
 0x2a0   :  { %v507_v30 = vpop.xlane.xlu2 %506 }
 0x2a1   :  { %4073 = vrcp.f32 %v507_v30 }
 0x2a7   :  { %v4074_v31 = vpop.eup %4073 }
 0x2a8   :  { %v513_v32 = vmul.f32 %v4074_v31, %v4627_v2  ;;  %1104 = vrot.lane.b32.xlu1 %v4496_v61, %s4189_s30  ;;  %1083 = vrot.lane.b32.xlu0 %v4490_v58, %s4189_s30 }
 0x2aa   :  { %v515_v34 = vpack.c.bf16 %v513_v32, %v513_v32 }
 0x2ac   :  { %3468 = vmatmul.msk.bf16.vlgmr.msra.gmra.mxu3 %vm371_vm2, %v515_v34 }
 0x2ad   :  { %762 = vmatpush.bf16.msra.mxu3 %v753_v12  ;;  %1195 = vrot.lane.b32.xlu2 %v4490_v58, %s5729_s5 }
 0x2b1   :  { %v625_v37 = vpop.xlane.xlu0 %624 }
 0x2b2   :  { %4075 = vrcp.f32 %v625_v37 }
 0x2b5   :  { %1216 = vrot.lane.b32.xlu2 %v4496_v61, %s5729_s5 }
 0x2b7   :  { %v510_v2 = vpop.xlane.xlu1 %509 }
 0x2b8   :  { %v4076_v38 = vpop.eup %4075  ;;  %v4713_v39 = vpop.f32.mrf.mxu3  ;;  %4077 = vrcp.f32 %v510_v2 }
 0x2b9   :  { %v631_v41 = vmul.f32 %v4076_v38, %v4639_v20  ;;  %v774_v20 = vsel %vm399_vm1, %v4618_v47, 0  ;;  %4079 = vpow2.f32 %v1179_v48 }
 0x2ba   :  { %4081 = vpow2.f32 %v1181_v50 }
 0x2bb   :  { %v633_v6 = vpack.c.bf16 %v631_v41, %v631_v41 }
 0x2bd   :  { %3472 = vmatmul.msk.bf16.vlgmr.msrb.gmra.mxu3 %vm371_vm2, %v633_v6 }
 0x2be   :  { %v4078_v58 = vpop.eup %4077  ;;  %874 = vmatpush.bf16.msrb.mxu3 %v865_v44 }
 0x2bf   :  { %v514_v61 = vmul.f32 %v4078_v58, %v4643_v5  ;;  %v4725_v40 = vpop.eup %4079 }
 0x2c0   :  { %v414_v25 = vpop.f32.mrf.mxu3  ;;  %v4727_v52 = vpop.eup %4081  ;;  %v1183_v47 = vsel %vm371_vm2, %v4725_v40, 0.0 }
 0x2c1   :  { %v516_v18 = vpack.c.bf16 %v514_v61, %v514_v61  ;;  %v1186_v0 = vsel %vm371_vm2, %v4727_v52, 0.0 }
 0x2c3   :  { %3469 = vmatmul.msk.bf16.vlgmr.msrb.gmra.mxu0 %vm371_vm2, %v516_v18 }
 0x2c4   :  { %783 = vmatpush.bf16.msrb.mxu0 %v774_v20 }
 0x2c7   :  { %v628_v51 = vpop.xlane.xlu2 %627 }
 0x2c8   :  { %4083 = vrcp.f32 %v628_v51 }
 0x2ce   :  { %v4084_v59 = vpop.eup %4083 }
 0x2cf   :  { %v632_v5 = vmul.f32 %v4084_v59, %v4648_v7  ;;  %v972_v21 = vpop.permute.xlu2 %971  ;;  %v993_v15 = vpop.permute.xlu1 %992 }
 0x2d0   :  { %v977_v27 = vsel %vm399_vm1, %v972_v21, 0  ;;  %v998_v26 = vsel %vm399_vm1, %v993_v15, 0 }
 0x2d1   :  { %v634_v62 = vpack.c.bf16 %v632_v5, %v632_v5 }
 0x2d2   :  { %1187 = vadd.xlane.f32.xlu0 %v1186_v0  ;;  %1184 = vadd.xlane.f32.xlu1 %v1183_v47 }
 0x2d3   :  { %3473 = vmatmul.msk.bf16.vlgmr.msra.gmra.mxu0 %vm371_vm2, %v634_v62 }
 0x2d4   :  { %895 = vmatpush.bf16.msra.mxu0 %v886_v29 }
 0x2e6   :  { %v737_v1 = vpop.xlane.xlu0 %736 }
 0x2e7   :  { %4085 = vrcp.f32 %v737_v1  ;;  %v4737_v63 = vpop.f32.mrf.mxu0 }
 0x2ed   :  { %v4086_v7 = vpop.eup %4085 }
 0x2ee   :  { %v743_v8 = vmul.f32 %v4086_v7, %v4663_v49  ;;  %v849_v14 = vpop.xlane.xlu0 %848 }
 0x2ef   :  { %v433_v9 = vpop.f32.mrf.mxu0  ;;  %4087 = vrcp.f32 %v849_v14 }
 0x2f0   :  { %v745_v10 = vpack.c.bf16 %v743_v8, %v743_v8 }
 0x2f2   :  { %3476 = vmatmul.msk.bf16.vlgmr.msra.gmra.mxu3 %vm371_vm2, %v745_v10 }
 0x2f3   :  { %986 = vmatpush.bf16.msra.mxu3 %v977_v27 }
 0x2f5   :  { %v4088_v28 = vpop.eup %4087 }
 0x2f6   :  { %v855_v36 = vmul.f32 %v4088_v28, %v4669_v60  ;;  %v852_v3 = vpop.xlane.xlu0 %851 }
 0x2f8   :  { %v857_v19 = vpack.c.bf16 %v855_v36, %v855_v36 }
 0x2fa   :  { %v740_v16 = vpop.xlane.xlu1 %739 }
 0x2fb   :  { %4089 = vrcp.f32 %v740_v16 }
 0x2fe   :  { %v964_v31 = vpop.xlane.xlu0 %963 }
 0x301   :  { %v4090_v33 = vpop.eup %4089 }
 0x302   :  { %v744_v49 = vmul.f32 %v4090_v33, %v4679_v13  ;;  %3480 = vmatmul.msk.bf16.vlgmr.msrb.gmra.mxu3 %vm371_vm2, %v857_v19  ;;  %v961_v43 = vpop.xlane.xlu1 %960 }
 0x303   :  { %4091 = vrcp.f32 %v961_v43 }
 0x304   :  { %v746_v24 = vpack.c.bf16 %v744_v49, %v744_v49  ;;  %4093 = vrcp.f32 %v852_v3 }
 0x306   :  { %3477 = vmatmul.msk.bf16.vlgmr.msrb.gmra.mxu0 %vm371_vm2, %v746_v24 }
 0x307   :  { %1007 = vmatpush.bf16.msrb.mxu0 %v998_v26  ;;  %v1076_v35 = vpop.xlane.xlu0 %1075 }
 0x308   :  { %v1073_v34 = vpop.xlane.xlu2 %1072 }
 0x309   :  { %v4092_v30 = vpop.eup %4091  ;;  %4095 = vrcp.f32 %v1073_v34 }
 0x30a   :  { %v967_v60 = vmul.f32 %v4092_v30, %v4689_v57  ;;  %v4094_v32 = vpop.eup %4093  ;;  %4097 = vrcp.f32 %v964_v31 }
 0x30b   :  { %v856_v12 = vmul.f32 %v4094_v32, %v4674_v4  ;;  %4099 = vrcp.f32 %v1076_v35 }
 0x30c   :  { %v969_v13 = vpack.c.bf16 %v967_v60, %v967_v60 }
 0x30d   :  { %v858_v37 = vpack.c.bf16 %v856_v12, %v856_v12 }
 0x30f   :  { %v4096_v2 = vpop.eup %4095 }
 0x310   :  { %v1196_v38 = vpop.permute.xlu2 %1195  ;;  %v1079_v58 = vmul.f32 %v4096_v2, %v4693_v22  ;;  %v4098_v46 = vpop.eup %4097 }
 0x311   :  { %v1201_v4 = vsel %vm399_vm1, %v1196_v38, 0  ;;  %v968_v11 = vmul.f32 %v4098_v46, %v4685_v17  ;;  %v4100_v22 = vpop.eup %4099  ;;  %v3862_v46 = vld [vmem:[%s5713_s7 + $0x18] sm:$0xff] }
 0x312   :  { %3484 = vmatmul.msk.bf16.vlgmr.msra.gmra.mxu3 %vm371_vm2, %v969_v13  ;;  %v1081_v61 = vpack.c.bf16 %v1079_v58, %v1079_v58  ;;  %v1080_v50 = vmul.f32 %v4100_v22, %v4695_v23  ;;  %v3864_v58 = vld [vmem:[%s5713_s7 + $0x28] sm:$0xff] }
 0x313   :  { %v970_v18 = vpack.c.bf16 %v968_v11, %v968_v11  ;;  %v3861_v11 = vld [vmem:[%s5713_s7 + $0x10] sm:$0xff] }
 0x314   :  { %v1082_v51 = vpack.c.bf16 %v1080_v50, %v1080_v50 }
 0x316   :  { %3481 = vmatmul.msk.bf16.vlgmr.msra.gmra.mxu0 %vm371_vm2, %v858_v37 }
 0x318   :  { %v1217_v25 = vpop.permute.xlu2 %1216 }
 0x319   :  { %v1222_v48 = vsel %vm399_vm1, %v1217_v25, 0  ;;  %v3859_v25 = vld [vmem:[%s5713_s7] sm:$0xff] }
 0x31a   :  { %v1084_v41 = vpop.permute.xlu0 %1083  ;;  %v1105_v6 = vpop.permute.xlu1 %1104 }
 0x31b   :  { %v1089_v44 = vsel %vm399_vm1, %v1084_v41, 0  ;;  %v1110_v57 = vsel %vm399_vm1, %v1105_v6, 0 }
 0x31c   :  { %1098 = vmatpush.bf16.msrb.mxu3 %v1089_v44  ;;  %1119 = vmatpush.bf16.msra.mxu0 %v1110_v57  ;;  %v3866_v44 = vld [vmem:[%s5713_s7 + $0x38] sm:$0xff]  ;;  %v3865_v57 = vld [vmem:[%s5713_s7 + $0x30] sm:$0xff] }
 0x31d   :  { %1382 = vmatpush.bf16.msra.mxu1 %v3866_v44 }
 0x320   :  { %1210 = vmatpush.bf16.msra.mxu3 %v1201_v4  ;;  %v3863_v4 = vld [vmem:[%s5713_s7 + $0x20] sm:$0xff] }
 0x321   :  { %1383 = vmatpush.bf16.msra.mxu1 %v3865_v57 }
 0x322   :  { %3488 = vmatmul.msk.bf16.vlgmr.msrb.gmra.mxu3 %vm371_vm2, %v1081_v61  ;;  %v3860_v61 = vld [vmem:[%s5713_s7 + $0x8] sm:$0xff] }
 0x325   :  { %1384 = vmatpush.bf16.msra.mxu1 %v3864_v58 }
 0x326   :  { %3485 = vmatmul.msk.bf16.vlgmr.msrb.gmra.mxu0 %vm371_vm2, %v970_v18 }
 0x327   :  { %1231 = vmatpush.bf16.msrb.mxu0 %v1222_v48 }
 0x329   :  { %1385 = vmatpush.bf16.msra.mxu1 %v3863_v4 }
 0x32d   :  { %1386 = vmatpush.bf16.msra.mxu1 %v3862_v46 }
 0x32f   :  { %v537_v20 = vpop.f32.mrf.mxu3 }
 0x331   :  { %1387 = vmatpush.bf16.msra.mxu1 %v3861_v11  ;;  %v3572_v11 = vld [vmem:[%s5714_s9 + $0x4c] sm:$0xf] }
 0x335   :  { %1388 = vmatpush.bf16.msra.mxu1 %v3860_v61  ;;  %v3878_v61 = vld [vmem:[%s5714_s9 + $0x54] sm:$0xf0] }
 0x336   :  { %3489 = vmatmul.msk.bf16.vlgmr.msra.gmra.mxu0 %vm371_vm2, %v1082_v51 }
 0x337   :  { %v539_v59 = vpop.f32.mrf.mxu3 }
 0x339   :  { %1389 = vmatpush.bf16.msra.mxu1 %v3859_v25  ;;  %v3573_v25 = vor.u32 %v3878_v61, %v3572_v11 }
 0x340   :  { %v652_v17 = vpop.f32.mrf.mxu3  ;;  %v561_v5 = vpop.f32.mrf.mxu0 }
 0x341   :  { %v3962_v62 = vpack.i.bf16 %v561_v5, %v537_v20 }
 0x343   :  { %3963 = vrot.lane.b32.xlu1 %v3962_v62, %s5729_s5 }
 0x345   :  { %v1188_v0 = vpop.xlane.xlu0 %1187  ;;  %v1185_v47 = vpop.xlane.xlu1 %1184 }
 0x346   :  { %4101 = vrcp.f32 %v1188_v0 }
 0x347   :  { %4103 = vrcp.f32 %v1185_v47 }
 0x348   :  { %v654_v29 = vpop.f32.mrf.mxu3  ;;  %v563_v1 = vpop.f32.mrf.mxu0 }
 0x34c   :  { %v4102_v7 = vpop.eup %4101 }
 0x34d   :  { %v4104_v8 = vpop.eup %4103  ;;  %v1192_v21 = vmul.f32 %v4102_v7, %v4727_v52 }
 0x34e   :  { %v1191_v23 = vmul.f32 %v4104_v8, %v4725_v40 }
 0x34f   :  { %v1194_v9 = vpack.c.bf16 %v1192_v21, %v1192_v21 }
 0x350   :  { %v1193_v10 = vpack.c.bf16 %v1191_v23, %v1191_v23  ;;  %v673_v14 = vpop.f32.mrf.mxu0 }
 0x351   :  { %v3967_v27 = vpack.i.bf16 %v673_v14, %v652_v17  ;;  %3493 = vmatmul.msk.bf16.vlgmr.msrb.gmra.mxu0 %vm371_vm2, %v1194_v9 }
 0x352   :  { %3492 = vmatmul.msk.bf16.vlgmr.msra.gmra.mxu3 %vm371_vm2, %v1193_v10 }
 0x353   :  { %3968 = vrot.lane.b32.xlu2 %v3967_v27, %s4189_s30 }
 0x358   :  { %v675_v15 = vpop.f32.mrf.mxu0 }
 0x375   :  { %v764_v28 = vpop.f32.mrf.mxu3 }
 0x37d   :  { %v766_v16 = vpop.f32.mrf.mxu3 }
 0x383   :  { %v785_v36 = vpop.f32.mrf.mxu0 }
 0x384   :  { %v3972_v19 = vpack.i.bf16 %v785_v36, %v764_v28 }
 0x385   :  { %v876_v3 = vpop.f32.mrf.mxu3 }
 0x386   :  { %3973 = vrot.lane.b32.xlu0 %v3972_v19, %s4188_s26 }
 0x38b   :  { %v787_v52 = vpop.f32.mrf.mxu0 }
 0x38d   :  { %v878_v40 = vpop.f32.mrf.mxu3 }
 0x393   :  { %v897_v33 = vpop.f32.mrf.mxu0 }
 0x394   :  { %v3977_v49 = vpack.i.bf16 %v897_v33, %v876_v3 }
 0x395   :  { %v988_v43 = vpop.f32.mrf.mxu3 }
 0x396   :  { %3978 = vrot.lane.b32.xlu2 %v3977_v49, %s4187_s25 }
 0x39b   :  { %v899_v24 = vpop.f32.mrf.mxu0 }
 0x39d   :  { %v990_v26 = vpop.f32.mrf.mxu3 }
 0x39e   :  { %v3588_v26 = vld [vmem:[%s5714_s9 + $0xac] sm:$0xf] }
 0x3a3   :  { %v1009_v30 = vpop.f32.mrf.mxu0 }
 0x3a4   :  { %v3982_v31 = vpack.i.bf16 %v1009_v30, %v988_v43  ;;  %v3882_v30 = vld [vmem:[%s5714_s9 + $0xb4] sm:$0xf0] }
 0x3a5   :  { %v1100_v60 = vpop.f32.mrf.mxu3 }
 0x3a6   :  { %3983 = vrot.lane.b32.xlu2 %v3982_v31, %s4186_s24  ;;  %v3584_v31 = vld [vmem:[%s5714_s9 + $0x94] sm:$0xf] }
 0x3ab   :  { %v1011_v32 = vpop.f32.mrf.mxu0 }
 0x3ac   :  { %v3881_v32 = vld [vmem:[%s5714_s9 + $0x9c] sm:$0xf0] }
 0x3ad   :  { %v1102_v34 = vpop.f32.mrf.mxu3  ;;  %v3969_v18 = vpop.permute.xlu2 %3968 }
 0x3ae   :  { %v3971_v47 = vunpack.i.h.bf16 %v3969_v18  ;;  %v3970_v29 = vunpack.i.l.bf16 %v3969_v18  ;;  %v3585_v34 = vor.u32 %v3881_v32, %v3584_v31  ;;  %v4191_v18 = vmov 128.0  }
 0x3af   :  { %4105 = vrcp.f32 %v4191_v18  ;;  %v3873_v18 = vld [vmem:[%s5714_s9 + $0x98] sm:$0xf0] }
 0x3b3   :  { %v1121_v12 = vpop.f32.mrf.mxu0 }
 0x3b4   :  { %v3987_v13 = vpack.i.bf16 %v1121_v12, %v1100_v60  ;;  %v3589_v60 = vor.u32 %v3882_v30, %v3588_v26  ;;  %v3580_v12 = vld [vmem:[%s5714_s9 + $0x7c] sm:$0xf] }
 0x3b5   :  { %v3964_v22 = vpop.permute.xlu1 %3963 }
 0x3b6   :  { %3988 = vrot.lane.b32.xlu1 %v3987_v13, %s4184_s29  ;;  %v3966_v20 = vunpack.i.h.bf16 %v3964_v22  ;;  %v3965_v50 = vunpack.i.l.bf16 %v3964_v22  ;;  %1618 = vmatpush.bf16.msrb.mxu3 %v3589_v60  ;;  %v3880_v13 = vld [vmem:[%s5714_s9 + $0x84] sm:$0xf0] }
 0x3b7   :  { %v3876_v22 = vld [vmem:[%s5714_s9 + $0x24] sm:$0xf0] }
 0x3b8   :  { %v1294_v17 = vsel %vm332_vm0, %v4737_v63, %v3966_v20  ;;  %v1293_v5 = vsel %vm332_vm0, %v4713_v39, %v3965_v50  ;;  %v4106_v50 = vpop.eup %4105 }
 0x3b9   :  { %v1296_v7 = vsel %vm1295_vm3, %v1293_v5, %v3970_v29  ;;  %v1297_v8 = vsel %vm1295_vm3, %v1294_v17, %v3971_v47  ;;  %v66_v17 = vld [vmem:[%s5715_s1] sm:$0xff]   ;;  %vm1407_vm9 = vweird.f32 %v4106_v50 }
 0x3ba   :  { %1619 = vmatpush.bf16.msrb.mxu3 %v3585_v34  ;;  %v96_v47 = vunpack.c.h.bf16 %v66_v17 }
 0x3bb   :  { %v1123_v35 = vpop.f32.mrf.mxu0 }
 0x3bc   :  { %v3581_v35 = vor.u32 %v3880_v13, %v3580_v12 }
 0x3be   :  { %1620 = vmatpush.bf16.msrb.mxu3 %v3581_v35 }
 0x3ce   :  { %v1233_v37 = vpop.f32.mrf.mxu0 }
 0x3d5   :  { %v1212_v2 = vpop.f32.mrf.mxu3 }
 0x3d6   :  { %v3992_v38 = vpack.i.bf16 %v1233_v37, %v1212_v2  ;;  %v1235_v41 = vpop.f32.mrf.mxu0  ;;  %v3576_v37 = vld [vmem:[%s5714_s9 + $0x64] sm:$0xf]  ;;  %v3879_v2 = vld [vmem:[%s5714_s9 + $0x6c] sm:$0xf0] }
 0x3d7   :  { %v4033_v41 = vld [vmem:[%s5712_s8] ss:$0 sm:$0xff] }
 0x3d8   :  { %3993 = vrot.lane.b32.xlu2 %v3992_v38, %s4185_s20  ;;  %v3577_v38 = vor.u32 %v3879_v2, %v3576_v37 }
 0x3da   :  { %1621 = vmatpush.bf16.msrb.mxu3 %v3577_v38 }
 0x3dd   :  { %v1214_v6 = vpop.f32.mrf.mxu3 }
 0x3de   :  { %1622 = vmatpush.bf16.msrb.mxu3 %v3573_v25  ;;  %v3556_v25 = vld [vmem:[%s5714_s9 + $0xa8] sm:$0xf] }
 0x3f0   :  { %v3979_v48 = vpop.permute.xlu2 %3978 }
 0x3f1   :  { %v3981_v10 = vunpack.i.h.bf16 %v3979_v48  ;;  %v3980_v39 = vunpack.i.l.bf16 %v3979_v48  ;;  %v3564_v48 = vld [vmem:[%s5714_s9 + $0x1c] sm:$0xf] }
 0x3f2   :  { %v3565_v20 = vor.u32 %v3876_v22, %v3564_v48  ;;  %v3548_v22 = vld [vmem:[%s5714_s9 + $0x78] sm:$0xf] }
 0x3f8   :  { %v3974_v51 = vpop.permute.xlu0 %3973 }
 0x3f9   :  { %v3976_v62 = vunpack.i.h.bf16 %v3974_v51  ;;  %v3975_v0 = vunpack.i.l.bf16 %v3974_v51  ;;  %v3560_v51 = vld [vmem:[%s5714_s9 + $0x4] sm:$0xf] }
 0x3fb   :  { %v1300_v21 = vsel %vm1298_vm4, %v1297_v8, %v3976_v62  ;;  %v1299_v23 = vsel %vm1298_vm4, %v1296_v7, %v3975_v0  ;;  %v3936_v62 = vld [vmem:[%s5716_s3] sm:$0xff]   ;;  %v95_v0 = vunpack.c.l.bf16 %v66_v17  ;;  %v1403_v7 = vmul.f32 128.0, %v4106_v50 }
 0x3fc   :  { %v1302_v15 = vsel %vm1301_vm5, %v1299_v23, %v3980_v39  ;;  %v1303_v28 = vsel %vm1301_vm5, %v1300_v21, %v3981_v10  ;;  %v3937_v29 = vunpack.c.l.bf16 %v3936_v62  ;;  %v3951_v10 = vld [vmem:[%s5716_s3 + $0x8] sm:$0xff]  }
 0x3fe   :  { %v1454_v8 = vadd.f32 %v3937_v29, %v95_v0  ;;  %v3536_v29 = vld [vmem:[%s5714_s9 + $0x30] sm:$0xf] }
 0x400   :  { %v3984_v59 = vpop.permute.xlu2 %3983 }
 0x401   :  { %v3986_v63 = vunpack.i.h.bf16 %v3984_v59  ;;  %v3985_v9 = vunpack.i.l.bf16 %v3984_v59  ;;  %v3875_v59 = vld [vmem:[%s5714_s9 + $0xc] sm:$0xf0] }
 0x402   :  { %v3561_v5 = vor.u32 %v3875_v59, %v3560_v51  ;;  %v3544_v51 = vld [vmem:[%s5714_s9 + $0x60] sm:$0xf]  ;;  %v3871_v59 = vld [vmem:[%s5714_s9 + $0x68] sm:$0xf0] }
 0x403   :  { %v1306_v36 = vsel %vm1304_vm6, %v1303_v28, %v3986_v63  ;;  %v1305_v19 = vsel %vm1304_vm6, %v1302_v15, %v3985_v9  ;;  %v1404_v63 = vsub.f32 1.0, %v1403_v7  ;;  %v68_v9 = vld [vmem:[%s5715_s1 + $0x8] sm:$0xff]   ;;  %v3545_v17 = vor.u32 %v3871_v59, %v3544_v51 }
 0x404   :  { %v97_v15 = vunpack.c.l.bf16 %v68_v9  ;;  %v98_v28 = vunpack.c.h.bf16 %v68_v9 }
 0x405   :  { %v1405_v39 = vmul.f32 %v4106_v50, %v1404_v63 }
 0x428   :  { %v3989_v1 = vpop.permute.xlu1 %3988 }
 0x429   :  { %v3991_v14 = vunpack.i.h.bf16 %v3989_v1  ;;  %v3990_v27 = vunpack.i.l.bf16 %v3989_v1  ;;  %v3938_v1 = vunpack.c.h.bf16 %v3936_v62  ;;  %v3870_v62 = vld [vmem:[%s5714_s9 + $0x50] sm:$0xf0] }
 0x42b   :  { %v1309_v40 = vsel %vm1307_vm7, %v1306_v36, %v3991_v14  ;;  %v1308_v33 = vsel %vm1307_vm7, %v1305_v19, %v3990_v27  ;;  %v1455_v21 = vadd.f32 %v3938_v1, %v96_v47  ;;  %v3941_v14 = vunpack.c.l.bf16 %v3951_v10  ;;  %v3869_v1 = vld [vmem:[%s5714_s9 + $0x38] sm:$0xf0] }
 0x42c   :  { %v3942_v27 = vunpack.c.h.bf16 %v3951_v10  ;;  %v3537_v7 = vor.u32 %v3869_v1, %v3536_v29  ;;  %v3528_v10 = vld [vmem:[%s5714_s9] sm:$0xf] }
 0x42d   :  { %v1462_v23 = vpack.c.bf16 %v1455_v21, %v1454_v8  ;;  %v1456_v36 = vadd.f32 %v3941_v14, %v97_v15  ;;  %v3532_v21 = vld [vmem:[%s5714_s9 + $0x18] sm:$0xf] }
 0x42e   :  { %v1457_v19 = vadd.f32 %v3942_v27, %v98_v28 }
 0x432   :  { %v3994_v16 = vpop.permute.xlu2 %3993 }
 0x433   :  { %v3996_v3 = vunpack.i.h.bf16 %v3994_v16  ;;  %v3995_v52 = vunpack.i.l.bf16 %v3994_v16  ;;  %v1406_v16 = vadd.f32 %v4106_v50, %v1405_v39  ;;  %v3867_v39 = vld [vmem:[%s5714_s9 + $0x8] sm:$0xf0] }
 0x434   :  { %v3529_v27 = vor.u32 %v3867_v39, %v3528_v10  ;;  %v3884_v10 = vld [vmem:[%s5714_s9 + $0x28] sm:$0xf0] }
 0x435   :  { %v1312_v49 = vsel %vm1310_vm8, %v1309_v40, %v3996_v3  ;;  %v1311_v43 = vsel %vm1310_vm8, %v1308_v33, %v3995_v52  ;;  %v4879_v3 = vsel %vm1407_vm9, %v4106_v50, %v1406_v16  ;;  %v1463_v52 = vpack.c.bf16 %v1457_v19, %v1456_v36  ;;  %v3636_v36 = vld [vmem:[%s5714_s9 + $0xb0] sm:$0xf]  ;;  %v3890_v19 = vld [vmem:[%s5714_s9 + $0xb8] sm:$0xf0] }
 0x436   :  { %v1313_v24 = vpack.c.bf16 %v1312_v49, %v1311_v43  ;;  %v70_v43 = vld [vmem:[%s5715_s1 + $0x10] sm:$0xff]  }
 0x437   :  { %v99_v60 = vunpack.c.l.bf16 %v70_v43  ;;  %v100_v32 = vunpack.c.h.bf16 %v70_v43 }
 0x438   :  { %1390 = vmatmul.bf16.vlgmr.msra.gmra.mxu1 %v1313_v24  ;;  %v3952_v24 = vld [vmem:[%s5716_s3 + $0x10] sm:$0xff]  }
 0x439   :  { %v3945_v30 = vunpack.c.l.bf16 %v3952_v24  ;;  %v3946_v31 = vunpack.c.h.bf16 %v3952_v24 }
 0x43b   :  { %v1458_v35 = vadd.f32 %v3945_v30, %v99_v60  ;;  %v1459_v37 = vadd.f32 %v3946_v31, %v100_v32  ;;  %v4972_v60 = vld [vmem:[%s5717_s10 + $0x1] ss:$0 sm:$0xff] }
 0x43c   :  { %v3628_v32 = vld [vmem:[%s5714_s9 + $0x80] sm:$0xf] }
 0x43d   :  { %v1464_v38 = vpack.c.bf16 %v1459_v37, %v1458_v35 }
 0x4b5   :  { %v1391_v6 = vpop.f32.mrf.mxu1 }
 0x4b6   :  { %v1392_v44 = vadd.f32 %v4033_v41, %v1391_v6  ;;  %v3953_v6 = vld [vmem:[%s5716_s3 + $0x18] sm:$0xff]  }
 0x4b8   :  { %v1396_v57 = vadd.f32 %v1392_v44, %v93_v53  ;;  %v3568_v53 = vld [vmem:[%s5714_s9 + $0x34] sm:$0xf]  ;;  %v3949_v44 = vunpack.c.l.bf16 %v3953_v6 }
 0x4ba   :  { %1398 = vadd.xlane.f32.xlu0 %v1396_v57 }
 0x4bd   :  { %v1393_v58 = vpop.f32.mrf.mxu1 }
 0x4be   :  { %v1394_v4 = vadd.f32 %v4033_v41, %v1393_v58  ;;  %v72_v41 = vld [vmem:[%s5715_s1 + $0x18] sm:$0xff]  }
 0x4bf   :  { %v101_v58 = vunpack.c.l.bf16 %v72_v41 }
 0x4c0   :  { %v1397_v46 = vadd.f32 %v1394_v4, %v94_v56  ;;  %v3569_v56 = vor.u32 %v3877_v42, %v3568_v53  ;;  %v102_v4 = vunpack.c.h.bf16 %v72_v41  ;;  %v3874_v53 = vld [vmem:[%s5714_s9 + $0xb0] sm:$0xf0] }
 0x4c1   :  { %v3557_v42 = vor.u32 %v3874_v53, %v3556_v25  ;;  %v3887_v41 = vld [vmem:[%s5714_s9 + $0x70] sm:$0xf0]  ;;  %v3620_v25 = vld [vmem:[%s5714_s9 + $0x50] sm:$0xf]  ;;  %v3886_v53 = vld [vmem:[%s5714_s9 + $0x58] sm:$0xf0] }
 0x4c2   :  { %1400 = vadd.xlane.f32.xlu1 %v1397_v46  ;;  %1623 = vmatpush.bf16.msrb.mxu3 %v3569_v56  ;;  %v3552_v56 = vld [vmem:[%s5714_s9 + $0x90] sm:$0xf] }
 0x4c3   :  { %1534 = vmatpush.bf16.msra.mxu2 %v3557_v42  ;;  %v3553_v48 = vor.u32 %v3873_v18, %v3552_v56  ;;  %v92_v42 = vld [vmem:[%s5718_s17] sm:$0x3f] }
 0x4c4   :  { %v1445_v51 = vperm.slane %v92_v42, 0 }
 0x4c6   :  { %1624 = vmatpush.bf16.msrb.mxu3 %v3565_v20  ;;  %v3872_v20 = vld [vmem:[%s5714_s9 + $0x80] sm:$0xf0] }
 0x4c7   :  { %1535 = vmatpush.bf16.msra.mxu2 %v3553_v48  ;;  %v3549_v50 = vor.u32 %v3872_v20, %v3548_v22 }
 0x4ca   :  { %1625 = vmatpush.bf16.msrb.mxu3 %v3561_v5  ;;  %v3540_v5 = vld [vmem:[%s5714_s9 + $0x48] sm:$0xf] }
 0x4cb   :  { %1536 = vmatpush.bf16.msra.mxu2 %v3549_v50  ;;  %v3541_v0 = vor.u32 %v3870_v62, %v3540_v5  ;;  %v3621_v50 = vor.u32 %v3886_v53, %v3620_v25  ;;  %v3616_v5 = vld [vmem:[%s5714_s9 + $0x38] sm:$0xf]  ;;  %v3885_v62 = vld [vmem:[%s5714_s9 + $0x40] sm:$0xf0]  ;;  %v3833_v53 = vld [vmem:[%s5715_s1 + $0x10] sm:$0xff] }
 0x4cd   :  { %1626 = vmatmul.bf16.vlgmr.msrb.gmra.mxu3 %v1462_v23  ;;  %v3868_v23 = vld [vmem:[%s5714_s9 + $0x20] sm:$0xf0] }
 0x4ce   :  { %v3533_v9 = vor.u32 %v3868_v23, %v3532_v21 }
 0x4cf   :  { %1537 = vmatpush.bf16.msra.mxu2 %v3545_v17 }
 0x4d3   :  { %1538 = vmatpush.bf16.msra.mxu2 %v3541_v0 }
 0x4d7   :  { %1539 = vmatpush.bf16.msra.mxu2 %v3537_v7 }
 0x4db   :  { %1540 = vmatpush.bf16.msra.mxu2 %v3533_v9  ;;  %v3612_v9 = vld [vmem:[%s5714_s9 + $0x20] sm:$0xf] }
 0x4dd   :  { %1631 = vmatmul.bf16.gmra.mxu3 %v1463_v52  ;;  %v3632_v52 = vld [vmem:[%s5714_s9 + $0x98] sm:$0xf] }
 0x4df   :  { %1541 = vmatpush.bf16.msra.mxu2 %v3529_v27 }
 0x4ed   :  { %1636 = vmatmul.bf16.gmra.mxu3 %v1464_v38  ;;  %v3624_v38 = vld [vmem:[%s5714_s9 + $0x68] sm:$0xf] }
 0x52d   :  { %v1399_v40 = vpop.xlane.xlu0 %1398 }
 0x52e   :  { %v1409_v33 = vmul.f32 %v4879_v3, %v1399_v40  ;;  %v3637_v40 = vor.u32 %v3890_v19, %v3636_v36  ;;  %v3608_v19 = vld [vmem:[%s5714_s9 + $0x8] sm:$0xf] }
 0x530   :  { %v4882_v49 = vsub.f32 %v1396_v57, %v1409_v33  ;;  %v3950_v57 = vunpack.c.h.bf16 %v3953_v6  ;;  %v3889_v33 = vld [vmem:[%s5714_s9 + $0xa0] sm:$0xf0]  ;;  %1739 = vmatpush.bf16.msra.mxu0 %v3637_v40 }
 0x531   :  { %v3633_v31 = vor.u32 %v3889_v33, %v3632_v52  ;;  %v3883_v52 = vld [vmem:[%s5714_s9 + $0x10] sm:$0xf0] }
 0x532   :  { %v1413_v26 = vmul.f32 %v4882_v49, %v4882_v49  ;;  %v1461_v11 = vadd.f32 %v3950_v57, %v102_v4 }
 0x534   :  { %1415 = vadd.xlane.f32.xlu2 %v1413_v26  ;;  %1740 = vmatpush.bf16.msra.mxu0 %v3633_v31 }
 0x535   :  { %v1401_v34 = vpop.xlane.xlu1 %1400 }
 0x536   :  { %v1410_v12 = vmul.f32 %v4879_v3, %v1401_v34  ;;  %v3888_v34 = vld [vmem:[%s5714_s9 + $0x88] sm:$0xf0] }
 0x538   :  { %v4893_v13 = vsub.f32 %v1397_v46, %v1410_v12  ;;  %v1460_v46 = vadd.f32 %v3949_v44, %v101_v58 }
 0x53a   :  { %v1414_v2 = vmul.f32 %v4893_v13, %v4893_v13  ;;  %v1465_v61 = vpack.c.bf16 %v1461_v11, %v1460_v46  ;;  %v3625_v11 = vor.u32 %v3887_v41, %v3624_v38 }
 0x53c   :  { %1417 = vadd.xlane.f32.xlu0 %v1414_v2  ;;  %1641 = vmatmul.bf16.gmra.mxu3 %v1465_v61  ;;  %v3629_v2 = vor.u32 %v3888_v34, %v3628_v32 }
 0x53e   :  { %1741 = vmatpush.bf16.msra.mxu0 %v3629_v2 }
 0x542   :  { %1742 = vmatpush.bf16.msra.mxu0 %v3625_v11  ;;  %v3832_v11 = vld [vmem:[%s5715_s1 + $0x8] sm:$0xff] }
 0x546   :  { %1743 = vmatpush.bf16.msra.mxu0 %v3621_v50 }
 0x550   :  { %v4933_v47 = vpop.f32.mrf.mxu3 }
 0x551   :  { %v1628_v7 = vadd.f32 %v4972_v60, %v4933_v47 }
 0x553   :  { %v1770_v27 = vpack.c.bf16 %v1628_v7, %v1628_v7 }
 0x555   :  { %v1796_v33 = vunpack.c.l.b16 %v1770_v27 }
 0x558   :  { %v4954_v15 = vpop.f32.mrf.mxu3 }
 0x559   :  { %v1630_v23 = vadd.f32 %v4972_v60, %v4954_v15  ;;  %v3613_v15 = vor.u32 %v3884_v10, %v3612_v9 }
 0x560   :  { %v1632_v30 = vpop.f32.mrf.mxu3 }
 0x561   :  { %v1633_v35 = vadd.f32 %v4972_v60, %v1632_v30 }
 0x563   :  { %v1772_v57 = vpack.c.bf16 %v1633_v35, %v1633_v35 }
 0x565   :  { %v1798_v48 = vunpack.c.l.b16 %v1772_v57 }
 0x568   :  { %v1634_v46 = vpop.f32.mrf.mxu3 }
 0x569   :  { %v1635_v61 = vadd.f32 %v4972_v60, %v1634_v46 }
 0x56b   :  { %v1773_v22 = vpack.c.bf16 %v1635_v61, %v1635_v61 }
 0x56d   :  { %v1799_v17 = vunpack.c.l.b16 %v1773_v22  ;;  %v4035_v22 = vld [vmem:[%s5717_s10] ss:$0 sm:$0xff] }
 0x56f   :  { %v5004_v29 = vpack.c.b16 %v1799_v17, %v1798_v48 }
 0x571   :  { %1943 = vrot.lane.b32.xlu2 %v5004_v29, %s4185_s20 }
 0x579   :  { %2070 = vrot.lane.b32.xlu2 %v5004_v29, %s4184_s29 }
 0x5a7   :  { %v1416_v8 = vpop.xlane.xlu2 %1415 }
 0x5a8   :  { %v1419_v63 = vmul.f32 %v1416_v8, %v4879_v3  ;;  %v1637_v8 = vpop.f32.mrf.mxu3 }
 0x5aa   :  { %v1421_v14 = vadd.f32 1e-05, %v1419_v63  ;;  %v1448_v63 = vperm.slane %v92_v42, 1  ;;  %v3834_v42 = vld [vmem:[%s5715_s1 + $0x18] sm:$0xff] }
 0x5ac   :  { %4107 = vrsqrt.f32 %v1421_v14  ;;  %vm1429_vm11 = vweird.f32 %v1421_v14 }
 0x5af   :  { %v1418_v28 = vpop.xlane.xlu0 %1417 }
 0x5b0   :  { %v1420_v16 = vmul.f32 %v1418_v28, %v4879_v3 }
 0x5b2   :  { %v4108_v43 = vpop.eup %4107  ;;  %v1422_v24 = vadd.f32 1e-05, %v1420_v16  ;;  %v1771_v16 = vpack.c.bf16 %v1630_v23, %v1630_v23 }
 0x5b3   :  { %v1424_v26 = vmul.f32 %v4108_v43, %v1421_v14  ;;  %vm1430_vm10 = vweird.f32 %v4108_v43  ;;  %v1638_v14 = vadd.f32 %v4972_v60, %v1637_v8 }
 0x5b4   :  { %4109 = vrsqrt.f32 %v1422_v24  ;;  %vm1431_vm12 = vmor %vm1429_vm11, %vm1430_vm10  ;;  %vm1439_vm14 = vweird.f32 %v1422_v24 }
 0x5b5   :  { %v1425_v12 = vmul.f32 %v4108_v43, %v1424_v26  ;;  %v1797_v26 = vunpack.c.l.b16 %v1771_v16 }
 0x5b7   :  { %v1426_v37 = vmul.f32 0.5, %v1425_v12  ;;  %v5042_v2 = vpack.c.b16 %v1797_v26, %v1796_v33 }
 0x5b9   :  { %v1427_v6 = vsub.f32 1.5, %v1426_v37  ;;  %v3831_v37 = vld [vmem:[%s5715_s1] sm:$0xff]  ;;  %2068 = vrot.lane.b32.xlu2 %v5042_v2, %s4184_s29 }
 0x5ba   :  { %v4110_v44 = vpop.eup %4109 }
 0x5bb   :  { %v1428_v58 = vmul.f32 %v4108_v43, %v1427_v6  ;;  %v1434_v4 = vmul.f32 %v4110_v44, %v1422_v24  ;;  %vm1440_vm13 = vweird.f32 %v4110_v44  ;;  %v3609_v24 = vor.u32 %v3883_v52, %v3608_v19 }
 0x5bc   :  { %vm1441_vm15 = vmor %vm1439_vm14, %vm1440_vm13 }
 0x5bd   :  { %v1432_v56 = vsel %vm1431_vm12, %v4108_v43, %v1428_v58  ;;  %v1435_v18 = vmul.f32 %v4110_v44, %v1434_v4  ;;  %v1639_v43 = vpop.f32.mrf.mxu3 }
 0x5be   :  { %v1443_v59 = vmul.f32 %v1432_v56, %v4882_v49  ;;  %v3617_v49 = vor.u32 %v3885_v62, %v3616_v5  ;;  %v1640_v32 = vadd.f32 %v4972_v60, %v1639_v43 }
 0x5bf   :  { %v1436_v20 = vmul.f32 0.5, %v1435_v18 }
 0x5c0   :  { %v1446_v21 = vmul.f32 %v1445_v51, %v1443_v59  ;;  %1744 = vmatpush.bf16.msra.mxu0 %v3617_v49  ;;  %v1775_v35 = vpack.c.bf16 %v1640_v32, %v1640_v32 }
 0x5c1   :  { %v1437_v0 = vsub.f32 1.5, %v1436_v20  ;;  %2192 = vrot.lane.b32.xlu2 %v5042_v2, %s4186_s24 }
 0x5c2   :  { %v5020_v36 = vadd.f32 %v1448_v63, %v1446_v21 }
 0x5c3   :  { %v1438_v1 = vmul.f32 %v4110_v44, %v1437_v0 }
 0x5c4   :  { %1745 = vmatpush.bf16.msra.mxu0 %v3613_v15  ;;  %v1451_v30 = vadd.f32 %v3933_v54, %v5020_v36  ;;  %v1829_v54 = vunpack.c.l.b16 %v1775_v35 }
 0x5c5   :  { %v1442_v47 = vsel %vm1441_vm15, %v4110_v44, %v1438_v1  ;;  %v1642_v45 = vpop.f32.mrf.mxu3  ;;  %v1806_v44 = vsel %vm332_vm0, %v5042_v2, 0 }
 0x5c6   :  { %v1444_v39 = vmul.f32 %v1442_v47, %v4893_v13  ;;  %v1774_v13 = vpack.c.bf16 %v1638_v14, %v1638_v14  ;;  %v1643_v41 = vadd.f32 %v4972_v60, %v1642_v45 }
 0x5c8   :  { %v1447_v28 = vmul.f32 %v1445_v51, %v1444_v39  ;;  %v1828_v12 = vunpack.c.l.b16 %v1774_v13  ;;  %1746 = vmatpush.bf16.msra.mxu0 %v3609_v24  ;;  %v1776_v6 = vpack.c.bf16 %v1643_v41, %v1643_v41 }
 0x5ca   :  { %v5028_v40 = vadd.f32 %v1448_v63, %v1447_v28  ;;  %v5044_v38 = vpack.c.b16 %v1829_v54, %v1828_v12  ;;  %v1830_v4 = vunpack.c.l.b16 %v1776_v6  ;;  %v4036_v28 = vld [vmem:[%s5717_s10 + $0x2] ss:$0 sm:$0xff]  ;;  %s5737_s10 = smov 16  }
 0x5cb   :  { %1747 = vmatmul.bf16.vlgmr.msra.gmra.mxu0 %v3831_v37  ;;  %v5089_v48 = vpop.permute.xlu2 %1943 }
 0x5cc   :  { %v1452_v31 = vadd.f32 %v3934_v55, %v5028_v40  ;;  %1972 = vrot.lane.b32.xlu0 %v5044_v38, %s4185_s20  ;;  %v1809_v55 = vsel %vm332_vm0, %v5004_v29, 0  ;;  %v1838_v56 = vsel %vm332_vm0, %v5044_v38, 0 }
 0x5cd   :  { %1817 = vmatpush.bf16.xpose.msrb.mxu1 %v1809_v55  ;;  %v1644_v57 = vpop.f32.mrf.mxu3 }
 0x5ce   :  { %v1453_v34 = vpack.c.bf16 %v1452_v31, %v1451_v30  ;;  %v1645_v58 = vadd.f32 %v4972_v60, %v1644_v57  ;;  %v1952_v57 = vsel %vm332_vm0, %v5089_v48, 0 }
 0x5d0   :  { %1542 = vmatmul.bf16.vlgmr.msra.gmra.mxu2 %v1453_v34  ;;  %v1777_v46 = vpack.c.bf16 %v1645_v58, %v1645_v58 }
 0x5d2   :  { %v1831_v61 = vunpack.c.l.b16 %v1777_v46 }
 0x5d3   :  { %v2071_v62 = vpop.permute.xlu2 %2070 }
 0x5d4   :  { %v5061_v25 = vpack.c.b16 %v1831_v61, %v1830_v4  ;;  %v2079_v1 = vsel %vm332_vm0, %v2071_v62, 0 }
 0x5d5   :  { %1818 = vmatpush.bf16.xpose.msrb.mxu1 %v1806_v44  ;;  %2087 = vmatpush.bf16.xpose.msra.mxu3 %v2079_v1 }
 0x5d6   :  { %2098 = vrot.lane.b32.xlu0 %v5061_v25, %s4184_s29  ;;  %1974 = vrot.lane.b32.xlu1 %v5061_v25, %s4185_s20  ;;  %v1841_v60 = vsel %vm332_vm0, %v5061_v25, 0 }
 0x5d7   :  { %1849 = vmatpush.bf16.xpose.msrb.mxu2 %v1841_v60 }
 0x5db   :  { %1752 = vmatmul.bf16.gmra.mxu0 %v3832_v11 }
 0x5de   :  { %2096 = vrot.lane.b32.xlu0 %v5044_v38, %s4184_s29  ;;  %1941 = vrot.lane.b32.xlu1 %v5042_v2, %s4185_s20 }
 0x5df   :  { %1850 = vmatpush.bf16.xpose.msrb.mxu2 %v1838_v56 }
 0x5e6   :  { %2194 = vrot.lane.b32.xlu0 %v5004_v29, %s4186_s24  ;;  %2222 = vrot.lane.b32.xlu1 %v5061_v25, %s4186_s24 }
 0x5eb   :  { %1757 = vmatmul.bf16.gmra.mxu0 %v3833_v53 }
 0x5ee   :  { %2220 = vrot.lane.b32.xlu0 %v5044_v38, %s4186_s24 }
 0x5fb   :  { %1762 = vmatmul.bf16.gmra.mxu0 %v3834_v42 }
 0x613   :  { %v2069_v47 = vpop.permute.xlu2 %2068 }
 0x614   :  { %v2076_v14 = vsel %vm332_vm0, %v2069_v47, 0  ;;  %v5159_v47 = vld [vmem:[%s5719_s4] ss:$0 sm:$0xff] }
 0x615   :  { %2088 = vmatpush.bf16.xpose.msra.mxu3 %v2076_v14 }
 0x61b   :  { %v2193_v33 = vpop.permute.xlu2 %2192 }
 0x61c   :  { %v2200_v30 = vsel %vm332_vm0, %v2193_v33, 0 }
 0x63e   :  { %v5087_v18 = vpop.permute.xlu0 %1972 }
 0x648   :  { %v2099_v59 = vpop.permute.xlu0 %2098  ;;  %v1748_v17 = vpop.f32.mrf.mxu0 }
 0x649   :  { %v2107_v5 = vsel %vm332_vm0, %v2099_v59, 0  ;;  %v1749_v43 = vadd.f32 %v4036_v28, %v1748_v17  ;;  %v1975_v6 = vpop.permute.xlu1 %1974 }
 0x64a   :  { %2115 = vmatpush.bf16.xpose.msrb.mxu0 %v2107_v5 }
 0x64b   :  { %v1778_v32 = vpack.c.bf16 %v1749_v43, %v1749_v43 }
 0x64d   :  { %v1884_v54 = vunpack.c.l.b16 %v1778_v32 }
 0x650   :  { %v2097_v63 = vpop.permute.xlu0 %2096  ;;  %v1750_v9 = vpop.f32.mrf.mxu0 }
 0x651   :  { %v2104_v10 = vsel %vm332_vm0, %v2097_v63, 0  ;;  %v1751_v24 = vadd.f32 %v4036_v28, %v1750_v9  ;;  %v1942_v4 = vpop.permute.xlu1 %1941  ;;  %v1980_v9 = vsel %vm332_vm0, %v5087_v18, 0 }
 0x652   :  { %2116 = vmatpush.bf16.xpose.msrb.mxu0 %v2104_v10  ;;  %v1949_v46 = vsel %vm332_vm0, %v1942_v4, 0 }
 0x653   :  { %v1543_v20 = vpop.f32.mrf.mxu2  ;;  %v1779_v34 = vpack.c.bf16 %v1751_v24, %v1751_v24 }
 0x654   :  { %v1544_v50 = vadd.f32 %v4035_v22, %v1543_v20 }
 0x655   :  { %v1885_v45 = vunpack.c.l.b16 %v1779_v34 }
 0x656   :  { %v1548_v51 = vmul.f32 0.25, %v1544_v50 }
 0x657   :  { %v5125_v44 = vpack.c.b16 %v1885_v45, %v1884_v54 }
 0x658   :  { %v1768_v0 = vpack.c.bf16 %v1548_v51, %v1548_v51  ;;  %v2195_v16 = vpop.permute.xlu0 %2194  ;;  %v1753_v19 = vpop.f32.mrf.mxu0 }
 0x659   :  { %v2203_v52 = vsel %vm332_vm0, %v2195_v16, 0  ;;  %v1754_v13 = vadd.f32 %v4036_v28, %v1753_v19 }
 0x65a   :  { %v1937_v7 = vunpack.c.l.b16 %v1768_v0  ;;  %3638 = vmatmul.msk.bf16.vlgmr.msrb.gmra.mxu1 %vm332_vm0, %v1768_v0  ;;  %2211 = vmatpush.bf16.xpose.msrb.mxu3 %v2203_v52 }
 0x65b   :  { %v1545_v8 = vpop.f32.mrf.mxu2  ;;  %v1780_v26 = vpack.c.bf16 %v1754_v13, %v1754_v13  ;;  %v5170_v13 = vld [vmem:[%s5719_s4 + $0x1] ss:$0 sm:$0xff] }
 0x65c   :  { %v5097_v49 = vpack.c.b16 %v1937_v7, %v1937_v7  ;;  %v1546_v21 = vadd.f32 %v4035_v22, %v1545_v8  ;;  %v1983_v7 = vsel %vm332_vm0, %v1975_v6, 0  ;;  %v2223_v8 = vpop.permute.xlu1 %2222 }
 0x65d   :  { %v1886_v35 = vunpack.c.l.b16 %v1780_v26 }
 0x65e   :  { %v1549_v23 = vmul.f32 0.25, %v1546_v21  ;;  %1939 = vrot.lane.b32.xlu1 %v5097_v49, %s4185_s20  ;;  %v2231_v21 = vsel %vm332_vm0, %v2223_v8, 0 }
 0x65f   :  { %2239 = vmatpush.bf16.xpose.msra.mxu0 %v2231_v21 }
 0x660   :  { %v1769_v39 = vpack.c.bf16 %v1549_v23, %v1549_v23  ;;  %v1755_v31 = vpop.f32.mrf.mxu0  ;;  %v2221_v23 = vpop.permute.xlu0 %2220 }
 0x661   :  { %v1756_v12 = vadd.f32 %v4036_v28, %v1755_v31  ;;  %v2228_v63 = vsel %vm332_vm0, %v2221_v23, 0 }
 0x662   :  { %v1968_v27 = vunpack.c.l.b16 %v1769_v39  ;;  %3639 = vmatmul.msk.bf16.vlgmr.msrb.gmra.mxu2 %vm332_vm0, %v1769_v39  ;;  %2212 = vmatpush.bf16.xpose.msrb.mxu3 %v2200_v30 }
 0x663   :  { %v1781_v37 = vpack.c.bf16 %v1756_v12, %v1756_v12 }
 0x664   :  { %v5104_v15 = vpack.c.b16 %v1968_v27, %v1968_v27 }
 0x665   :  { %v1887_v55 = vunpack.c.l.b16 %v1781_v37 }
 0x666   :  { %2094 = vrot.lane.b32.xlu2 %v5104_v15, %s4184_s29  ;;  %1970 = vrot.lane.b32.xlu0 %v5104_v15, %s4185_s20 }
 0x667   :  { %2066 = vrot.lane.b32.xlu1 %v5097_v49, %s4184_s29  ;;  %v5121_v41 = vpack.c.b16 %v1887_v55, %v1886_v35  ;;  %2240 = vmatpush.bf16.xpose.msra.mxu0 %v2228_v63 }
 0x668   :  { %v1758_v58 = vpop.f32.mrf.mxu0 }
 0x669   :  { %1901 = vmatpush.bf16.msra.mxu1 %v5121_v41  ;;  %v1759_v53 = vadd.f32 %v4036_v28, %v1758_v58 }
 0x66b   :  { %v1782_v22 = vpack.c.bf16 %v1759_v53, %v1759_v53 }
 0x66d   :  { %1902 = vmatpush.bf16.msra.mxu1 %v5125_v44  ;;  %v1912_v17 = vunpack.c.l.b16 %v1782_v22 }
 0x66e   :  { %2318 = vrot.lane.b32.xlu0 %v5004_v29, %s4187_s25 }
 0x66f   :  { %2190 = vrot.lane.b32.xlu1 %v5097_v49, %s4186_s24 }
 0x670   :  { %v1760_v11 = vpop.f32.mrf.mxu0 }
 0x671   :  { %1960 = vmatpush.bf16.xpose.msrb.mxu1 %v1952_v57  ;;  %v1761_v42 = vadd.f32 %v4036_v28, %v1760_v11 }
 0x673   :  { %v1783_v20 = vpack.c.bf16 %v1761_v42, %v1761_v42 }
 0x675   :  { %v1913_v5 = vunpack.c.l.b16 %v1783_v20 }
 0x676   :  { %2344 = vrot.lane.b32.xlu0 %v5044_v38, %s4187_s25 }
 0x677   :  { %v5144_v1 = vpack.c.b16 %v1913_v5, %v1912_v17 }
 0x678   :  { %v1763_v61 = vpop.f32.mrf.mxu0 }
 0x679   :  { %1961 = vmatpush.bf16.xpose.msrb.mxu1 %v1949_v46  ;;  %v1764_v60 = vadd.f32 %v4036_v28, %v1763_v61 }
 0x67b   :  { %v1784_v56 = vpack.c.bf16 %v1764_v60, %v1764_v60 }
 0x67d   :  { %v1914_v51 = vunpack.c.l.b16 %v1784_v56 }
 0x67e   :  { %2442 = vrot.lane.b32.xlu0 %v5004_v29, %s4188_s26 }
 0x680   :  { %v1765_v48 = vpop.f32.mrf.mxu0 }
 0x681   :  { %v1766_v50 = vadd.f32 %v4036_v28, %v1765_v48 }
 0x683   :  { %v1785_v59 = vpack.c.bf16 %v1766_v50, %v1766_v50 }
 0x685   :  { %v1915_v62 = vunpack.c.l.b16 %v1785_v59 }
 0x686   :  { %2468 = vrot.lane.b32.xlu0 %v5044_v38, %s4188_s26 }
 0x687   :  { %v5140_v0 = vpack.c.b16 %v1915_v62, %v1914_v51 }
 0x689   :  { %1929 = vmatpush.bf16.msra.mxu2 %v5140_v0 }
 0x68d   :  { %1930 = vmatpush.bf16.msra.mxu2 %v5144_v1 }
 0x68e   :  { %2566 = vrot.lane.b32.xlu0 %v5004_v29, %s4189_s30 }
 0x691   :  { %1991 = vmatpush.bf16.xpose.msrb.mxu2 %v1983_v7 }
 0x696   :  { %2592 = vrot.lane.b32.xlu0 %v5044_v38, %s4189_s30 }
 0x699   :  { %1992 = vmatpush.bf16.xpose.msrb.mxu2 %v1980_v9 }
 0x69e   :  { %2690 = vrot.lane.b32.xlu0 %v5004_v29, %s5737_s10 }
 0x6c0   :  { %v2095_v29 = vpop.permute.xlu2 %2094 }
 0x6c1   :  { %3647 = vmatmul.msk.bf16.vlgmr.msrb.gmra.mxu0 %vm332_vm0, %v2095_v29 }
 0x6d0   :  { %v5154_v10 = vpop.permute.xlu1 %1939 }
 0x6d7   :  { %v1820_v39 = vpop.f32.mrf.mxu1 }
 0x6d8   :  { %v1821_v14 = vadd.f32 %v5159_v47, %v1820_v39  ;;  %v5162_v27 = vpop.permute.xlu0 %1970 }
 0x6d9   :  { %v2067_v28 = vpop.permute.xlu1 %2066 }
 0x6da   :  { %3646 = vmatmul.msk.bf16.vlgmr.msra.gmra.mxu3 %vm332_vm0, %v2067_v28  ;;  %v1856_v18 = vsel %vm1295_vm3, %v1821_v14, -inf }
 0x6db   :  { %1857 = vmax.xlane.f32.xlu1 %v1856_v18 }
 0x6df   :  { %v1822_v16 = vpop.f32.mrf.mxu1 }
 0x6e0   :  { %v2319_v19 = vpop.permute.xlu0 %2318 }
 0x6e1   :  { %v2327_v52 = vsel %vm332_vm0, %v2319_v19, 0  ;;  %v2191_v26 = vpop.permute.xlu1 %2190 }
 0x6e2   :  { %2335 = vmatpush.bf16.xpose.msra.mxu3 %v2327_v52 }
 0x6e5   :  { %v1852_v33 = vpop.f32.mrf.mxu2 }
 0x6e6   :  { %v1853_v43 = vadd.f32 %v5170_v13, %v1852_v33 }
 0x6e8   :  { %v1859_v24 = vsel %vm1295_vm3, %v1853_v43, -inf  ;;  %v2345_v11 = vpop.permute.xlu0 %2344 }
 0x6e9   :  { %1860 = vmax.xlane.f32.xlu2 %v1859_v24  ;;  %v2352_v42 = vsel %vm332_vm0, %v2345_v11, 0 }
 0x6ea   :  { %3650 = vmatmul.msk.bf16.vlgmr.msrb.gmra.mxu3 %vm332_vm0, %v2191_v26 }
 0x6ed   :  { %v1854_v30 = vpop.f32.mrf.mxu2 }
 0x6f0   :  { %v2443_v56 = vpop.permute.xlu0 %2442 }
 0x6f1   :  { %v2451_v39 = vsel %vm332_vm0, %v2443_v56, 0 }
 0x6f4   :  { %2346 = vrot.lane.b32.xlu1 %v5061_v25, %s4187_s25 }
 0x6f8   :  { %v2469_v50 = vpop.permute.xlu0 %2468 }
 0x6f9   :  { %v2476_v51 = vsel %vm332_vm0, %v2469_v50, 0 }
 0x6fc   :  { %2314 = vrot.lane.b32.xlu1 %v5097_v49, %s4187_s25 }
 0x700   :  { %v2567_v17 = vpop.permute.xlu0 %2566 }
 0x701   :  { %2218 = vrot.lane.b32.xlu2 %v5104_v15, %s4186_s24 }
 0x704   :  { %2470 = vrot.lane.b32.xlu1 %v5061_v25, %s4188_s26 }
 0x708   :  { %v2593_v5 = vpop.permute.xlu0 %2592 }
 0x70c   :  { %2438 = vrot.lane.b32.xlu1 %v5097_v49, %s4188_s26 }
 0x710   :  { %v2691_v8 = vpop.permute.xlu0 %2690 }
 0x714   :  { %2594 = vrot.lane.b32.xlu1 %v5061_v25, %s4189_s30 }
 0x71c   :  { %2562 = vrot.lane.b32.xlu1 %v5097_v49, %s4189_s30 }
 0x724   :  { %2718 = vrot.lane.b32.xlu1 %v5061_v25, %s5737_s10 }
 0x72c   :  { %2686 = vrot.lane.b32.xlu1 %v5097_v49, %s5737_s10 }
 0x734   :  { %2024 = vrot.lane.b32.xlu1 %v5121_v41, %s4185_s20 }
 0x73e   :  { %v2118_v31 = vpop.f32.mrf.mxu0 }
 0x73f   :  { %v5235_v7 = vadd.f32 %v5170_v13, %v2118_v31 }
 0x746   :  { %v2120_v32 = vpop.f32.mrf.mxu0 }
 0x74e   :  { %v1858_v34 = vpop.xlane.xlu1 %1857 }
 0x74f   :  { %v1862_v12 = vsub.f32 %v1821_v14, %v1858_v34 }
 0x751   :  { %v1864_v35 = vmul.f32 1.442695, %v1862_v12  ;;  %v2600_v12 = vsel %vm332_vm0, %v2593_v5, 0 }
 0x753   :  { %4111 = vpow2.f32 %v1864_v35 }
 0x759   :  { %v4112_v37 = vpop.eup %4111 }
 0x75a   :  { %v1868_v54 = vsel %vm1295_vm3, %v4112_v37, 0.0 }
 0x75b   :  { %1869 = vadd.xlane.f32.xlu2 %v1868_v54 }
 0x75c   :  { %v1861_v45 = vpop.xlane.xlu2 %1860 }
 0x75d   :  { %v1863_v55 = vsub.f32 %v1853_v43, %v1861_v45  ;;  %v2090_v6 = vpop.f32.mrf.mxu3 }
 0x75e   :  { %v5220_v59 = vadd.f32 %v5159_v47, %v2090_v6 }
 0x75f   :  { %v1866_v25 = vmul.f32 1.442695, %v1863_v55 }
 0x761   :  { %4113 = vpow2.f32 %v1866_v25 }
 0x764   :  { %v2219_v57 = vpop.permute.xlu2 %2218 }
 0x765   :  { %v2092_v49 = vpop.f32.mrf.mxu3  ;;  %3651 = vmatmul.msk.bf16.vlgmr.msra.gmra.mxu0 %vm332_vm0, %v2219_v57 }
 0x766   :  { %v2347_v58 = vpop.permute.xlu1 %2346 }
 0x767   :  { %v5197_v4 = vpop.eup %4113  ;;  %v2355_v46 = vsel %vm332_vm0, %v2347_v58, 0 }
 0x768   :  { %2363 = vmatpush.bf16.xpose.msrb.mxu0 %v2355_v46  ;;  %v1871_v61 = vsel %vm1295_vm3, %v5197_v4, 0.0 }
 0x769   :  { %1872 = vadd.xlane.f32.xlu0 %v1871_v61 }
 0x76d   :  { %v2214_v60 = vpop.f32.mrf.mxu3 }
 0x76e   :  { %v2315_v53 = vpop.permute.xlu1 %2314  ;;  %v5240_v9 = vadd.f32 %v5159_v47, %v2214_v60 }
 0x770   :  { %2364 = vmatpush.bf16.xpose.msrb.mxu0 %v2352_v42  ;;  %v2246_v18 = vsel %vm1295_vm3, %v5240_v9, -inf }
 0x773   :  { %2316 = vrot.lane.b32.xlu2 %v5042_v2, %s4187_s25 }
 0x775   :  { %v2216_v48 = vpop.f32.mrf.mxu3 }
 0x776   :  { %v2471_v22 = vpop.permute.xlu1 %2470 }
 0x777   :  { %v2479_v20 = vsel %vm332_vm0, %v2471_v22, 0 }
 0x778   :  { %2487 = vmatpush.bf16.xpose.msra.mxu0 %v2479_v20 }
 0x77b   :  { %2342 = vrot.lane.b32.xlu2 %v5104_v15, %s4187_s25 }
 0x77d   :  { %2716 = vrot.lane.b32.xlu0 %v5044_v38, %s5737_s10  ;;  %v2122_v38 = vsel %vm1295_vm3, %v5220_v59, -inf }
 0x77e   :  { %v2439_v62 = vpop.permute.xlu1 %2438 }
 0x780   :  { %2488 = vmatpush.bf16.xpose.msra.mxu0 %v2476_v51 }
 0x783   :  { %2440 = vrot.lane.b32.xlu2 %v5042_v2, %s4188_s26 }
 0x786   :  { %v2595_v14 = vpop.permute.xlu1 %2594 }
 0x787   :  { %v2603_v52 = vsel %vm332_vm0, %v2595_v14, 0 }
 0x78b   :  { %2466 = vrot.lane.b32.xlu2 %v5104_v15, %s4188_s26 }
 0x78e   :  { %v2563_v33 = vpop.permute.xlu1 %2562 }
 0x793   :  { %2564 = vrot.lane.b32.xlu2 %v5042_v2, %s4189_s30 }
 0x796   :  { %v2719_v45 = vpop.permute.xlu1 %2718 }
 0x797   :  { %v2727_v6 = vsel %vm332_vm0, %v2719_v45, 0 }
 0x79b   :  { %2590 = vrot.lane.b32.xlu2 %v5104_v15, %s4189_s30 }
 0x79e   :  { %v2687_v61 = vpop.permute.xlu1 %2686 }
 0x7a3   :  { %2688 = vrot.lane.b32.xlu2 %v5042_v2, %s5737_s10 }
 0x7a7   :  { %2123 = vmax.xlane.f32.xlu0 %v2122_v38 }
 0x7ab   :  { %2714 = vrot.lane.b32.xlu2 %v5104_v15, %s5737_s10  ;;  %v2125_v15 = vsel %vm1295_vm3, %v5235_v7, -inf }
 0x7bb   :  { %2046 = vrot.lane.b32.xlu0 %v5140_v0, %s4185_s20 }
 0x7c3   :  { %2170 = vrot.lane.b32.xlu0 %v5140_v0, %s4184_s29 }
 0x7cb   :  { %2148 = vrot.lane.b32.xlu0 %v5121_v41, %s4184_s29 }
 0x7ce   :  { %v1870_v2 = vpop.xlane.xlu2 %1869 }
 0x7cf   :  { %4115 = vrcp.f32 %v1870_v2 }
 0x7d4   :  { %2126 = vmax.xlane.f32.xlu2 %v2125_v15 }
 0x7d5   :  { %v4116_v21 = vpop.eup %4115 }
 0x7d6   :  { %v1876_v23 = vmul.f32 %v4116_v21, %v4112_v37  ;;  %v2317_v63 = vpop.permute.xlu2 %2316  ;;  %v2575_v37 = vsel %vm332_vm0, %v2567_v17, 0 }
 0x7d7   :  { %v2324_v29 = vsel %vm332_vm0, %v2317_v63, 0 }
 0x7d8   :  { %v1878_v28 = vpack.c.bf16 %v1876_v23, %v1876_v23  ;;  %2336 = vmatpush.bf16.xpose.msra.mxu3 %v2324_v29 }
 0x7da   :  { %3640 = vmatmul.msk.bf16.vlgmr.msra.gmra.mxu1 %vm1295_vm3, %v1878_v28 }
 0x7dc   :  { %v1873_v16 = vpop.xlane.xlu0 %1872  ;;  %2247 = vmax.xlane.f32.xlu2 %v2246_v18 }
 0x7dd   :  { %4117 = vrcp.f32 %v1873_v16 }
 0x7de   :  { %v2343_v19 = vpop.permute.xlu2 %2342 }
 0x7df   :  { %3654 = vmatmul.msk.bf16.vlgmr.msra.gmra.mxu3 %vm332_vm0, %v2315_v53  ;;  %3655 = vmatmul.msk.bf16.vlgmr.msrb.gmra.mxu0 %vm332_vm0, %v2343_v19  ;;  %v2025_v53 = vpop.permute.xlu1 %2024 }
 0x7e0   :  { %2459 = vmatpush.bf16.xpose.msrb.mxu3 %v2451_v39  ;;  %2611 = vmatpush.bf16.xpose.msrb.mxu0 %v2603_v52 }
 0x7e1   :  { %2037 = vmatpush.bf16.msra.mxu1 %v2025_v53 }
 0x7e2   :  { %v2242_v43 = vpop.f32.mrf.mxu0 }
 0x7e3   :  { %v4118_v24 = vpop.eup %4117  ;;  %v5251_v26 = vadd.f32 %v5170_v13, %v2242_v43 }
 0x7e4   :  { %v1877_v30 = vmul.f32 %v4118_v24, %v5197_v4 }
 0x7e5   :  { %v2249_v31 = vsel %vm1295_vm3, %v5251_v26, -inf }
 0x7e6   :  { %v1879_v32 = vpack.c.bf16 %v1877_v30, %v1877_v30  ;;  %v2441_v34 = vpop.permute.xlu2 %2440  ;;  %2250 = vmax.xlane.f32.xlu1 %v2249_v31 }
 0x7e7   :  { %v2448_v35 = vsel %vm332_vm0, %v2441_v34, 0 }
 0x7e8   :  { %2612 = vmatpush.bf16.xpose.msrb.mxu0 %v2600_v12  ;;  %3641 = vmatmul.msk.bf16.vlgmr.msra.gmra.mxu2 %vm1295_vm3, %v1879_v32 }
 0x7e9   :  { %2460 = vmatpush.bf16.xpose.msrb.mxu3 %v2448_v35 }
 0x7ea   :  { %3642 = vmatmul.msk.bf16.vlgmr.msrb.gmra.mxu1 %vm332_vm0, %v5154_v10  ;;  %v2244_v54 = vpop.f32.mrf.mxu0  ;;  %v2699_v10 = vsel %vm332_vm0, %v2691_v8, 0 }
 0x7ee   :  { %v2467_v55 = vpop.permute.xlu2 %2466 }
 0x7ef   :  { %3659 = vmatmul.msk.bf16.vlgmr.msra.gmra.mxu0 %vm332_vm0, %v2467_v55  ;;  %v2717_v25 = vpop.permute.xlu0 %2716 }
 0x7f0   :  { %3658 = vmatmul.msk.bf16.vlgmr.msrb.gmra.mxu3 %vm332_vm0, %v2439_v62  ;;  %2735 = vmatpush.bf16.xpose.msra.mxu0 %v2727_v6  ;;  %v2724_v49 = vsel %vm332_vm0, %v2717_v25, 0 }
 0x7f1   :  { %2583 = vmatpush.bf16.xpose.msra.mxu3 %v2575_v37 }
 0x7f4   :  { %2044 = vrot.lane.b32.xlu2 %v5144_v1, %s4185_s20 }
 0x7f6   :  { %v2565_v57 = vpop.permute.xlu2 %2564 }
 0x7f7   :  { %v2572_v58 = vsel %vm332_vm0, %v2565_v57, 0 }
 0x7f8   :  { %2736 = vmatpush.bf16.xpose.msra.mxu0 %v2724_v49  ;;  %3643 = vmatmul.msk.bf16.vlgmr.msrb.gmra.mxu2 %vm332_vm0, %v5162_v27 }
 0x7f9   :  { %2584 = vmatpush.bf16.xpose.msra.mxu3 %v2572_v58 }
 0x7fc   :  { %2022 = vrot.lane.b32.xlu2 %v5125_v44, %s4185_s20 }
 0x7fe   :  { %v2591_v4 = vpop.permute.xlu2 %2590 }
 0x7ff   :  { %3663 = vmatmul.msk.bf16.vlgmr.msrb.gmra.mxu0 %vm332_vm0, %v2591_v4 }
 0x800   :  { %3662 = vmatmul.msk.bf16.vlgmr.msra.gmra.mxu3 %vm332_vm0, %v2563_v33 }
 0x801   :  { %2707 = vmatpush.bf16.xpose.msrb.mxu3 %v2699_v10 }
 0x804   :  { %2168 = vrot.lane.b32.xlu2 %v5144_v1, %s4184_s29 }
 0x806   :  { %v2689_v46 = vpop.permute.xlu2 %2688 }
 0x807   :  { %v2696_v11 = vsel %vm332_vm0, %v2689_v46, 0 }
 0x809   :  { %2708 = vmatpush.bf16.xpose.msrb.mxu3 %v2696_v11 }
 0x80e   :  { %v2715_v27 = vpop.permute.xlu2 %2714 }
 0x80f   :  { %3667 = vmatmul.msk.bf16.vlgmr.msra.gmra.mxu0 %vm332_vm0, %v2715_v27 }
 0x810   :  { %3666 = vmatmul.msk.bf16.vlgmr.msrb.gmra.mxu3 %vm332_vm0, %v2687_v61 }
 0x81a   :  { %v2124_v60 = vpop.xlane.xlu0 %2123 }
 0x81b   :  { %v2128_v32 = vsub.f32 %v5220_v59, %v2124_v60 }
 0x81d   :  { %v2130_v34 = vmul.f32 1.442695, %v2128_v32 }
 0x82d   :  { %v2047_v42 = vpop.permute.xlu0 %2046 }
 0x82e   :  { %2059 = vmatpush.bf16.msra.mxu2 %v2047_v42 }
 0x835   :  { %v2171_v22 = vpop.permute.xlu0 %2170 }
 0x83d   :  { %v2149_v2 = vpop.permute.xlu0 %2148 }
 0x847   :  { %v2127_v56 = vpop.xlane.xlu2 %2126 }
 0x848   :  { %v2129_v6 = vsub.f32 %v5235_v7, %v2127_v56 }
 0x84a   :  { %v2132_v49 = vmul.f32 1.442695, %v2129_v6 }
 0x84f   :  { %v2248_v48 = vpop.xlane.xlu2 %2247 }
 0x850   :  { %v2252_v18 = vsub.f32 %v5240_v9, %v2248_v48 }
 0x852   :  { %v2254_v33 = vmul.f32 1.442695, %v2252_v18 }
 0x854   :  { %4119 = vpow2.f32 %v2254_v33 }
 0x855   :  { %4121 = vpow2.f32 %v2130_v34 }
 0x856   :  { %4123 = vpow2.f32 %v2132_v49 }
 0x857   :  { %v2045_v20 = vpop.permute.xlu2 %2044  ;;  %v5281_v50 = vpop.f32.mrf.mxu1 }
 0x858   :  { %2060 = vmatpush.bf16.msra.mxu2 %v2045_v20 }
 0x859   :  { %v2251_v11 = vpop.xlane.xlu1 %2250 }
 0x85a   :  { %v5307_v12 = vpop.eup %4119  ;;  %v2253_v53 = vsub.f32 %v5251_v26, %v2251_v11 }
 0x85b   :  { %v2258_v59 = vsel %vm1295_vm3, %v5307_v12, 0.0  ;;  %v5322_v4 = vpop.eup %4121 }
 0x85c   :  { %2183 = vmatpush.bf16.msrb.mxu2 %v2171_v22  ;;  %v2366_v51 = vpop.f32.mrf.mxu0  ;;  %v2134_v7 = vsel %vm1295_vm3, %v5322_v4, 0.0  ;;  %v5326_v61 = vpop.eup %4123  ;;  %v2256_v56 = vmul.f32 1.442695, %v2253_v53 }
 0x85d   :  { %v5284_v38 = vadd.f32 %v5170_v13, %v2366_v51  ;;  %v2137_v42 = vsel %vm1295_vm3, %v5326_v61, 0.0 }
 0x85e   :  { %4125 = vpow2.f32 %v2256_v56 }
 0x85f   :  { %v2023_v17 = vpop.permute.xlu2 %2022  ;;  %v1906_v5 = vpop.f32.mrf.mxu1  ;;  %v2373_v62 = vsel %vm1295_vm3, %v5284_v38, -inf }
 0x860   :  { %2374 = vmax.xlane.f32.xlu0 %v2373_v62  ;;  %2038 = vmatpush.bf16.msra.mxu1 %v2023_v17 }
 0x862   :  { %v2338_v15 = vpop.f32.mrf.mxu3 }
 0x863   :  { %v5289_v8 = vadd.f32 %v5159_v47, %v2338_v15 }
 0x864   :  { %2161 = vmatpush.bf16.msrb.mxu1 %v2149_v2  ;;  %v2368_v21 = vpop.f32.mrf.mxu0  ;;  %v5335_v5 = vpop.eup %4125 }
 0x865   :  { %v2370_v23 = vsel %vm1295_vm3, %v5289_v8, -inf  ;;  %v2261_v26 = vsel %vm1295_vm3, %v5335_v5, 0.0 }
 0x866   :  { %2371 = vmax.xlane.f32.xlu2 %v2370_v23 }
 0x867   :  { %v2169_v63 = vpop.permute.xlu2 %2168  ;;  %v1963_v29 = vpop.f32.mrf.mxu1 }
 0x868   :  { %2184 = vmatpush.bf16.msrb.mxu2 %v2169_v63  ;;  %v1964_v48 = vadd.f32 %v5159_v47, %v1963_v29 }
 0x86a   :  { %v2340_v39 = vpop.f32.mrf.mxu3  ;;  %v1998_v51 = vsel %vm1295_vm3, %v1964_v48, -inf }
 0x86b   :  { %v5293_v14 = vpop.f32.mrf.mxu2 }
 0x86c   :  { %v2490_v28 = vpop.f32.mrf.mxu0 }
 0x86d   :  { %v5297_v16 = vadd.f32 %v5170_v13, %v2490_v28 }
 0x86f   :  { %v1965_v19 = vpop.f32.mrf.mxu1  ;;  %v2497_v52 = vsel %vm1295_vm3, %v5297_v16, -inf }
 0x870   :  { %2498 = vmax.xlane.f32.xlu0 %v2497_v52 }
 0x873   :  { %v2462_v43 = vpop.f32.mrf.mxu3  ;;  %v1934_v24 = vpop.f32.mrf.mxu2 }
 0x874   :  { %v5302_v30 = vadd.f32 %v5159_v47, %v2462_v43  ;;  %v2492_v31 = vpop.f32.mrf.mxu0 }
 0x876   :  { %v2494_v9 = vsel %vm1295_vm3, %v5302_v30, -inf }
 0x877   :  { %2495 = vmax.xlane.f32.xlu2 %v2494_v9 }
 0x87b   :  { %v2464_v35 = vpop.f32.mrf.mxu3  ;;  %v1994_v37 = vpop.f32.mrf.mxu2 }
 0x87c   :  { %v5310_v54 = vadd.f32 %v5170_v13, %v1994_v37  ;;  %v2614_v45 = vpop.f32.mrf.mxu0 }
 0x87d   :  { %v5313_v55 = vadd.f32 %v5170_v13, %v2614_v45 }
 0x87e   :  { %v2001_v25 = vsel %vm1295_vm3, %v5310_v54, -inf }
 0x87f   :  { %2259 = vadd.xlane.f32.xlu2 %v2258_v59  ;;  %2002 = vmax.xlane.f32.xlu0 %v2001_v25  ;;  %v2621_v57 = vsel %vm1295_vm3, %v5313_v55, -inf }
 0x880   :  { %2622 = vmax.xlane.f32.xlu1 %v2621_v57 }
 0x883   :  { %v2586_v58 = vpop.f32.mrf.mxu3  ;;  %v1996_v10 = vpop.f32.mrf.mxu2 }
 0x884   :  { %v2616_v46 = vpop.f32.mrf.mxu0  ;;  %v5340_v62 = vadd.f32 %v5159_v47, %v2586_v58 }
 0x886   :  { %v2618_v2 = vsel %vm1295_vm3, %v5340_v62, -inf }
 0x888   :  { %2135 = vadd.xlane.f32.xlu1 %v2134_v7 }
 0x88b   :  { %v2588_v27 = vpop.f32.mrf.mxu3 }
 0x88c   :  { %v2738_v60 = vpop.f32.mrf.mxu0 }
 0x88d   :  { %v5347_v15 = vadd.f32 %v5170_v13, %v2738_v60 }
 0x88f   :  { %v2745_v21 = vsel %vm1295_vm3, %v5347_v15, -inf }
 0x890   :  { %2138 = vadd.xlane.f32.xlu1 %v2137_v42 }
 0x893   :  { %v2710_v22 = vpop.f32.mrf.mxu3  ;;  %2146 = vrot.lane.b32.xlu0 %v5125_v44, %s4184_s29 }
 0x894   :  { %v2740_v20 = vpop.f32.mrf.mxu0  ;;  %v5354_v23 = vadd.f32 %v5159_v47, %v2710_v22 }
 0x896   :  { %v2742_v63 = vsel %vm1295_vm3, %v5354_v23, -inf }
 0x898   :  { %1999 = vmax.xlane.f32.xlu1 %v1998_v51 }
 0x89b   :  { %v2712_v17 = vpop.f32.mrf.mxu3 }
 0x8a0   :  { %2262 = vadd.xlane.f32.xlu1 %v2261_v26 }
 0x8b9   :  { %2294 = vrot.lane.b32.xlu1 %v5140_v0, %s4186_s24 }
 0x8bd   :  { %2619 = vmax.xlane.f32.xlu0 %v2618_v2 }
 0x8c1   :  { %2292 = vrot.lane.b32.xlu1 %v5144_v1, %s4186_s24 }
 0x8c5   :  { %2746 = vmax.xlane.f32.xlu0 %v2745_v21 }
 0x8c9   :  { %2272 = vrot.lane.b32.xlu1 %v5121_v41, %s4186_s24 }
 0x8cd   :  { %2743 = vmax.xlane.f32.xlu0 %v2742_v63 }
 0x8d1   :  { %2270 = vrot.lane.b32.xlu1 %v5125_v44, %s4186_s24 }
 0x8d3   :  { %v2375_v13 = vpop.xlane.xlu0 %2374 }
 0x8d4   :  { %v2377_v29 = vsub.f32 %v5284_v38, %v2375_v13 }
 0x8d6   :  { %v2380_v39 = vmul.f32 1.442695, %v2377_v29 }
 0x8d8   :  { %4127 = vpow2.f32 %v2380_v39 }
 0x8d9   :  { %v2372_v28 = vpop.xlane.xlu2 %2371  ;;  %2418 = vrot.lane.b32.xlu1 %v5140_v0, %s4187_s25 }
 0x8da   :  { %v2376_v47 = vsub.f32 %v5289_v8, %v2372_v28 }
 0x8dc   :  { %v2378_v18 = vmul.f32 1.442695, %v2376_v47 }
 0x8de   :  { %v5366_v19 = vpop.eup %4127  ;;  %4129 = vpow2.f32 %v2378_v18 }
 0x8df   :  { %v2385_v52 = vsel %vm1295_vm3, %v5366_v19, 0.0 }
 0x8e0   :  { %2386 = vadd.xlane.f32.xlu2 %v2385_v52 }
 0x8e1   :  { %2416 = vrot.lane.b32.xlu0 %v5144_v1, %s4187_s25 }
 0x8e3   :  { %v2499_v43 = vpop.xlane.xlu0 %2498 }
 0x8e4   :  { %v5372_v38 = vpop.eup %4129  ;;  %v2501_v51 = vsub.f32 %v5297_v16, %v2499_v43 }
 0x8e5   :  { %v2382_v33 = vsel %vm1295_vm3, %v5372_v38, 0.0 }
 0x8e8   :  { %2383 = vadd.xlane.f32.xlu2 %v2382_v33 }
 0x8e9   :  { %2542 = vrot.lane.b32.xlu0 %v5140_v0, %s4188_s26 }
 0x8ea   :  { %v2496_v32 = vpop.xlane.xlu2 %2495 }
 0x8eb   :  { %v2500_v9 = vsub.f32 %v5302_v30, %v2496_v32 }
 0x8ed   :  { %v2502_v35 = vmul.f32 1.442695, %v2500_v9 }
 0x8ef   :  { %4131 = vpow2.f32 %v2502_v35 }
 0x8f2   :  { %v2003_v31 = vpop.xlane.xlu0 %2002  ;;  %v2260_v18 = vpop.xlane.xlu2 %2259 }
 0x8f3   :  { %v2623_v8 = vpop.xlane.xlu1 %2622  ;;  %v2005_v59 = vsub.f32 %v5310_v54, %v2003_v31 }
 0x8f4   :  { %v2625_v26 = vsub.f32 %v5313_v55, %v2623_v8 }
 0x8f5   :  { %v5388_v57 = vpop.eup %4131  ;;  %v2008_v30 = vmul.f32 1.442695, %v2005_v59 }
 0x8f6   :  { %v2506_v49 = vsel %vm1295_vm3, %v5388_v57, 0.0 }
 0x8fb   :  { %v5378_v24 = vpop.xlane.xlu1 %2135 }
 0x900   :  { %2394 = vrot.lane.b32.xlu2 %v5125_v44, %s4187_s25 }
 0x903   :  { %v5383_v34 = vpop.xlane.xlu1 %2138 }
 0x905   :  { %v2147_v37 = vpop.permute.xlu0 %2146 }
 0x906   :  { %2162 = vmatpush.bf16.msrb.mxu1 %v2147_v37 }
 0x908   :  { %2540 = vrot.lane.b32.xlu2 %v5144_v1, %s4188_s26 }
 0x90b   :  { %v2000_v45 = vpop.xlane.xlu1 %1999 }
 0x90c   :  { %v2004_v6 = vsub.f32 %v1964_v48, %v2000_v45 }
 0x90e   :  { %v2006_v25 = vmul.f32 1.442695, %v2004_v6 }
 0x910   :  { %4133 = vpow2.f32 %v2006_v25  ;;  %2520 = vrot.lane.b32.xlu2 %v5121_v41, %s4188_s26 }
 0x911   :  { %4135 = vpow2.f32 %v2008_v30 }
 0x913   :  { %2507 = vadd.xlane.f32.xlu0 %v2506_v49  ;;  %v2263_v17 = vpop.xlane.xlu1 %2262 }
 0x916   :  { %v4134_v58 = vpop.eup %4133 }
 0x917   :  { %v2010_v10 = vsel %vm1295_vm3, %v4134_v58, 0.0  ;;  %v5397_v54 = vpop.eup %4135 }
 0x918   :  { %2518 = vrot.lane.b32.xlu2 %v5125_v44, %s4188_s26  ;;  %2011 = vadd.xlane.f32.xlu1 %v2010_v10  ;;  %v2013_v46 = vsel %vm1295_vm3, %v5397_v54, 0.0 }
 0x920   :  { %2666 = vrot.lane.b32.xlu2 %v5140_v0, %s4189_s30  ;;  %2014 = vadd.xlane.f32.xlu1 %v2013_v46 }
 0x928   :  { %2664 = vrot.lane.b32.xlu2 %v5144_v1, %s4189_s30 }
 0x92b   :  { %v2295_v2 = vpop.permute.xlu1 %2294 }
 0x930   :  { %v2620_v7 = vpop.xlane.xlu0 %2619  ;;  %2642 = vrot.lane.b32.xlu2 %v5125_v44, %s4189_s30 }
 0x933   :  { %v2293_v13 = vpop.permute.xlu1 %2292 }
 0x938   :  { %v2747_v11 = vpop.xlane.xlu0 %2746  ;;  %2790 = vrot.lane.b32.xlu2 %v5140_v0, %s5737_s10 }
 0x939   :  { %v2749_v27 = vsub.f32 %v5347_v15, %v2747_v11  ;;  %2396 = vrot.lane.b32.xlu1 %v5121_v41, %s4187_s25  ;;  %v2628_v15 = vmul.f32 1.442695, %v2625_v26 }
 0x93b   :  { %v2752_v60 = vmul.f32 1.442695, %v2749_v27  ;;  %v2273_v28 = vpop.permute.xlu1 %2272 }
 0x93d   :  { %4137 = vpow2.f32 %v2752_v60 }
 0x940   :  { %v2744_v53 = vpop.xlane.xlu0 %2743  ;;  %2788 = vrot.lane.b32.xlu2 %v5144_v1, %s5737_s10  ;;  %v2504_v1 = vmul.f32 1.442695, %v2501_v51 }
 0x941   :  { %v2748_v42 = vsub.f32 %v5354_v23, %v2744_v53  ;;  %v2624_v23 = vsub.f32 %v5340_v62, %v2620_v7 }
 0x943   :  { %v5415_v56 = vpop.eup %4137  ;;  %v2750_v48 = vmul.f32 1.442695, %v2748_v42  ;;  %v2626_v16 = vmul.f32 1.442695, %v2624_v23  ;;  %v2271_v47 = vpop.permute.xlu1 %2270 }
 0x944   :  { %v2757_v22 = vsel %vm1295_vm3, %v5415_v56, 0.0 }
 0x945   :  { %4139 = vpow2.f32 %v2750_v48  ;;  %2758 = vadd.xlane.f32.xlu0 %v2757_v22 }
 0x946   :  { %4141 = vpow2.f32 %v2504_v1 }
 0x947   :  { %4143 = vpow2.f32 %v2628_v15 }
 0x948   :  { %4145 = vpow2.f32 %v2626_v16 }
 0x94b   :  { %v5419_v0 = vpop.eup %4139  ;;  %v2419_v33 = vpop.permute.xlu1 %2418 }
 0x94c   :  { %v2754_v20 = vsel %vm1295_vm3, %v5419_v0, 0.0  ;;  %v5425_v21 = vpop.eup %4141 }
 0x94d   :  { %2755 = vadd.xlane.f32.xlu0 %v2754_v20  ;;  %v2509_v63 = vsel %vm1295_vm3, %v5425_v21, 0.0  ;;  %v5432_v29 = vpop.eup %4143 }
 0x94e   :  { %v2633_v55 = vsel %vm1295_vm3, %v5432_v29, 0.0  ;;  %v5436_v39 = vpop.eup %4145 }
 0x94f   :  { %v2630_v62 = vsel %vm1295_vm3, %v5436_v39, 0.0 }
 0x953   :  { %v2387_v52 = vpop.xlane.xlu2 %2386 }
 0x95b   :  { %v2384_v43 = vpop.xlane.xlu2 %2383 }
 0x961   :  { %2768 = vrot.lane.b32.xlu0 %v5121_v41, %s5737_s10 }
 0x963   :  { %2510 = vadd.xlane.f32.xlu1 %v2509_v63  ;;  %v2395_v37 = vpop.permute.xlu2 %2394 }
 0x96b   :  { %2634 = vadd.xlane.f32.xlu1 %v2633_v55  ;;  %v2541_v25 = vpop.permute.xlu2 %2540 }
 0x973   :  { %2631 = vadd.xlane.f32.xlu1 %v2630_v62 }
 0x98b   :  { %v2012_v8 = vpop.xlane.xlu1 %2011 }
 0x98c   :  { %4147 = vrcp.f32 %v2012_v8  ;;  %2644 = vrot.lane.b32.xlu1 %v5121_v41, %s4189_s30 }
 0x992   :  { %v4148_v31 = vpop.eup %4147 }
 0x993   :  { %v2018_v32 = vmul.f32 %v4148_v31, %v4134_v58  ;;  %v2015_v9 = vpop.xlane.xlu1 %2014  ;;  %v2521_v58 = vpop.permute.xlu2 %2520 }
 0x994   :  { %4149 = vrcp.f32 %v2015_v9  ;;  %2766 = vrot.lane.b32.xlu1 %v5125_v44, %s5737_s10 }
 0x995   :  { %v2020_v35 = vpack.c.bf16 %v2018_v32, %v2018_v32  ;;  %4151 = vrcp.f32 %v5378_v24 }
 0x996   :  { %4153 = vrcp.f32 %v5383_v34  ;;  %v2417_v34 = vpop.permute.xlu0 %2416 }
 0x997   :  { %3644 = vmatmul.msk.bf16.vlgmr.msra.gmra.mxu1 %vm1295_vm3, %v2020_v35  ;;  %4155 = vrcp.f32 %v2260_v18 }
 0x998   :  { %2285 = vmatpush.bf16.msra.mxu1 %v2273_v28  ;;  %4157 = vrcp.f32 %v2263_v17 }
 0x999   :  { %4159 = vrcp.f32 %v2384_v43 }
 0x99a   :  { %v4150_v45 = vpop.eup %4149  ;;  %4161 = vrcp.f32 %v2387_v52 }
 0x99b   :  { %v2019_v6 = vmul.f32 %v4150_v45, %v5397_v54  ;;  %v4152_v41 = vpop.eup %4151  ;;  %v2519_v7 = vpop.permute.xlu2 %2518 }
 0x99c   :  { %2286 = vmatpush.bf16.msra.mxu1 %v2271_v47  ;;  %v2142_v44 = vmul.f32 %v4152_v41, %v5322_v4  ;;  %v4154_v49 = vpop.eup %4153 }
 0x99d   :  { %v2021_v59 = vpack.c.bf16 %v2019_v6, %v2019_v6  ;;  %v2143_v24 = vmul.f32 %v4154_v49, %v5326_v61  ;;  %v4156_v46 = vpop.eup %4155 }
 0x99e   :  { %v2144_v30 = vpack.c.bf16 %v2142_v44, %v2142_v44  ;;  %v2266_v4 = vmul.f32 %v4156_v46, %v5307_v12  ;;  %v4158_v27 = vpop.eup %4157  ;;  %v2543_v53 = vpop.permute.xlu0 %2542 }
 0x99f   :  { %3645 = vmatmul.msk.bf16.vlgmr.msra.gmra.mxu2 %vm1295_vm3, %v2021_v59  ;;  %v2145_v54 = vpack.c.bf16 %v2143_v24, %v2143_v24  ;;  %v2267_v61 = vmul.f32 %v4158_v27, %v5335_v5  ;;  %v4160_v42 = vpop.eup %4159 }
 0x9a0   :  { %2307 = vmatpush.bf16.msra.mxu2 %v2295_v2  ;;  %v2268_v11 = vpack.c.bf16 %v2266_v4, %v2266_v4  ;;  %v2390_v12 = vmul.f32 %v4160_v42, %v5372_v38  ;;  %v4162_v51 = vpop.eup %4161 }
 0x9a1   :  { %v2269_v60 = vpack.c.bf16 %v2267_v61, %v2267_v61  ;;  %v2391_v5 = vmul.f32 %v4162_v51, %v5366_v19 }
 0x9a2   :  { %v2392_v22 = vpack.c.bf16 %v2390_v12, %v2390_v12 }
 0x9a3   :  { %v2667_v48 = vpop.permute.xlu2 %2666  ;;  %v2393_v1 = vpack.c.bf16 %v2391_v5, %v2391_v5 }
 0x9a4   :  { %2308 = vmatpush.bf16.msra.mxu2 %v2293_v13 }
 0x9a6   :  { %v2508_v20 = vpop.xlane.xlu0 %2507 }
 0x9a7   :  { %3648 = vmatmul.msk.bf16.vlgmr.msrb.gmra.mxu1 %vm1295_vm3, %v2144_v30  ;;  %4163 = vrcp.f32 %v2508_v20 }
 0x9ab   :  { %v2397_v10 = vpop.permute.xlu1 %2396  ;;  %v2665_v17 = vpop.permute.xlu2 %2664 }
 0x9ac   :  { %2409 = vmatpush.bf16.msrb.mxu1 %v2397_v10 }
 0x9ad   :  { %v4164_v26 = vpop.eup %4163 }
 0x9ae   :  { %v2514_v2 = vmul.f32 %v4164_v26, %v5388_v57 }
 0x9af   :  { %3649 = vmatmul.msk.bf16.vlgmr.msrb.gmra.mxu2 %vm1295_vm3, %v2145_v54 }
 0x9b0   :  { %2431 = vmatpush.bf16.msrb.mxu2 %v2419_v33  ;;  %2410 = vmatpush.bf16.msrb.mxu1 %v2395_v37  ;;  %v2516_v38 = vpack.c.bf16 %v2514_v2, %v2514_v2 }
 0x9b3   :  { %v2643_v15 = vpop.permute.xlu2 %2642 }
 0x9b4   :  { %2432 = vmatpush.bf16.msrb.mxu2 %v2417_v34 }
 0x9b7   :  { %3652 = vmatmul.msk.bf16.vlgmr.msra.gmra.mxu1 %vm1295_vm3, %v2268_v11 }
 0x9b8   :  { %2533 = vmatpush.bf16.msra.mxu1 %v2521_v58  ;;  %v2759_v47 = vpop.xlane.xlu0 %2758 }
 0x9bb   :  { %v2791_v63 = vpop.permute.xlu2 %2790 }
 0x9bc   :  { %2534 = vmatpush.bf16.msra.mxu1 %v2519_v7 }
 0x9bf   :  { %3653 = vmatmul.msk.bf16.vlgmr.msra.gmra.mxu2 %vm1295_vm3, %v2269_v60 }
 0x9c0   :  { %2555 = vmatpush.bf16.msra.mxu2 %v2543_v53 }
 0x9c3   :  { %v2789_v28 = vpop.permute.xlu2 %2788 }
 0x9c4   :  { %2556 = vmatpush.bf16.msra.mxu2 %v2541_v25 }
 0x9c7   :  { %3656 = vmatmul.msk.bf16.vlgmr.msrb.gmra.mxu1 %vm1295_vm3, %v2392_v22 }
 0x9cf   :  { %3657 = vmatmul.msk.bf16.vlgmr.msrb.gmra.mxu2 %vm1295_vm3, %v2393_v1 }
 0x9d0   :  { %2679 = vmatpush.bf16.msrb.mxu2 %v2667_v48 }
 0x9d4   :  { %2680 = vmatpush.bf16.msrb.mxu2 %v2665_v17 }
 0x9d6   :  { %v2511_v23 = vpop.xlane.xlu1 %2510 }
 0x9d7   :  { %4165 = vrcp.f32 %v2511_v23  ;;  %3660 = vmatmul.msk.bf16.vlgmr.msra.gmra.mxu1 %vm1295_vm3, %v2516_v38 }
 0x9dd   :  { %v4166_v16 = vpop.eup %4165 }
 0x9de   :  { %v2515_v13 = vmul.f32 %v4166_v16, %v5425_v21  ;;  %v2635_v19 = vpop.xlane.xlu1 %2634  ;;  %v2756_v21 = vpop.xlane.xlu0 %2755  ;;  %v3897_v16 = vld [vmem:[%s5721_s11 + $0x30] sm:$0xff] }
 0x9df   :  { %4167 = vrcp.f32 %v2635_v19  ;;  %v3894_v19 = vld [vmem:[%s5721_s11 + $0x18] sm:$0xff] }
 0x9e0   :  { %v2517_v55 = vpack.c.bf16 %v2515_v13, %v2515_v13  ;;  %4169 = vrcp.f32 %v2759_v47  ;;  %v3896_v13 = vld [vmem:[%s5721_s11 + $0x28] sm:$0xff] }
 0x9e2   :  { %3661 = vmatmul.msk.bf16.vlgmr.msra.gmra.mxu2 %vm1295_vm3, %v2517_v55  ;;  %v3895_v55 = vld [vmem:[%s5721_s11 + $0x20] sm:$0xff] }
 0x9e3   :  { %2803 = vmatpush.bf16.msra.mxu2 %v2791_v63  ;;  %v3898_v63 = vld [vmem:[%s5721_s11 + $0x38] sm:$0xff] }
 0x9e4   :  { %2949 = vmatpush.bf16.msra.mxu3 %v3898_v63  ;;  %v3762_v63 = vld [vmem:[%s5722_s13 + $0x78] sm:$0xf0] }
 0x9e5   :  { %v4168_v57 = vpop.eup %4167 }
 0x9e6   :  { %v2639_v62 = vmul.f32 %v4168_v57, %v5432_v29  ;;  %v2632_v52 = vpop.xlane.xlu1 %2631  ;;  %v4170_v33 = vpop.eup %4169  ;;  %v3892_v57 = vld [vmem:[%s5721_s11 + $0x8] sm:$0xff] }
 0x9e7   :  { %2804 = vmatpush.bf16.msra.mxu2 %v2789_v28  ;;  %4171 = vrcp.f32 %v2632_v52  ;;  %v2763_v8 = vmul.f32 %v4170_v33, %v5415_v56  ;;  %v2769_v29 = vpop.permute.xlu0 %2768  ;;  %v3893_v28 = vld [vmem:[%s5721_s11 + $0x10] sm:$0xff] }
 0x9e8   :  { %v2641_v18 = vpack.c.bf16 %v2639_v62, %v2639_v62  ;;  %4173 = vrcp.f32 %v2756_v21  ;;  %2950 = vmatpush.bf16.msra.mxu3 %v3897_v16  ;;  %v3891_v62 = vld [vmem:[%s5721_s11] sm:$0xff] }
 0x9e9   :  { %v2765_v32 = vpack.c.bf16 %v2763_v8, %v2763_v8 }
 0x9ec   :  { %2951 = vmatpush.bf16.msra.mxu3 %v3896_v13  ;;  %v3752_v13 = vld [vmem:[%s5722_s13 + $0x60] sm:$0xf] }
 0x9ed   :  { %v4172_v43 = vpop.eup %4171 }
 0x9ee   :  { %v2638_v9 = vmul.f32 %v4172_v43, %v5436_v39  ;;  %v4174_v45 = vpop.eup %4173 }
 0x9ef   :  { %v2762_v56 = vmul.f32 %v4174_v45, %v5419_v0 }
 0x9f0   :  { %v2640_v35 = vpack.c.bf16 %v2638_v9, %v2638_v9  ;;  %2952 = vmatpush.bf16.msra.mxu3 %v3895_v55  ;;  %v3912_v55 = vld [vmem:[%s5722_s13 + $0x64] sm:$0xf0] }
 0x9f1   :  { %v2764_v6 = vpack.c.bf16 %v2762_v56, %v2762_v56 }
 0x9f2   :  { %3665 = vmatmul.msk.bf16.vlgmr.msrb.gmra.mxu2 %vm1295_vm3, %v2641_v18 }
 0x9f4   :  { %2953 = vmatpush.bf16.msra.mxu3 %v3894_v19  ;;  %v3911_v19 = vld [vmem:[%s5722_s13 + $0x64] sm:$0xf] }
 0x9f8   :  { %2954 = vmatpush.bf16.msra.mxu3 %v3893_v28  ;;  %v3753_v28 = vor.u32 %v3912_v55, %v3752_v13 }
 0x9fc   :  { %2955 = vmatpush.bf16.msra.mxu3 %v3892_v57  ;;  %v3754_v57 = vld [vmem:[%s5722_s13 + $0x68] sm:$0xf0] }
 0x9fe   :  { %v2645_v31 = vpop.permute.xlu1 %2644 }
 0x9ff   :  { %2657 = vmatpush.bf16.msrb.mxu1 %v2645_v31 }
 0xa00   :  { %2956 = vmatpush.bf16.msra.mxu3 %v3891_v62  ;;  %v3757_v62 = vor.u32 %v3911_v19, %v3754_v57 }
 0xa02   :  { %3669 = vmatmul.msk.bf16.vlgmr.msra.gmra.mxu2 %vm1295_vm3, %v2765_v32 }
 0xa03   :  { %2658 = vmatpush.bf16.msrb.mxu1 %v2643_v15 }
 0xa06   :  { %3664 = vmatmul.msk.bf16.vlgmr.msrb.gmra.mxu1 %vm1295_vm3, %v2640_v35  ;;  %v2767_v37 = vpop.permute.xlu1 %2766 }
 0xa07   :  { %2781 = vmatpush.bf16.msra.mxu1 %v2769_v29 }
 0xa0b   :  { %2782 = vmatpush.bf16.msra.mxu1 %v2767_v37 }
 0xa14   :  { %v2040_v59 = vpop.f32.mrf.mxu1 }
 0xa16   :  { %3668 = vmatmul.msk.bf16.vlgmr.msra.gmra.mxu1 %vm1295_vm3, %v2764_v6 }
 0xa1c   :  { %v2042_v41 = vpop.f32.mrf.mxu1 }
 0xa22   :  { %v2062_v39 = vpop.f32.mrf.mxu2 }
 0xa23   :  { %v3997_v25 = vpack.i.bf16 %v2062_v39, %v2040_v59 }
 0xa24   :  { %v2164_v44 = vpop.f32.mrf.mxu1 }
 0xa25   :  { %3998 = vrot.lane.b32.xlu2 %v3997_v25, %s5737_s10 }
 0xa2a   :  { %v2064_v30 = vpop.f32.mrf.mxu2 }
 0xa2c   :  { %v2166_v49 = vpop.f32.mrf.mxu1 }
 0xa32   :  { %v2186_v24 = vpop.f32.mrf.mxu2 }
 0xa33   :  { %v4002_v58 = vpack.i.bf16 %v2186_v24, %v2164_v44 }
 0xa34   :  { %v2288_v10 = vpop.f32.mrf.mxu1 }
 0xa35   :  { %4003 = vrot.lane.b32.xlu1 %v4002_v58, %s4189_s30 }
 0xa3a   :  { %v2188_v54 = vpop.f32.mrf.mxu2 }
 0xa3c   :  { %v2290_v46 = vpop.f32.mrf.mxu1 }
 0xa42   :  { %v2310_v0 = vpop.f32.mrf.mxu2 }
 0xa43   :  { %v4007_v4 = vpack.i.bf16 %v2310_v0, %v2288_v10 }
 0xa44   :  { %v2412_v34 = vpop.f32.mrf.mxu1 }
 0xa45   :  { %4008 = vrot.lane.b32.xlu2 %v4007_v4, %s4188_s26 }
 0xa4a   :  { %v2312_v7 = vpop.f32.mrf.mxu2 }
 0xa4c   :  { %v2414_v11 = vpop.f32.mrf.mxu1 }
 0xa52   :  { %v2434_v27 = vpop.f32.mrf.mxu2 }
 0xa53   :  { %v4012_v61 = vpack.i.bf16 %v2434_v27, %v2412_v34 }
 0xa54   :  { %v2536_v60 = vpop.f32.mrf.mxu1 }
 0xa55   :  { %4013 = vrot.lane.b32.xlu0 %v4012_v61, %s4187_s25  ;;  %v4039_v61 = vld [vmem:[%s5720_s12] ss:$0 sm:$0xff] }
 0xa5a   :  { %v2436_v53 = vpop.f32.mrf.mxu2 }
 0xa5c   :  { %v2538_v42 = vpop.f32.mrf.mxu1 }
 0xa65   :  { %v2558_v48 = vpop.f32.mrf.mxu2 }
 0xa66   :  { %v4017_v12 = vpack.i.bf16 %v2558_v48, %v2536_v60 }
 0xa68   :  { %4018 = vrot.lane.b32.xlu1 %v4017_v12, %s4186_s24 }
 0xa6d   :  { %v2560_v22 = vpop.f32.mrf.mxu2 }
 0xa75   :  { %v2682_v20 = vpop.f32.mrf.mxu2 }
 0xa7d   :  { %v2684_v51 = vpop.f32.mrf.mxu2 }
 0xa7f   :  { %v3999_v47 = vpop.permute.xlu2 %3998 }
 0xa80   :  { %v4001_v33 = vunpack.i.h.bf16 %v3999_v47  ;;  %v4000_v21 = vunpack.i.l.bf16 %v3999_v47  ;;  %v3744_v47 = vld [vmem:[%s5722_s13 + $0x50] sm:$0xf] }
 0xa82   :  { %v2867_v9 = vsel %vm332_vm0, %v5293_v14, %v4001_v33  ;;  %v2866_v29 = vsel %vm332_vm0, %v5281_v50, %v4000_v21  ;;  %v3746_v21 = vld [vmem:[%s5722_s13 + $0x58] sm:$0xf0] }
 0xa83   :  { %v2660_v17 = vpop.f32.mrf.mxu1 }
 0xa84   :  { %v4022_v5 = vpack.i.bf16 %v2682_v20, %v2660_v17 }
 0xa85   :  { %v2806_v1 = vpop.f32.mrf.mxu2 }
 0xa86   :  { %4023 = vrot.lane.b32.xlu2 %v4022_v5, %s4184_s29 }
 0xa8b   :  { %v2662_v26 = vpop.f32.mrf.mxu1 }
 0xa8d   :  { %v2808_v2 = vpop.f32.mrf.mxu2 }
 0xa93   :  { %v2784_v15 = vpop.f32.mrf.mxu1 }
 0xa94   :  { %v4027_v38 = vpack.i.bf16 %v2806_v1, %v2784_v15  ;;  %v3914_v15 = vld [vmem:[%s5722_s13 + $0x74] sm:$0xf0] }
 0xa96   :  { %4028 = vrot.lane.b32.xlu0 %v4027_v38, %s4185_s20  ;;  %v3913_v38 = vld [vmem:[%s5722_s13 + $0x74] sm:$0xf] }
 0xa97   :  { %v3765_v16 = vor.u32 %v3913_v38, %v3762_v63  ;;  %v3927_v63 = vld [vmem:[%s5723_s15 + $0x60] sm:$0xff] }
 0xa99   :  { %3128 = vmatpush.bf16.msrb.mxu1 %v3765_v16 }
 0xa9b   :  { %v2786_v23 = vpop.f32.mrf.mxu1 }
 0xa9d   :  { %3129 = vmatpush.bf16.msrb.mxu1 %v3757_v62 }
 0xa9f   :  { %v4009_v52 = vpop.permute.xlu2 %4008 }
 0xaa0   :  { %v4011_v59 = vunpack.i.h.bf16 %v4009_v52  ;;  %v4010_v41 = vunpack.i.l.bf16 %v4009_v52  ;;  %v3909_v52 = vld [vmem:[%s5722_s13 + $0x54] sm:$0xf] }
 0xaa7   :  { %v4004_v18 = vpop.permute.xlu1 %4003 }
 0xaa8   :  { %v4006_v8 = vunpack.i.h.bf16 %v4004_v18  ;;  %v4005_v43 = vunpack.i.l.bf16 %v4004_v18  ;;  %v3910_v18 = vld [vmem:[%s5722_s13 + $0x54] sm:$0xf0] }
 0xaa9   :  { %v3745_v33 = vor.u32 %v3910_v18, %v3744_v47  ;;  %v5660_v18 = vld [vmem:[%s5718_s17] sm:$0x3f] }
 0xaaa   :  { %v2869_v37 = vsel %vm1295_vm3, %v2867_v9, %v4006_v8  ;;  %v2868_v45 = vsel %vm1295_vm3, %v2866_v29, %v4005_v43  ;;  %v3749_v8 = vor.u32 %v3909_v52, %v3746_v21  ;;  %v3736_v43 = vld [vmem:[%s5722_s13 + $0x40] sm:$0xf]  ;;  %v3738_v29 = vld [vmem:[%s5722_s13 + $0x48] sm:$0xf0]  ;;  %v3005_v52 = vperm.slane %v5660_v18, 2 }
 0xaab   :  { %v2870_v49 = vsel %vm1298_vm4, %v2868_v45, %v4010_v41  ;;  %v2871_v14 = vsel %vm1298_vm4, %v2869_v37, %v4011_v59  ;;  %v3728_v37 = vld [vmem:[%s5722_s13 + $0x30] sm:$0xf]  ;;  %v3906_v45 = vld [vmem:[%s5722_s13 + $0x34] sm:$0xf0]  ;;  %v3730_v59 = vld [vmem:[%s5722_s13 + $0x38] sm:$0xf0] }
 0xaac   :  { %3130 = vmatpush.bf16.msrb.mxu1 %v3749_v8 }
 0xac7   :  { %v4014_v31 = vpop.permute.xlu0 %4013 }
 0xac8   :  { %v4016_v56 = vunpack.i.h.bf16 %v4014_v31  ;;  %v4015_v6 = vunpack.i.l.bf16 %v4014_v31  ;;  %v3908_v31 = vld [vmem:[%s5722_s13 + $0x44] sm:$0xf0] }
 0xac9   :  { %v3737_v9 = vor.u32 %v3908_v31, %v3736_v43  ;;  %v3008_v43 = vperm.slane %v5660_v18, 3 }
 0xaca   :  { %v2872_v24 = vsel %vm1301_vm5, %v2870_v49, %v4015_v6  ;;  %v2873_v50 = vsel %vm1301_vm5, %v2871_v14, %v4016_v56  ;;  %v3905_v56 = vld [vmem:[%s5722_s13 + $0x34] sm:$0xf]  ;;  %v3729_v6 = vor.u32 %v3906_v45, %v3728_v37  ;;  %v3722_v49 = vld [vmem:[%s5722_s13 + $0x28] sm:$0xf0]  ;;  %v3918_v45 = vld [vmem:[%s5723_s15 + $0x18] sm:$0xff] }
 0xacb   :  { %v3733_v41 = vor.u32 %v3905_v56, %v3730_v59  ;;  %v3925_v56 = vld [vmem:[%s5723_s15 + $0x50] sm:$0xff]  ;;  %v3924_v59 = vld [vmem:[%s5723_s15 + $0x48] sm:$0xff] }
 0xada   :  { %v4019_v32 = vpop.permute.xlu1 %4018 }
 0xadb   :  { %v4021_v39 = vunpack.i.h.bf16 %v4019_v32  ;;  %v4020_v25 = vunpack.i.l.bf16 %v4019_v32  ;;  %v3907_v32 = vld [vmem:[%s5722_s13 + $0x44] sm:$0xf] }
 0xadd   :  { %v2874_v10 = vsel %vm1304_vm6, %v2872_v24, %v4020_v25  ;;  %v2875_v54 = vsel %vm1304_vm6, %v2873_v50, %v4021_v39  ;;  %v3720_v39 = vld [vmem:[%s5722_s13 + $0x20] sm:$0xf]  ;;  %v3904_v25 = vld [vmem:[%s5722_s13 + $0x24] sm:$0xf0]  ;;  %v3712_v24 = vld [vmem:[%s5722_s13 + $0x10] sm:$0xf] }
 0xade   :  { %v3902_v50 = vld [vmem:[%s5722_s13 + $0x14] sm:$0xf0] }
 0xae0   :  { %v4024_v35 = vpop.permute.xlu2 %4023 }
 0xae1   :  { %v4026_v44 = vunpack.i.h.bf16 %v4024_v35  ;;  %v4025_v30 = vunpack.i.l.bf16 %v4024_v35  ;;  %v3741_v35 = vor.u32 %v3907_v32, %v3738_v29 }
 0xae3   :  { %v2876_v4 = vsel %vm1307_vm7, %v2874_v10, %v4025_v30  ;;  %v2877_v34 = vsel %vm1307_vm7, %v2875_v54, %v4026_v44  ;;  %3131 = vmatpush.bf16.msrb.mxu1 %v3741_v35  ;;  %v3903_v44 = vld [vmem:[%s5722_s13 + $0x24] sm:$0xf]  ;;  %v3721_v30 = vor.u32 %v3904_v25, %v3720_v39  ;;  %v3713_v10 = vor.u32 %v3902_v50, %v3712_v24  ;;  %v3714_v54 = vld [vmem:[%s5722_s13 + $0x18] sm:$0xf0]  ;;  %v3028_v25 = vld [vmem:[%s5725_s14] sm:$0x3] }
 0xae4   :  { %v3725_v14 = vor.u32 %v3903_v44, %v3722_v49  ;;  %v3923_v39 = vld [vmem:[%s5723_s15 + $0x40] sm:$0xff]  ;;  %v3030_v49 = vperm.slane %v3028_v25, 0 }
 0xae7   :  { %3132 = vmatpush.bf16.msrb.mxu1 %v3733_v41  ;;  %v3915_v41 = vld [vmem:[%s5723_s15] sm:$0xff] }
 0xaeb   :  { %3133 = vmatpush.bf16.msrb.mxu1 %v3725_v14  ;;  %v3031_v14 = vperm.slane %v3028_v25, 1 }
 0xb08   :  { %v4029_v58 = vpop.permute.xlu0 %4028 }
 0xb09   :  { %v4031_v46 = vunpack.i.h.bf16 %v4029_v58  ;;  %v4030_v0 = vunpack.i.l.bf16 %v4029_v58  ;;  %v3901_v58 = vld [vmem:[%s5722_s13 + $0x14] sm:$0xf] }
 0xb0b   :  { %v2878_v7 = vsel %vm1310_vm8, %v2876_v4, %v4030_v0  ;;  %v2879_v11 = vsel %vm1310_vm8, %v2877_v34, %v4031_v46  ;;  %v3717_v0 = vor.u32 %v3901_v58, %v3714_v54  ;;  %v3704_v34 = vld [vmem:[%s5722_s13] sm:$0xf] }
 0xb0c   :  { %v2880_v27 = vpack.c.bf16 %v2879_v11, %v2878_v7  ;;  %v3900_v7 = vld [vmem:[%s5722_s13 + $0x4] sm:$0xf0]  ;;  %v3899_v11 = vld [vmem:[%s5722_s13 + $0x4] sm:$0xf] }
 0xb0d   :  { %3134 = vmatpush.bf16.msrb.mxu1 %v3717_v0 }
 0xb0e   :  { %2957 = vmatmul.bf16.vlgmr.msra.gmra.mxu3 %v2880_v27 }
 0xb91   :  { %v2958_v60 = vpop.f32.mrf.mxu3 }
 0xb92   :  { %v2959_v53 = vadd.f32 %v4039_v61, %v2958_v60  ;;  %v3706_v60 = vld [vmem:[%s5722_s13 + $0x8] sm:$0xf0] }
 0xb94   :  { %v2963_v42 = vadd.f32 %v2959_v53, %v5020_v36  ;;  %v3709_v53 = vor.u32 %v3899_v11, %v3706_v60 }
 0xb96   :  { %2965 = vadd.xlane.f32.xlu1 %v2963_v42  ;;  %3135 = vmatpush.bf16.msrb.mxu1 %v3709_v53 }
 0xb99   :  { %v2960_v48 = vpop.f32.mrf.mxu3 }
 0xb9a   :  { %v2961_v12 = vadd.f32 %v4039_v61, %v2960_v48  ;;  %v3705_v61 = vor.u32 %v3900_v7, %v3704_v34  ;;  %v3930_v48 = vld [vmem:[%s5723_s15 + $0x78] sm:$0xff] }
 0xb9b   :  { %3294 = vmatpush.bf16.msrb.mxu3 %v3930_v48 }
 0xb9c   :  { %v2964_v22 = vadd.f32 %v2961_v12, %v5028_v40  ;;  %v3760_v40 = vld [vmem:[%s5722_s13 + $0x70] sm:$0xf] }
 0xb9d   :  { %v3761_v23 = vor.u32 %v3914_v15, %v3760_v40  ;;  %v3928_v40 = vld [vmem:[%s5723_s15 + $0x68] sm:$0xff] }
 0xb9e   :  { %2967 = vadd.xlane.f32.xlu2 %v2964_v22 }
 0xb9f   :  { %3114 = vmatpush.bf16.msrb.mxu0 %v3761_v23  ;;  %v3919_v23 = vld [vmem:[%s5723_s15 + $0x20] sm:$0xff] }
 0xba3   :  { %3115 = vmatpush.bf16.msrb.mxu0 %v3753_v28 }
 0xba7   :  { %3116 = vmatpush.bf16.msrb.mxu0 %v3745_v33 }
 0xbab   :  { %3117 = vmatpush.bf16.msrb.mxu0 %v3737_v9 }
 0xbaf   :  { %3118 = vmatpush.bf16.msrb.mxu0 %v3729_v6  ;;  %v3916_v6 = vld [vmem:[%s5723_s15 + $0x8] sm:$0xff] }
 0xbb3   :  { %3119 = vmatpush.bf16.msrb.mxu0 %v3721_v30 }
 0xbb7   :  { %3120 = vmatpush.bf16.msrb.mxu0 %v3713_v10 }
 0xbbb   :  { %3121 = vmatpush.bf16.msrb.mxu0 %v3705_v61  ;;  %v4040_v61 = vld [vmem:[%s5724_s16] ss:$0 sm:$0xff] }
 0xc09   :  { %v2966_v20 = vpop.xlane.xlu1 %2965 }
 0xc0a   :  { %v2969_v51 = vmul.f32 %v2966_v20, %v4879_v3  ;;  %v3921_v20 = vld [vmem:[%s5723_s15 + $0x30] sm:$0xff] }
 0xc0c   :  { %v5526_v17 = vsub.f32 %v2963_v42, %v2969_v51  ;;  %v3922_v42 = vld [vmem:[%s5723_s15 + $0x38] sm:$0xff]  ;;  %v3929_v51 = vld [vmem:[%s5723_s15 + $0x70] sm:$0xff] }
 0xc0d   :  { %3280 = vmatpush.bf16.msrb.mxu2 %v3922_v42  ;;  %3295 = vmatpush.bf16.msrb.mxu3 %v3929_v51 }
 0xc0e   :  { %v2973_v5 = vmul.f32 %v5526_v17, %v5526_v17 }
 0xc10   :  { %2975 = vadd.xlane.f32.xlu0 %v2973_v5 }
 0xc11   :  { %v2968_v1 = vpop.xlane.xlu2 %2967  ;;  %3281 = vmatpush.bf16.msrb.mxu2 %v3921_v20  ;;  %3296 = vmatpush.bf16.msrb.mxu3 %v3928_v40 }
 0xc12   :  { %v2970_v26 = vmul.f32 %v2968_v1, %v4879_v3 }
 0xc14   :  { %v5531_v2 = vsub.f32 %v2964_v22, %v2970_v26 }
 0xc15   :  { %3297 = vmatpush.bf16.msrb.mxu3 %v3927_v63 }
 0xc16   :  { %v2974_v36 = vmul.f32 %v5531_v2, %v5531_v2 }
 0xc18   :  { %2977 = vadd.xlane.f32.xlu2 %v2974_v36  ;;  %v3920_v36 = vld [vmem:[%s5723_s15 + $0x28] sm:$0xff] }
 0xc19   :  { %3282 = vmatpush.bf16.msrb.mxu2 %v3920_v36 }
 0xc1d   :  { %3283 = vmatpush.bf16.msrb.mxu2 %v3919_v23 }
 0xc21   :  { %3284 = vmatpush.bf16.msrb.mxu2 %v3918_v45 }
 0xc83   :  { %v2976_v46 = vpop.xlane.xlu0 %2975 }
 0xc84   :  { %v2979_v4 = vmul.f32 %v2976_v46, %v4879_v3 }
 0xc86   :  { %v2981_v27 = vadd.f32 1e-05, %v2979_v4 }
 0xc88   :  { %4175 = vrsqrt.f32 %v2981_v27  ;;  %vm2989_vm1 = vweird.f32 %v2981_v27 }
 0xc8b   :  { %v2978_v12 = vpop.xlane.xlu2 %2977 }
 0xc8c   :  { %v2980_v22 = vmul.f32 %v2978_v12, %v4879_v3 }
 0xc8e   :  { %v4176_v5 = vpop.eup %4175  ;;  %v2982_v1 = vadd.f32 1e-05, %v2980_v22 }
 0xc8f   :  { %v2984_v26 = vmul.f32 %v4176_v5, %v2981_v27  ;;  %vm2990_vm0 = vweird.f32 %v4176_v5 }
 0xc90   :  { %4177 = vrsqrt.f32 %v2982_v1  ;;  %vm2991_vm2 = vmor %vm2989_vm1, %vm2990_vm0  ;;  %vm2999_vm4 = vweird.f32 %v2982_v1 }
 0xc91   :  { %v2985_v15 = vmul.f32 %v4176_v5, %v2984_v26 }
 0xc93   :  { %v2986_v38 = vmul.f32 0.5, %v2985_v15 }
 0xc95   :  { %v2987_v16 = vsub.f32 1.5, %v2986_v38 }
 0xc96   :  { %v4178_v13 = vpop.eup %4177 }
 0xc97   :  { %v2988_v55 = vmul.f32 %v4176_v5, %v2987_v16  ;;  %v2994_v19 = vmul.f32 %v4178_v13, %v2982_v1  ;;  %vm3000_vm3 = vweird.f32 %v4178_v13 }
 0xc98   :  { %vm3001_vm5 = vmor %vm2999_vm4, %vm3000_vm3 }
 0xc99   :  { %v2995_v28 = vmul.f32 %v4178_v13, %v2994_v19  ;;  %v2992_v57 = vsel %vm2991_vm2, %v4176_v5, %v2988_v55 }
 0xc9a   :  { %v3003_v33 = vmul.f32 %v2992_v57, %v5526_v17  ;;  %v3926_v17 = vld [vmem:[%s5723_s15 + $0x58] sm:$0xff] }
 0xc9b   :  { %v2996_v62 = vmul.f32 0.5, %v2995_v28  ;;  %3298 = vmatpush.bf16.msrb.mxu3 %v3926_v17 }
 0xc9c   :  { %v3006_v31 = vmul.f32 %v3005_v52, %v3003_v33 }
 0xc9d   :  { %v2997_v47 = vsub.f32 1.5, %v2996_v62 }
 0xc9e   :  { %v3009_v29 = vadd.f32 %v3008_v43, %v3006_v31 }
 0xc9f   :  { %v2998_v21 = vmul.f32 %v4178_v13, %v2997_v47  ;;  %3299 = vmatpush.bf16.msrb.mxu3 %v3925_v56 }
 0xca1   :  { %v3002_v8 = vsel %vm3001_vm5, %v4178_v13, %v2998_v21 }
 0xca2   :  { %v3004_v32 = vmul.f32 %v3002_v8, %v5531_v2  ;;  %v3917_v2 = vld [vmem:[%s5723_s15 + $0x10] sm:$0xff] }
 0xca3   :  { %3285 = vmatpush.bf16.msrb.mxu2 %v3917_v2  ;;  %3300 = vmatpush.bf16.msrb.mxu3 %v3924_v59 }
 0xca4   :  { %v3007_v9 = vmul.f32 %v3005_v52, %v3004_v32 }
 0xca6   :  { %v3010_v35 = vadd.f32 %v3008_v43, %v3007_v9  ;;  %v3350_v9 = vperm.slane %v5660_v18, 4 }
 0xca7   :  { %3286 = vmatpush.bf16.msrb.mxu2 %v3916_v6  ;;  %3301 = vmatpush.bf16.msrb.mxu3 %v3923_v39 }
 0xca8   :  { %v3011_v37 = vpack.c.bf16 %v3010_v35, %v3009_v29 }
 0xcaa   :  { %3122 = vmatmul.bf16.vlgmr.msrb.gmra.mxu0 %v3011_v37  ;;  %3136 = vmatmul.bf16.vlgmr.msrb.gmra.mxu1 %v3011_v37  ;;  %v3353_v37 = vperm.slane %v5660_v18, 5 }
 0xcab   :  { %3287 = vmatpush.bf16.msrb.mxu2 %v3915_v41 }
 0xd27   :  { %v3123_v44 = vpop.f32.mrf.mxu0  ;;  %v3137_v30 = vpop.f32.mrf.mxu1 }
 0xd28   :  { %v3124_v24 = vadd.f32 %v3123_v44, %v3030_v49  ;;  %v3138_v50 = vadd.f32 %v3137_v30, %v3031_v14 }
 0xd2a   :  { %v3142_v0 = vmax.f32 %v3124_v24, 0.0  ;;  %v3143_v4 = vmax.f32 %v3138_v50, 0.0 }
 0xd2f   :  { %v3125_v58 = vpop.f32.mrf.mxu0  ;;  %v3139_v10 = vpop.f32.mrf.mxu1 }
 0xd30   :  { %v3126_v54 = vadd.f32 %v3125_v58, %v3030_v49  ;;  %v3140_v46 = vadd.f32 %v3139_v10, %v3031_v14 }
 0xd32   :  { %v3144_v34 = vmax.f32 %v3126_v54, 0.0  ;;  %v3145_v7 = vmax.f32 %v3140_v46, 0.0 }
 0xd34   :  { %v3146_v11 = vpack.c.bf16 %v3144_v34, %v3142_v0  ;;  %v3147_v27 = vpack.c.bf16 %v3145_v7, %v3143_v4 }
 0xd36   :  { %3288 = vmatmul.bf16.vlgmr.msrb.gmra.mxu2 %v3146_v11  ;;  %3302 = vmatmul.bf16.vlgmr.msrb.gmra.mxu3 %v3147_v27 }
 0xdb9   :  { %v3289_v60 = vpop.f32.mrf.mxu2  ;;  %v3303_v53 = vpop.f32.mrf.mxu3 }
 0xdba   :  { %v3290_v42 = vadd.f32 %v4040_v61, %v3289_v60 }
 0xdbc   :  { %v3304_v48 = vadd.f32 %v3303_v53, %v3290_v42 }
 0xdbe   :  { %v3308_v12 = vadd.f32 %v3304_v48, %v3009_v29 }
 0xdc0   :  { %3310 = vadd.xlane.f32.xlu1 %v3308_v12 }
 0xdc1   :  { %v3291_v22 = vpop.f32.mrf.mxu2  ;;  %v3305_v51 = vpop.f32.mrf.mxu3 }
 0xdc2   :  { %v3292_v20 = vadd.f32 %v4040_v61, %v3291_v22 }
 0xdc4   :  { %v3306_v5 = vadd.f32 %v3305_v51, %v3292_v20 }
 0xdc6   :  { %v3309_v1 = vadd.f32 %v3306_v5, %v3010_v35 }
 0xdc8   :  { %3312 = vadd.xlane.f32.xlu0 %v3309_v1 }
 0xe33   :  { %v3311_v26 = vpop.xlane.xlu1 %3310 }
 0xe34   :  { %v3314_v36 = vmul.f32 %v3311_v26, %v4879_v3 }
 0xe36   :  { %v3316_v40 = vsub.f32 %v3308_v12, %v3314_v36 }
 0xe38   :  { %v3318_v15 = vmul.f32 %v3316_v40, %v3316_v40 }
 0xe3a   :  { %3320 = vadd.xlane.f32.xlu2 %v3318_v15 }
 0xe3b   :  { %v3313_v38 = vpop.xlane.xlu0 %3312 }
 0xe3c   :  { %v3315_v23 = vmul.f32 %v3313_v38, %v4879_v3 }
 0xe3e   :  { %v3317_v63 = vsub.f32 %v3309_v1, %v3315_v23 }
 0xe40   :  { %v3319_v16 = vmul.f32 %v3317_v63, %v3317_v63 }
 0xe42   :  { %3322 = vadd.xlane.f32.xlu1 %v3319_v16 }
 0xead   :  { %v3321_v13 = vpop.xlane.xlu2 %3320 }
 0xeae   :  { %v3324_v55 = vmul.f32 %v3321_v13, %v4879_v3 }
 0xeb0   :  { %v3326_v19 = vadd.f32 1e-05, %v3324_v55 }
 0xeb2   :  { %4179 = vrsqrt.f32 %v3326_v19  ;;  %vm3334_vm7 = vweird.f32 %v3326_v19 }
 0xeb5   :  { %v3323_v28 = vpop.xlane.xlu1 %3322 }
 0xeb6   :  { %v3325_v57 = vmul.f32 %v3323_v28, %v4879_v3 }
 0xeb8   :  { %v4180_v62 = vpop.eup %4179  ;;  %v3327_v47 = vadd.f32 1e-05, %v3325_v57 }
 0xeb9   :  { %v3329_v52 = vmul.f32 %v4180_v62, %v3326_v19  ;;  %vm3335_vm6 = vweird.f32 %v4180_v62 }
 0xeba   :  { %4181 = vrsqrt.f32 %v3327_v47  ;;  %vm3336_vm8 = vmor %vm3334_vm7, %vm3335_vm6  ;;  %vm3344_vm10 = vweird.f32 %v3327_v47 }
 0xebb   :  { %v3330_v33 = vmul.f32 %v4180_v62, %v3329_v52 }
 0xebd   :  { %v3331_v21 = vmul.f32 0.5, %v3330_v33 }
 0xebf   :  { %v3332_v8 = vsub.f32 1.5, %v3331_v21 }
 0xec0   :  { %v4182_v43 = vpop.eup %4181 }
 0xec1   :  { %v3333_v31 = vmul.f32 %v4180_v62, %v3332_v8  ;;  %v3339_v32 = vmul.f32 %v4182_v43, %v3327_v47  ;;  %vm3345_vm9 = vweird.f32 %v4182_v43 }
 0xec2   :  { %vm3346_vm11 = vmor %vm3344_vm10, %vm3345_vm9 }
 0xec3   :  { %v3337_v29 = vsel %vm3336_vm8, %v4180_v62, %v3333_v31  ;;  %v3340_v35 = vmul.f32 %v4182_v43, %v3339_v32 }
 0xec4   :  { %v3348_v3 = vmul.f32 %v3337_v29, %v3316_v40 }
 0xec5   :  { %v3341_v45 = vmul.f32 0.5, %v3340_v35 }
 0xec6   :  { %v3351_v17 = vmul.f32 %v3350_v9, %v3348_v3 }
 0xec7   :  { %v3342_v2 = vsub.f32 1.5, %v3341_v45 }
 0xec8   :  { %v3354_v56 = vadd.f32 %v3353_v37, %v3351_v17 }
 0xec9   :  { %v3343_v6 = vmul.f32 %v4182_v43, %v3342_v2 }
 0xeca   :  { %3356 = vst [vmem:[%s5726_s18] sm:$0xff] %v3354_v56 }
 0xecb   :  { %v3347_v59 = vsel %vm3346_vm11, %v4182_v43, %v3343_v6 }
 0xecc   :  { %v3349_v41 = vmul.f32 %v3347_v59, %v3317_v63 }
 0xece   :  { %v3352_v39 = vmul.f32 %v3350_v9, %v3349_v41 }
 0xed0   :  { %v3355_v25 = vadd.f32 %v3353_v37, %v3352_v39 }
 0xed2   :  { %3357 = vst [vmem:[%s5726_s18 + $0x8] sm:$0xff] %v3355_v25 }

</bundles_post_ra>
